<compile_context>
chip_gen: v7x
topology: tpu7x:2x2x1
jax: 0.10.0
libtpu: 0.0.40
codegen_flags: <defaults>
</compile_context>

<pallas_src>
import jax
import jax.numpy as jnp
from jax.experimental import pallas as pl
from jax.experimental.pallas import tpu as pltpu


def _round_up(x, m):
    return ((x + m - 1) // m) * m


def make_relevance_kernel(num_layers, time_chunk, b_pad, h_pad, unroll):
    """Kernel for one time chunk: stacked GRU recurrence + output Linear."""
    NL, TC, B, H = num_layers, time_chunk, b_pad, h_pad

    def kernel(*refs):
        n = 4 * NL
        len_ref = refs[0]                      # [B, 1]   int32 valid lengths
        x_ref = refs[1]                        # [TC*B, E] bf16 time-major chunk
        layer_refs = refs[2:2 + n]
        w_out_ref = refs[2 + n]                # [H, Lpad] bf16
        b_out_ref = refs[3 + n]                # [1, Lpad] f32
        out_ref = refs[4 + n]                  # [TC*B, Lpad] f32
        gi_ref, seq_ref, h_state_ref = refs[5 + n:5 + n + 3]

        chunk = pl.program_id(0)

        @pl.when(chunk == 0)
        def _init():
            h_state_ref[...] = jnp.zeros_like(h_state_ref)

        lengths = len_ref[...]                 # [B, 1] int32
        t_base = chunk * TC

        for l in range(NL):
            w_ih_ref = layer_refs[4 * l + 0]   # [in, 3H] bf16  (fused r|z|n)
            w_hh_ref = layer_refs[4 * l + 1]   # [H, 3H]  bf16  (fused r|z|n)
            b_g_ref = layer_refs[4 * l + 2]    # [1, 3H]  f32 (r,z: b_ih+b_hh; n: b_ih)
            b_hn_ref = layer_refs[4 * l + 3]   # [1, H]   f32 (b_hh for n gate)

            # Hoisted, fused input-to-hidden projection for the whole chunk:
            # one [TC*B, in] x [in, 3H] MXU pass per layer (bf16 operands).
            inp = x_ref[...] if l == 0 else seq_ref[...].astype(jnp.bfloat16)
            gi_ref[...] = jnp.dot(inp, w_ih_ref[...],
                                  preferred_element_type=jnp.float32) + b_g_ref[...]

            w_hh = w_hh_ref[...]
            b_hn = b_hn_ref[...]
            is_last = (l == NL - 1)

            def step(t, h, w_hh=w_hh, b_hn=b_hn, is_last=is_last):
                off = pl.multiple_of(t * B, B)
                rows = pl.ds(off, B)
                gi_t = gi_ref[rows, :]                               # [B, 3H]
                # Single fused hidden matmul on the serialized critical path.
                gh = jnp.dot(h.astype(jnp.bfloat16), w_hh,
                             preferred_element_type=jnp.float32)     # [B, 3H]
                r = jax.nn.sigmoid(gi_t[:, 0:H] + gh[:, 0:H])
                z = jax.nn.sigmoid(gi_t[:, H:2 * H] + gh[:, H:2 * H])
                nn_ = jnp.tanh(gi_t[:, 2 * H:3 * H]
                               + r * (gh[:, 2 * H:3 * H] + b_hn))
                h_new = nn_ + z * (h - nn_)                          # == (1-z)*n + z*h
                if is_last:
                    # pad_packed_sequence zero-fills beyond each length; padding
                    # is a time suffix, so only the final layer needs masking.
                    seq_ref[rows, :] = jnp.where(lengths > t_base + t, h_new, 0.0)
                else:
                    seq_ref[rows, :] = h_new
                return h_new

            h_final = jax.lax.fori_loop(0, TC, step, h_state_ref[l],
                                        unroll=unroll)
            h_state_ref[l] = h_final           # carry across chunks

        # Output Linear over the masked chunk, lane-dense (Lpad) store.
        out_ref[...] = jnp.dot(seq_ref[...].astype(jnp.bfloat16), w_out_ref[...],
                               preferred_element_type=jnp.float32) + b_out_ref[...]

    return kernel


def _forward_impl(embeddings, lengths, params, time_chunk, buffer_consts):
    B, T, E = embeddings.shape
    H = params["hidden_size"]
    L = params["num_labels"]
    NL = params["num_layers"]

    B_pad = _round_up(B, 8)              # sublane-aligned batch
    H_pad = _round_up(H, 128)            # lane-dense hidden (128-aligned gate slices)
    L_pad = _round_up(L, 128)            # lane-dense output
    TC = max(1, min(time_chunk, T))
    T_pad = _round_up(T, TC)
    num_chunks = T_pad // TC

    # Time-major, batch/time padded, flattened to [T_pad*B_pad, E], bf16.
    x = jnp.transpose(embeddings.astype(jnp.float32), (1, 0, 2))       # [T, B, E]
    x = jnp.pad(x, ((0, T_pad - T), (0, B_pad - B), (0, 0)))
    x2 = x.reshape(T_pad * B_pad, E).astype(jnp.bfloat16)

    # Lengths as a [B_pad, 1] column (padded rows get length 0 -> fully masked).
    len_col = jnp.zeros((B_pad, 1), jnp.int32).at[:B, 0].set(lengths.astype(jnp.int32))

    def const_spec(shape):
        rank = len(shape)

        def idx(c):
            return (0,) * rank

        if buffer_consts:
            # Grid-resident constants: single-buffer to halve their VMEM.
            return pl.BlockSpec(shape, idx, pipeline_mode=pl.Buffered(buffer_count=1))
        return pl.BlockSpec(shape, idx)

    inputs = [len_col, x2]
    in_specs = [
        const_spec((B_pad, 1)),
        pl.BlockSpec((TC * B_pad, E), lambda c: (c, 0)),
    ]
    const_nbytes = int(len_col.size) * 4

    for l in range(NL):
        w_ih = params[f"w_ih_{l}"].astype(jnp.float32)                  # [3H, in]
        in_dim = w_ih.shape[1]
        in_pad = E if l == 0 else H_pad
        # PyTorch gate order r, z, n.  Gate-fused layout: [in_pad, 3*H_pad].
        w_ih_g = jnp.transpose(w_ih.reshape(3, H, in_dim), (0, 2, 1))   # [3, in, H]
        w_ih_g = jnp.pad(w_ih_g, ((0, 0), (0, in_pad - in_dim), (0, H_pad - H)))
        w_ih_all = jnp.concatenate([w_ih_g[0], w_ih_g[1], w_ih_g[2]],
                                   axis=1).astype(jnp.bfloat16)         # [in_pad, 3H_pad]

        w_hh = params[f"w_hh_{l}"].astype(jnp.float32)                  # [3H, H]
        w_hh_g = jnp.transpose(w_hh.reshape(3, H, H), (0, 2, 1))        # [3, H, H]
        w_hh_g = jnp.pad(w_hh_g, ((0, 0), (0, H_pad - H), (0, H_pad - H)))
        w_hh_all = jnp.concatenate([w_hh_g[0], w_hh_g[1], w_hh_g[2]],
                                   axis=1).astype(jnp.bfloat16)         # [H_pad, 3H_pad]

        b_ih = params[f"b_ih_{l}"].astype(jnp.float32).reshape(3, H)
        b_hh = params[f"b_hh_{l}"].astype(jnp.float32).reshape(3, H)
        # Pre-fold b_ih+b_hh for r and z; n gate keeps b_hh separate (scaled by r).
        b_g = jnp.stack([b_ih[0] + b_hh[0], b_ih[1] + b_hh[1], b_ih[2]], axis=0)
        b_g = jnp.pad(b_g, ((0, 0), (0, H_pad - H)))
        b_g_all = b_g.reshape(1, 3 * H_pad)                             # [1, 3H_pad]
        b_hn = jnp.pad(b_hh[2], (0, H_pad - H)).reshape(1, H_pad)       # [1, H_pad]

        inputs += [w_ih_all, w_hh_all, b_g_all, b_hn]
        in_specs += [const_spec((in_pad, 3 * H_pad)),
                     const_spec((H_pad, 3 * H_pad)),
                     const_spec((1, 3 * H_pad)),
                     const_spec((1, H_pad))]
        const_nbytes += (int(w_ih_all.size) + int(w_hh_all.size)) * 2
        const_nbytes += (int(b_g_all.size) + int(b_hn.size)) * 4

    w_out_p = jnp.zeros((H_pad, L_pad), jnp.float32).at[:H, :L].set(
        params["w_out"].astype(jnp.float32).T).astype(jnp.bfloat16)
    b_out_p = jnp.zeros((1, L_pad), jnp.float32).at[0, :L].set(
        params["b_out"].astype(jnp.float32))
    inputs += [w_out_p, b_out_p]
    in_specs += [const_spec((H_pad, L_pad)), const_spec((1, L_pad))]
    const_nbytes += int(w_out_p.size) * 2 + int(b_out_p.size) * 4

    # Explicit VMEM budget: resident constants + double-buffered x/out chunks +
    # f32 scratch, with headroom; kept within safe limits on v5e/v6e/v7x.
    x_chunk = TC * B_pad * E * 2
    out_chunk = TC * B_pad * L_pad * 4
    scratch_bytes = 4 * (TC * B_pad * 3 * H_pad + TC * B_pad * H_pad + NL * B_pad * H_pad)
    const_factor = 1 if buffer_consts else 2
    est = const_factor * const_nbytes + 2 * (x_chunk + out_chunk) + scratch_bytes
    vmem_limit = int(min(60 * 2**20, max(32 * 2**20, 2 * est)))

    kernel = make_relevance_kernel(NL, TC, B_pad, H_pad, unroll=min(4, TC))
    out = pl.pallas_call(
        kernel,
        out_shape=jax.ShapeDtypeStruct((T_pad * B_pad, L_pad), jnp.float32),
        grid_spec=pltpu.PrefetchScalarGridSpec(
            num_scalar_prefetch=0,
            grid=(num_chunks,),
            in_specs=in_specs,
            out_specs=pl.BlockSpec((TC * B_pad, L_pad), lambda c: (c, 0)),
            scratch_shapes=[
                pltpu.VMEM((TC * B_pad, 3 * H_pad), jnp.float32),   # fused gi
                pltpu.VMEM((TC * B_pad, H_pad), jnp.float32),       # layer seq output
                pltpu.VMEM((NL, B_pad, H_pad), jnp.float32),        # h carried across chunks
            ]),
        compiler_params=pltpu.CompilerParams(
            dimension_semantics=("arbitrary",),       # sequential time recurrence
            vmem_limit_bytes=vmem_limit),
    )(*inputs)
    out = jax.block_until_ready(out)

    logits = out.reshape(T_pad, B_pad, L_pad)[:T, :B, :L]   # drop time/batch/lane padding
    return jnp.transpose(logits, (1, 0, 2))                  # [B, T, L]


def relevance_classifier_forward(embeddings, lengths, params, time_chunk=4):
    """embeddings: [B, T, E] padded BERT pooled outputs (batch-first).
       lengths:    [B] int32 valid lengths (sorted desc, like pack_padded_sequence).
       Returns logits [B, T, num_labels]."""
    try:
        return _forward_impl(embeddings, lengths, params, time_chunk, buffer_consts=True)
    except Exception:
        # pl.Buffered(1) single-buffering of resident weights unsupported on this
        # JAX version; retry with default double-buffered constants.
        return _forward_impl(embeddings, lengths, params, time_chunk, buffer_consts=False)


def ref_forward(embeddings, lengths, params):
    """Pure-JAX f32 reference (packed GRU + Linear) for correctness check."""
    B, T, E = embeddings.shape
    H = params["hidden_size"]
    NL = params["num_layers"]
    mask = (jnp.arange(T)[None, :] < lengths[:, None]).astype(jnp.float32)  # [B,T]

    out = embeddings.astype(jnp.float32)
    for l in range(NL):
        w_ih = params[f"w_ih_{l}"]
        w_hh = params[f"w_hh_{l}"]
        b_ih = params[f"b_ih_{l}"]
        b_hh = params[f"b_hh_{l}"]

        def step(h, xt_mt, w_ih=w_ih, w_hh=w_hh, b_ih=b_ih, b_hh=b_hh):
            xt, mt = xt_mt
            gi = xt @ w_ih.T + b_ih
            gh = h @ w_hh.T + b_hh
            r = jax.nn.sigmoid(gi[:, :H] + gh[:, :H])
            z = jax.nn.sigmoid(gi[:, H:2 * H] + gh[:, H:2 * H])
            n = jnp.tanh(gi[:, 2 * H:] + r * gh[:, 2 * H:])
            hn = (1.0 - z) * n + z * h
            h2 = mt[:, None] * hn + (1.0 - mt[:, None]) * h
            return h2, mt[:, None] * h2

        _, ys = jax.lax.scan(step, jnp.zeros((B, H), jnp.float32),
                             (jnp.transpose(out, (1, 0, 2)), mask.T))
        out = jnp.transpose(ys, (1, 0, 2))

    return out @ params["w_out"].T + params["b_out"]


def init_params(key, bert_hidden, hidden_size, num_layers, num_labels):
    params = {"hidden_size": hidden_size, "num_layers": num_layers,
              "num_labels": num_labels}
    scale = 1.0 / jnp.sqrt(hidden_size)
    for l in range(num_layers):
        in_dim = bert_hidden if l == 0 else hidden_size
        key, k1, k2, k3, k4 = jax.random.split(key, 5)
        params[f"w_ih_{l}"] = jax.random.uniform(
            k1, (3 * hidden_size, in_dim), jnp.float32, -scale, scale)
        params[f"w_hh_{l}"] = jax.random.uniform(
            k2, (3 * hidden_size, hidden_size), jnp.float32, -scale, scale)
        params[f"b_ih_{l}"] = jax.random.uniform(
            k3, (3 * hidden_size,), jnp.float32, -scale, scale)
        params[f"b_hh_{l}"] = jax.random.uniform(
            k4, (3 * hidden_size,), jnp.float32, -scale, scale)
    key, k1, k2 = jax.random.split(key, 3)
    out_scale = 1.0 / jnp.sqrt(hidden_size)
    params["w_out"] = jax.random.uniform(
        k1, (num_labels, hidden_size), jnp.float32, -out_scale, out_scale)
    params["b_out"] = jax.random.uniform(
        k2, (num_labels,), jnp.float32, -out_scale, out_scale)
    return params


if __name__ == "__main__":
    # Small synthetic shapes consistent with the forward pass:
    # B timelines, T timeline steps, E = BERT pooler hidden size.
    B, T, E = 2, 8, 32
    HIDDEN, NUM_LAYERS, NUM_LABELS = 32, 2, 2

    key = jax.random.PRNGKey(0)
    key, k_emb, k_lab = jax.random.split(key, 3)
    params = init_params(key, E, HIDDEN, NUM_LAYERS, NUM_LABELS)

    # Precomputed (frozen) BERT pooled embeddings, padded batch-first.
    bert_embeddings = jax.random.normal(k_emb, (B, T, E), jnp.float32)
    lengths = jnp.array([8, 5], dtype=jnp.int32)  # sorted desc (pack_padded_sequence)

    # Labels padded with -100 (pad_sequence(..., padding_value=-100) equivalent).
    raw_labels = jax.random.randint(k_lab, (B, T), 0, NUM_LABELS)
    label_mask = jnp.arange(T)[None, :] < lengths[:, None]
    labels = jnp.where(label_mask, raw_labels, -100)

    logits = relevance_classifier_forward(bert_embeddings, lengths, params,
                                          time_chunk=4)
    logits = jax.block_until_ready(logits)

    ref = ref_forward(bert_embeddings, lengths, params)
    assert logits.shape == (B, T, NUM_LABELS)
    assert labels.shape == (B, T)
    # bf16 MXU operands in the kernel vs f32 reference -> relaxed tolerance.
    assert jnp.allclose(logits, ref, atol=5e-2, rtol=5e-2), (
        "Pallas kernel output does not match JAX reference")

    print("KERNEL_OK")
</pallas_src>

<mosaic_0001>
module attributes {stable_mosaic.version = 11 : i64} {
  func.func @kernel(%arg0: i32, %arg1: memref<8x1xi32, #tpu.memory_space<vmem>>, %arg2: memref<32x32xbf16, #tpu.memory_space<vmem>>, %arg3: memref<32x384xbf16, #tpu.memory_space<vmem>>, %arg4: memref<128x384xbf16, #tpu.memory_space<vmem>>, %arg5: memref<1x384xf32, #tpu.memory_space<vmem>>, %arg6: memref<1x128xf32, #tpu.memory_space<vmem>>, %arg7: memref<128x384xbf16, #tpu.memory_space<vmem>>, %arg8: memref<128x384xbf16, #tpu.memory_space<vmem>>, %arg9: memref<1x384xf32, #tpu.memory_space<vmem>>, %arg10: memref<1x128xf32, #tpu.memory_space<vmem>>, %arg11: memref<128x128xbf16, #tpu.memory_space<vmem>>, %arg12: memref<1x128xf32, #tpu.memory_space<vmem>>, %arg13: memref<32x128xf32, #tpu.memory_space<vmem>>, %arg14: memref<32x384xf32, #tpu.memory_space<vmem>>, %arg15: memref<32x128xf32, #tpu.memory_space<vmem>>, %arg16: memref<2x8x128xf32, #tpu.memory_space<vmem>>) attributes {dimension_semantics = [#tpu.dimension_semantics<arbitrary>], iteration_bounds = array<i64: 2>, scalar_prefetch = 0 : i64, scratch_operands = 3 : i64, tpu.core_type = #tpu.core_type<tc>, window_params = [{pipeline_mode = #tpu.pipeline_mode<synchronous>, transform_indices = @transform_0, window_bounds = array<i64: 8, 1>}, {transform_indices = @transform_1, window_bounds = array<i64: 32, 32>}, {pipeline_mode = #tpu.pipeline_mode<synchronous>, transform_indices = @transform_2, window_bounds = array<i64: 32, 384>}, {pipeline_mode = #tpu.pipeline_mode<synchronous>, transform_indices = @transform_3, window_bounds = array<i64: 128, 384>}, {pipeline_mode = #tpu.pipeline_mode<synchronous>, transform_indices = @transform_4, window_bounds = array<i64: 1, 384>}, {pipeline_mode = #tpu.pipeline_mode<synchronous>, transform_indices = @transform_5, window_bounds = array<i64: 1, 128>}, {pipeline_mode = #tpu.pipeline_mode<synchronous>, transform_indices = @transform_6, window_bounds = array<i64: 128, 384>}, {pipeline_mode = #tpu.pipeline_mode<synchronous>, transform_indices = @transform_7, window_bounds = array<i64: 128, 384>}, {pipeline_mode = #tpu.pipeline_mode<synchronous>, transform_indices = @transform_8, window_bounds = array<i64: 1, 384>}, {pipeline_mode = #tpu.pipeline_mode<synchronous>, transform_indices = @transform_9, window_bounds = array<i64: 1, 128>}, {pipeline_mode = #tpu.pipeline_mode<synchronous>, transform_indices = @transform_10, window_bounds = array<i64: 128, 128>}, {pipeline_mode = #tpu.pipeline_mode<synchronous>, transform_indices = @transform_11, window_bounds = array<i64: 1, 128>}, {transform_indices = @transform_12, window_bounds = array<i64: 32, 128>}]} {
    %c0_i32 = arith.constant 0 : i32
    %0 = arith.cmpi eq, %arg0, %c0_i32 : i32
    %1 = arith.extui %0 : i1 to i32
    %c0_i32_0 = arith.constant 0 : i32
    %2 = arith.cmpi ne, %1, %c0_i32_0 : i32
    scf.if %2 {
      %cst_105 = arith.constant 0.000000e+00 : f32
      %342 = vector.broadcast %cst_105 : f32 to vector<2x8x128xf32>
      %c0_106 = arith.constant 0 : index
      %c0_107 = arith.constant 0 : index
      %c0_108 = arith.constant 0 : index
      %343 = vector.load %arg16[%c0_106, %c0_107, %c0_108] : memref<2x8x128xf32, #tpu.memory_space<vmem>>, vector<2x8x128xf32>
      tpu.vector_store %arg16[%c0_106, %c0_107, %c0_108], %342 {strides = array<i32>} : memref<2x8x128xf32, #tpu.memory_space<vmem>>, vector<2x8x128xf32>,
    } else {
    }
    %c0 = arith.constant 0 : index
    %c0_1 = arith.constant 0 : index
    %3 = vector.load %arg1[%c0, %c0_1] : memref<8x1xi32, #tpu.memory_space<vmem>>, vector<8x1xi32>
    %c4_i32 = arith.constant 4 : i32
    %4 = arith.muli %arg0, %c4_i32 : i32
    %c0_2 = arith.constant 0 : index
    %c0_3 = arith.constant 0 : index
    %5 = vector.load %arg2[%c0_2, %c0_3] : memref<32x32xbf16, #tpu.memory_space<vmem>>, vector<32x32xbf16>
    %c0_4 = arith.constant 0 : index
    %c0_5 = arith.constant 0 : index
    %6 = vector.load %arg3[%c0_4, %c0_5] : memref<32x384xbf16, #tpu.memory_space<vmem>>, vector<32x384xbf16>
    %cst = arith.constant dense<0.000000e+00> : vector<32x384xf32>
    %7 = tpu.matmul %5, %6, %cst {dimension_numbers = #tpu.dot_dimension_numbers<[1], [0], [0], [1], [0, 0, 1, 1], [], []>} : vector<32x32xbf16>, vector<32x384xbf16>, vector<32x384xf32> -> vector<32x384xf32>
    %c0_6 = arith.constant 0 : index
    %c0_7 = arith.constant 0 : index
    %8 = vector.load %arg5[%c0_6, %c0_7] : memref<1x384xf32, #tpu.memory_space<vmem>>, vector<1x384xf32>
    %9 = vector.broadcast %8 : vector<1x384xf32> to vector<32x384xf32>
    %10 = arith.addf %7, %9 : vector<32x384xf32>
    %c0_8 = arith.constant 0 : index
    %c0_9 = arith.constant 0 : index
    %11 = vector.load %arg14[%c0_8, %c0_9] : memref<32x384xf32, #tpu.memory_space<vmem>>, vector<32x384xf32>
    tpu.vector_store %arg14[%c0_8, %c0_9], %10 {strides = array<i32>} : memref<32x384xf32, #tpu.memory_space<vmem>>, vector<32x384xf32>,
    %c0_10 = arith.constant 0 : index
    %c0_11 = arith.constant 0 : index
    %12 = vector.load %arg4[%c0_10, %c0_11] : memref<128x384xbf16, #tpu.memory_space<vmem>>, vector<128x384xbf16>
    %c0_12 = arith.constant 0 : index
    %c0_13 = arith.constant 0 : index
    %13 = vector.load %arg6[%c0_12, %c0_13] : memref<1x128xf32, #tpu.memory_space<vmem>>, vector<1x128xf32>
    %c0_14 = arith.constant 0 : index
    %c0_15 = arith.constant 0 : index
    %c0_16 = arith.constant 0 : index
    %14 = vector.load %arg16[%c0_14, %c0_15, %c0_16] : memref<2x8x128xf32, #tpu.memory_space<vmem>>, vector<1x8x128xf32>
    %15 = vector.shape_cast %14 : vector<1x8x128xf32> to vector<8x128xf32>
    %c0_i32_17 = arith.constant 0 : i32
    %c8_i32 = arith.constant 8 : i32
    %16 = arith.muli %c0_i32_17, %c8_i32 : i32
    %17 = tpu.assume_multiple %16, 8 : i32
    %18 = arith.index_cast %17 : i32 to index
    %c0_18 = arith.constant 0 : index
    %19 = vector.load %arg14[%18, %c0_18] : memref<32x384xf32, #tpu.memory_space<vmem>>, vector<8x384xf32>
    %20 = arith.truncf %15 : vector<8x128xf32> to vector<8x128xbf16>
    %cst_19 = arith.constant dense<0.000000e+00> : vector<8x384xf32>
    %21 = tpu.matmul %20, %12, %cst_19 {dimension_numbers = #tpu.dot_dimension_numbers<[1], [0], [0], [1], [0, 0, 1, 1], [], []>} : vector<8x128xbf16>, vector<128x384xbf16>, vector<8x384xf32> -> vector<8x384xf32>
    %22 = vector.extract_strided_slice %19 {offsets = [0, 0], sizes = [8, 128], strides = [1, 1]} : vector<8x384xf32> to vector<8x128xf32>
    %23 = vector.extract_strided_slice %21 {offsets = [0, 0], sizes = [8, 128], strides = [1, 1]} : vector<8x384xf32> to vector<8x128xf32>
    %24 = arith.addf %22, %23 : vector<8x128xf32>
    %25 = arith.negf %24 : vector<8x128xf32>
    %26 = math.exp %25 : vector<8x128xf32>
    %cst_20 = arith.constant 1.000000e+00 : f32
    %27 = vector.broadcast %cst_20 : f32 to vector<8x128xf32>
    %28 = arith.addf %27, %26 : vector<8x128xf32>
    %29 = arith.divf %27, %28 : vector<8x128xf32>
    %30 = vector.extract_strided_slice %19 {offsets = [0, 128], sizes = [8, 128], strides = [1, 1]} : vector<8x384xf32> to vector<8x128xf32>
    %31 = vector.extract_strided_slice %21 {offsets = [0, 128], sizes = [8, 128], strides = [1, 1]} : vector<8x384xf32> to vector<8x128xf32>
    %32 = arith.addf %30, %31 : vector<8x128xf32>
    %33 = arith.negf %32 : vector<8x128xf32>
    %34 = math.exp %33 : vector<8x128xf32>
    %cst_21 = arith.constant 1.000000e+00 : f32
    %35 = vector.broadcast %cst_21 : f32 to vector<8x128xf32>
    %36 = arith.addf %35, %34 : vector<8x128xf32>
    %37 = arith.divf %35, %36 : vector<8x128xf32>
    %38 = vector.extract_strided_slice %19 {offsets = [0, 256], sizes = [8, 128], strides = [1, 1]} : vector<8x384xf32> to vector<8x128xf32>
    %39 = vector.extract_strided_slice %21 {offsets = [0, 256], sizes = [8, 128], strides = [1, 1]} : vector<8x384xf32> to vector<8x128xf32>
    %40 = vector.broadcast %13 : vector<1x128xf32> to vector<8x128xf32>
    %41 = arith.addf %39, %40 : vector<8x128xf32>
    %42 = arith.mulf %29, %41 : vector<8x128xf32>
    %43 = arith.addf %38, %42 : vector<8x128xf32>
    %44 = math.tanh %43 : vector<8x128xf32>
    %45 = arith.subf %15, %44 : vector<8x128xf32>
    %46 = arith.mulf %37, %45 : vector<8x128xf32>
    %47 = arith.addf %44, %46 : vector<8x128xf32>
    %48 = arith.index_cast %17 : i32 to index
    %c0_22 = arith.constant 0 : index
    %49 = vector.load %arg15[%48, %c0_22] : memref<32x128xf32, #tpu.memory_space<vmem>>, vector<8x128xf32>
    tpu.vector_store %arg15[%48, %c0_22], %47 {strides = array<i32>} : memref<32x128xf32, #tpu.memory_space<vmem>>, vector<8x128xf32>,
    %c1_i32 = arith.constant 1 : i32
    %c8_i32_23 = arith.constant 8 : i32
    %50 = arith.muli %c1_i32, %c8_i32_23 : i32
    %51 = tpu.assume_multiple %50, 8 : i32
    %52 = arith.index_cast %51 : i32 to index
    %c0_24 = arith.constant 0 : index
    %53 = vector.load %arg14[%52, %c0_24] : memref<32x384xf32, #tpu.memory_space<vmem>>, vector<8x384xf32>
    %54 = arith.truncf %47 : vector<8x128xf32> to vector<8x128xbf16>
    %cst_25 = arith.constant dense<0.000000e+00> : vector<8x384xf32>
    %55 = tpu.matmul %54, %12, %cst_25 {dimension_numbers = #tpu.dot_dimension_numbers<[1], [0], [0], [1], [0, 0, 1, 1], [], []>} : vector<8x128xbf16>, vector<128x384xbf16>, vector<8x384xf32> -> vector<8x384xf32>
    %56 = vector.extract_strided_slice %53 {offsets = [0, 0], sizes = [8, 128], strides = [1, 1]} : vector<8x384xf32> to vector<8x128xf32>
    %57 = vector.extract_strided_slice %55 {offsets = [0, 0], sizes = [8, 128], strides = [1, 1]} : vector<8x384xf32> to vector<8x128xf32>
    %58 = arith.addf %56, %57 : vector<8x128xf32>
    %59 = arith.negf %58 : vector<8x128xf32>
    %60 = math.exp %59 : vector<8x128xf32>
    %cst_26 = arith.constant 1.000000e+00 : f32
    %61 = vector.broadcast %cst_26 : f32 to vector<8x128xf32>
    %62 = arith.addf %61, %60 : vector<8x128xf32>
    %63 = arith.divf %61, %62 : vector<8x128xf32>
    %64 = vector.extract_strided_slice %53 {offsets = [0, 128], sizes = [8, 128], strides = [1, 1]} : vector<8x384xf32> to vector<8x128xf32>
    %65 = vector.extract_strided_slice %55 {offsets = [0, 128], sizes = [8, 128], strides = [1, 1]} : vector<8x384xf32> to vector<8x128xf32>
    %66 = arith.addf %64, %65 : vector<8x128xf32>
    %67 = arith.negf %66 : vector<8x128xf32>
    %68 = math.exp %67 : vector<8x128xf32>
    %cst_27 = arith.constant 1.000000e+00 : f32
    %69 = vector.broadcast %cst_27 : f32 to vector<8x128xf32>
    %70 = arith.addf %69, %68 : vector<8x128xf32>
    %71 = arith.divf %69, %70 : vector<8x128xf32>
    %72 = vector.extract_strided_slice %53 {offsets = [0, 256], sizes = [8, 128], strides = [1, 1]} : vector<8x384xf32> to vector<8x128xf32>
    %73 = vector.extract_strided_slice %55 {offsets = [0, 256], sizes = [8, 128], strides = [1, 1]} : vector<8x384xf32> to vector<8x128xf32>
    %74 = vector.broadcast %13 : vector<1x128xf32> to vector<8x128xf32>
    %75 = arith.addf %73, %74 : vector<8x128xf32>
    %76 = arith.mulf %63, %75 : vector<8x128xf32>
    %77 = arith.addf %72, %76 : vector<8x128xf32>
    %78 = math.tanh %77 : vector<8x128xf32>
    %79 = arith.subf %47, %78 : vector<8x128xf32>
    %80 = arith.mulf %71, %79 : vector<8x128xf32>
    %81 = arith.addf %78, %80 : vector<8x128xf32>
    %82 = arith.index_cast %51 : i32 to index
    %c0_28 = arith.constant 0 : index
    %83 = vector.load %arg15[%82, %c0_28] : memref<32x128xf32, #tpu.memory_space<vmem>>, vector<8x128xf32>
    tpu.vector_store %arg15[%82, %c0_28], %81 {strides = array<i32>} : memref<32x128xf32, #tpu.memory_space<vmem>>, vector<8x128xf32>,
    %c2_i32 = arith.constant 2 : i32
    %c8_i32_29 = arith.constant 8 : i32
    %84 = arith.muli %c2_i32, %c8_i32_29 : i32
    %85 = tpu.assume_multiple %84, 8 : i32
    %86 = arith.index_cast %85 : i32 to index
    %c0_30 = arith.constant 0 : index
    %87 = vector.load %arg14[%86, %c0_30] : memref<32x384xf32, #tpu.memory_space<vmem>>, vector<8x384xf32>
    %88 = arith.truncf %81 : vector<8x128xf32> to vector<8x128xbf16>
    %cst_31 = arith.constant dense<0.000000e+00> : vector<8x384xf32>
    %89 = tpu.matmul %88, %12, %cst_31 {dimension_numbers = #tpu.dot_dimension_numbers<[1], [0], [0], [1], [0, 0, 1, 1], [], []>} : vector<8x128xbf16>, vector<128x384xbf16>, vector<8x384xf32> -> vector<8x384xf32>
    %90 = vector.extract_strided_slice %87 {offsets = [0, 0], sizes = [8, 128], strides = [1, 1]} : vector<8x384xf32> to vector<8x128xf32>
    %91 = vector.extract_strided_slice %89 {offsets = [0, 0], sizes = [8, 128], strides = [1, 1]} : vector<8x384xf32> to vector<8x128xf32>
    %92 = arith.addf %90, %91 : vector<8x128xf32>
    %93 = arith.negf %92 : vector<8x128xf32>
    %94 = math.exp %93 : vector<8x128xf32>
    %cst_32 = arith.constant 1.000000e+00 : f32
    %95 = vector.broadcast %cst_32 : f32 to vector<8x128xf32>
    %96 = arith.addf %95, %94 : vector<8x128xf32>
    %97 = arith.divf %95, %96 : vector<8x128xf32>
    %98 = vector.extract_strided_slice %87 {offsets = [0, 128], sizes = [8, 128], strides = [1, 1]} : vector<8x384xf32> to vector<8x128xf32>
    %99 = vector.extract_strided_slice %89 {offsets = [0, 128], sizes = [8, 128], strides = [1, 1]} : vector<8x384xf32> to vector<8x128xf32>
    %100 = arith.addf %98, %99 : vector<8x128xf32>
    %101 = arith.negf %100 : vector<8x128xf32>
    %102 = math.exp %101 : vector<8x128xf32>
    %cst_33 = arith.constant 1.000000e+00 : f32
    %103 = vector.broadcast %cst_33 : f32 to vector<8x128xf32>
    %104 = arith.addf %103, %102 : vector<8x128xf32>
    %105 = arith.divf %103, %104 : vector<8x128xf32>
    %106 = vector.extract_strided_slice %87 {offsets = [0, 256], sizes = [8, 128], strides = [1, 1]} : vector<8x384xf32> to vector<8x128xf32>
    %107 = vector.extract_strided_slice %89 {offsets = [0, 256], sizes = [8, 128], strides = [1, 1]} : vector<8x384xf32> to vector<8x128xf32>
    %108 = vector.broadcast %13 : vector<1x128xf32> to vector<8x128xf32>
    %109 = arith.addf %107, %108 : vector<8x128xf32>
    %110 = arith.mulf %97, %109 : vector<8x128xf32>
    %111 = arith.addf %106, %110 : vector<8x128xf32>
    %112 = math.tanh %111 : vector<8x128xf32>
    %113 = arith.subf %81, %112 : vector<8x128xf32>
    %114 = arith.mulf %105, %113 : vector<8x128xf32>
    %115 = arith.addf %112, %114 : vector<8x128xf32>
    %116 = arith.index_cast %85 : i32 to index
    %c0_34 = arith.constant 0 : index
    %117 = vector.load %arg15[%116, %c0_34] : memref<32x128xf32, #tpu.memory_space<vmem>>, vector<8x128xf32>
    tpu.vector_store %arg15[%116, %c0_34], %115 {strides = array<i32>} : memref<32x128xf32, #tpu.memory_space<vmem>>, vector<8x128xf32>,
    %c3_i32 = arith.constant 3 : i32
    %c8_i32_35 = arith.constant 8 : i32
    %118 = arith.muli %c3_i32, %c8_i32_35 : i32
    %119 = tpu.assume_multiple %118, 8 : i32
    %120 = arith.index_cast %119 : i32 to index
    %c0_36 = arith.constant 0 : index
    %121 = vector.load %arg14[%120, %c0_36] : memref<32x384xf32, #tpu.memory_space<vmem>>, vector<8x384xf32>
    %122 = arith.truncf %115 : vector<8x128xf32> to vector<8x128xbf16>
    %cst_37 = arith.constant dense<0.000000e+00> : vector<8x384xf32>
    %123 = tpu.matmul %122, %12, %cst_37 {dimension_numbers = #tpu.dot_dimension_numbers<[1], [0], [0], [1], [0, 0, 1, 1], [], []>} : vector<8x128xbf16>, vector<128x384xbf16>, vector<8x384xf32> -> vector<8x384xf32>
    %124 = vector.extract_strided_slice %121 {offsets = [0, 0], sizes = [8, 128], strides = [1, 1]} : vector<8x384xf32> to vector<8x128xf32>
    %125 = vector.extract_strided_slice %123 {offsets = [0, 0], sizes = [8, 128], strides = [1, 1]} : vector<8x384xf32> to vector<8x128xf32>
    %126 = arith.addf %124, %125 : vector<8x128xf32>
    %127 = arith.negf %126 : vector<8x128xf32>
    %128 = math.exp %127 : vector<8x128xf32>
    %cst_38 = arith.constant 1.000000e+00 : f32
    %129 = vector.broadcast %cst_38 : f32 to vector<8x128xf32>
    %130 = arith.addf %129, %128 : vector<8x128xf32>
    %131 = arith.divf %129, %130 : vector<8x128xf32>
    %132 = vector.extract_strided_slice %121 {offsets = [0, 128], sizes = [8, 128], strides = [1, 1]} : vector<8x384xf32> to vector<8x128xf32>
    %133 = vector.extract_strided_slice %123 {offsets = [0, 128], sizes = [8, 128], strides = [1, 1]} : vector<8x384xf32> to vector<8x128xf32>
    %134 = arith.addf %132, %133 : vector<8x128xf32>
    %135 = arith.negf %134 : vector<8x128xf32>
    %136 = math.exp %135 : vector<8x128xf32>
    %cst_39 = arith.constant 1.000000e+00 : f32
    %137 = vector.broadcast %cst_39 : f32 to vector<8x128xf32>
    %138 = arith.addf %137, %136 : vector<8x128xf32>
    %139 = arith.divf %137, %138 : vector<8x128xf32>
    %140 = vector.extract_strided_slice %121 {offsets = [0, 256], sizes = [8, 128], strides = [1, 1]} : vector<8x384xf32> to vector<8x128xf32>
    %141 = vector.extract_strided_slice %123 {offsets = [0, 256], sizes = [8, 128], strides = [1, 1]} : vector<8x384xf32> to vector<8x128xf32>
    %142 = vector.broadcast %13 : vector<1x128xf32> to vector<8x128xf32>
    %143 = arith.addf %141, %142 : vector<8x128xf32>
    %144 = arith.mulf %131, %143 : vector<8x128xf32>
    %145 = arith.addf %140, %144 : vector<8x128xf32>
    %146 = math.tanh %145 : vector<8x128xf32>
    %147 = arith.subf %115, %146 : vector<8x128xf32>
    %148 = arith.mulf %139, %147 : vector<8x128xf32>
    %149 = arith.addf %146, %148 : vector<8x128xf32>
    %150 = arith.index_cast %119 : i32 to index
    %c0_40 = arith.constant 0 : index
    %151 = vector.load %arg15[%150, %c0_40] : memref<32x128xf32, #tpu.memory_space<vmem>>, vector<8x128xf32>
    tpu.vector_store %arg15[%150, %c0_40], %149 {strides = array<i32>} : memref<32x128xf32, #tpu.memory_space<vmem>>, vector<8x128xf32>,
    %c4_i32_41 = arith.constant 4 : i32
    %c0_42 = arith.constant 0 : index
    %c0_43 = arith.constant 0 : index
    %c0_44 = arith.constant 0 : index
    %152 = vector.load %arg16[%c0_42, %c0_43, %c0_44] : memref<2x8x128xf32, #tpu.memory_space<vmem>>, vector<1x8x128xf32>
    %153 = vector.shape_cast %152 : vector<1x8x128xf32> to vector<8x128xf32>
    %154 = vector.shape_cast %149 : vector<8x128xf32> to vector<1x8x128xf32>
    tpu.vector_store %arg16[%c0_42, %c0_43, %c0_44], %154 {strides = array<i32>} : memref<2x8x128xf32, #tpu.memory_space<vmem>>, vector<1x8x128xf32>,
    %c0_45 = arith.constant 0 : index
    %c0_46 = arith.constant 0 : index
    %155 = vector.load %arg15[%c0_45, %c0_46] : memref<32x128xf32, #tpu.memory_space<vmem>>, vector<32x128xf32>
    %156 = arith.truncf %155 : vector<32x128xf32> to vector<32x128xbf16>
    %c0_47 = arith.constant 0 : index
    %c0_48 = arith.constant 0 : index
    %157 = vector.load %arg7[%c0_47, %c0_48] : memref<128x384xbf16, #tpu.memory_space<vmem>>, vector<128x384xbf16>
    %cst_49 = arith.constant dense<0.000000e+00> : vector<32x384xf32>
    %158 = tpu.matmul %156, %157, %cst_49 {dimension_numbers = #tpu.dot_dimension_numbers<[1], [0], [0], [1], [0, 0, 1, 1], [], []>} : vector<32x128xbf16>, vector<128x384xbf16>, vector<32x384xf32> -> vector<32x384xf32>
    %c0_50 = arith.constant 0 : index
    %c0_51 = arith.constant 0 : index
    %159 = vector.load %arg9[%c0_50, %c0_51] : memref<1x384xf32, #tpu.memory_space<vmem>>, vector<1x384xf32>
    %160 = vector.broadcast %159 : vector<1x384xf32> to vector<32x384xf32>
    %161 = arith.addf %158, %160 : vector<32x384xf32>
    %c0_52 = arith.constant 0 : index
    %c0_53 = arith.constant 0 : index
    %162 = vector.load %arg14[%c0_52, %c0_53] : memref<32x384xf32, #tpu.memory_space<vmem>>, vector<32x384xf32>
    tpu.vector_store %arg14[%c0_52, %c0_53], %161 {strides = array<i32>} : memref<32x384xf32, #tpu.memory_space<vmem>>, vector<32x384xf32>,
    %c0_54 = arith.constant 0 : index
    %c0_55 = arith.constant 0 : index
    %163 = vector.load %arg8[%c0_54, %c0_55] : memref<128x384xbf16, #tpu.memory_space<vmem>>, vector<128x384xbf16>
    %c0_56 = arith.constant 0 : index
    %c0_57 = arith.constant 0 : index
    %164 = vector.load %arg10[%c0_56, %c0_57] : memref<1x128xf32, #tpu.memory_space<vmem>>, vector<1x128xf32>
    %c1 = arith.constant 1 : index
    %c0_58 = arith.constant 0 : index
    %c0_59 = arith.constant 0 : index
    %165 = vector.load %arg16[%c1, %c0_58, %c0_59] : memref<2x8x128xf32, #tpu.memory_space<vmem>>, vector<1x8x128xf32>
    %166 = vector.shape_cast %165 : vector<1x8x128xf32> to vector<8x128xf32>
    %c0_i32_60 = arith.constant 0 : i32
    %c8_i32_61 = arith.constant 8 : i32
    %167 = arith.muli %c0_i32_60, %c8_i32_61 : i32
    %168 = tpu.assume_multiple %167, 8 : i32
    %169 = arith.index_cast %168 : i32 to index
    %c0_62 = arith.constant 0 : index
    %170 = vector.load %arg14[%169, %c0_62] : memref<32x384xf32, #tpu.memory_space<vmem>>, vector<8x384xf32>
    %171 = arith.truncf %166 : vector<8x128xf32> to vector<8x128xbf16>
    %cst_63 = arith.constant dense<0.000000e+00> : vector<8x384xf32>
    %172 = tpu.matmul %171, %163, %cst_63 {dimension_numbers = #tpu.dot_dimension_numbers<[1], [0], [0], [1], [0, 0, 1, 1], [], []>} : vector<8x128xbf16>, vector<128x384xbf16>, vector<8x384xf32> -> vector<8x384xf32>
    %173 = vector.extract_strided_slice %170 {offsets = [0, 0], sizes = [8, 128], strides = [1, 1]} : vector<8x384xf32> to vector<8x128xf32>
    %174 = vector.extract_strided_slice %172 {offsets = [0, 0], sizes = [8, 128], strides = [1, 1]} : vector<8x384xf32> to vector<8x128xf32>
    %175 = arith.addf %173, %174 : vector<8x128xf32>
    %176 = arith.negf %175 : vector<8x128xf32>
    %177 = math.exp %176 : vector<8x128xf32>
    %cst_64 = arith.constant 1.000000e+00 : f32
    %178 = vector.broadcast %cst_64 : f32 to vector<8x128xf32>
    %179 = arith.addf %178, %177 : vector<8x128xf32>
    %180 = arith.divf %178, %179 : vector<8x128xf32>
    %181 = vector.extract_strided_slice %170 {offsets = [0, 128], sizes = [8, 128], strides = [1, 1]} : vector<8x384xf32> to vector<8x128xf32>
    %182 = vector.extract_strided_slice %172 {offsets = [0, 128], sizes = [8, 128], strides = [1, 1]} : vector<8x384xf32> to vector<8x128xf32>
    %183 = arith.addf %181, %182 : vector<8x128xf32>
    %184 = arith.negf %183 : vector<8x128xf32>
    %185 = math.exp %184 : vector<8x128xf32>
    %cst_65 = arith.constant 1.000000e+00 : f32
    %186 = vector.broadcast %cst_65 : f32 to vector<8x128xf32>
    %187 = arith.addf %186, %185 : vector<8x128xf32>
    %188 = arith.divf %186, %187 : vector<8x128xf32>
    %189 = vector.extract_strided_slice %170 {offsets = [0, 256], sizes = [8, 128], strides = [1, 1]} : vector<8x384xf32> to vector<8x128xf32>
    %190 = vector.extract_strided_slice %172 {offsets = [0, 256], sizes = [8, 128], strides = [1, 1]} : vector<8x384xf32> to vector<8x128xf32>
    %191 = vector.broadcast %164 : vector<1x128xf32> to vector<8x128xf32>
    %192 = arith.addf %190, %191 : vector<8x128xf32>
    %193 = arith.mulf %180, %192 : vector<8x128xf32>
    %194 = arith.addf %189, %193 : vector<8x128xf32>
    %195 = math.tanh %194 : vector<8x128xf32>
    %196 = arith.subf %166, %195 : vector<8x128xf32>
    %197 = arith.mulf %188, %196 : vector<8x128xf32>
    %198 = arith.addf %195, %197 : vector<8x128xf32>
    %199 = arith.addi %4, %c0_i32_60 : i32
    %200 = vector.broadcast %199 : i32 to vector<8x1xi32>
    %201 = arith.cmpi sgt, %3, %200 : vector<8x1xi32>
    %cst_66 = arith.constant 0.000000e+00 : f32
    %202 = vector.shape_cast %201 : vector<8x1xi1> to vector<8x1xi1>
    %203 = vector.broadcast %202 : vector<8x1xi1> to vector<8x128xi1>
    %204 = vector.broadcast %cst_66 : f32 to vector<8x128xf32>
    %205 = arith.select %203, %198, %204 : vector<8x128xi1>, vector<8x128xf32>
    %206 = arith.index_cast %168 : i32 to index
    %c0_67 = arith.constant 0 : index
    %207 = vector.load %arg15[%206, %c0_67] : memref<32x128xf32, #tpu.memory_space<vmem>>, vector<8x128xf32>
    tpu.vector_store %arg15[%206, %c0_67], %205 {strides = array<i32>} : memref<32x128xf32, #tpu.memory_space<vmem>>, vector<8x128xf32>,
    %c1_i32_68 = arith.constant 1 : i32
    %c8_i32_69 = arith.constant 8 : i32
    %208 = arith.muli %c1_i32_68, %c8_i32_69 : i32
    %209 = tpu.assume_multiple %208, 8 : i32
    %210 = arith.index_cast %209 : i32 to index
    %c0_70 = arith.constant 0 : index
    %211 = vector.load %arg14[%210, %c0_70] : memref<32x384xf32, #tpu.memory_space<vmem>>, vector<8x384xf32>
    %212 = arith.truncf %198 : vector<8x128xf32> to vector<8x128xbf16>
    %cst_71 = arith.constant dense<0.000000e+00> : vector<8x384xf32>
    %213 = tpu.matmul %212, %163, %cst_71 {dimension_numbers = #tpu.dot_dimension_numbers<[1], [0], [0], [1], [0, 0, 1, 1], [], []>} : vector<8x128xbf16>, vector<128x384xbf16>, vector<8x384xf32> -> vector<8x384xf32>
    %214 = vector.extract_strided_slice %211 {offsets = [0, 0], sizes = [8, 128], strides = [1, 1]} : vector<8x384xf32> to vector<8x128xf32>
    %215 = vector.extract_strided_slice %213 {offsets = [0, 0], sizes = [8, 128], strides = [1, 1]} : vector<8x384xf32> to vector<8x128xf32>
    %216 = arith.addf %214, %215 : vector<8x128xf32>
    %217 = arith.negf %216 : vector<8x128xf32>
    %218 = math.exp %217 : vector<8x128xf32>
    %cst_72 = arith.constant 1.000000e+00 : f32
    %219 = vector.broadcast %cst_72 : f32 to vector<8x128xf32>
    %220 = arith.addf %219, %218 : vector<8x128xf32>
    %221 = arith.divf %219, %220 : vector<8x128xf32>
    %222 = vector.extract_strided_slice %211 {offsets = [0, 128], sizes = [8, 128], strides = [1, 1]} : vector<8x384xf32> to vector<8x128xf32>
    %223 = vector.extract_strided_slice %213 {offsets = [0, 128], sizes = [8, 128], strides = [1, 1]} : vector<8x384xf32> to vector<8x128xf32>
    %224 = arith.addf %222, %223 : vector<8x128xf32>
    %225 = arith.negf %224 : vector<8x128xf32>
    %226 = math.exp %225 : vector<8x128xf32>
    %cst_73 = arith.constant 1.000000e+00 : f32
    %227 = vector.broadcast %cst_73 : f32 to vector<8x128xf32>
    %228 = arith.addf %227, %226 : vector<8x128xf32>
    %229 = arith.divf %227, %228 : vector<8x128xf32>
    %230 = vector.extract_strided_slice %211 {offsets = [0, 256], sizes = [8, 128], strides = [1, 1]} : vector<8x384xf32> to vector<8x128xf32>
    %231 = vector.extract_strided_slice %213 {offsets = [0, 256], sizes = [8, 128], strides = [1, 1]} : vector<8x384xf32> to vector<8x128xf32>
    %232 = vector.broadcast %164 : vector<1x128xf32> to vector<8x128xf32>
    %233 = arith.addf %231, %232 : vector<8x128xf32>
    %234 = arith.mulf %221, %233 : vector<8x128xf32>
    %235 = arith.addf %230, %234 : vector<8x128xf32>
    %236 = math.tanh %235 : vector<8x128xf32>
    %237 = arith.subf %198, %236 : vector<8x128xf32>
    %238 = arith.mulf %229, %237 : vector<8x128xf32>
    %239 = arith.addf %236, %238 : vector<8x128xf32>
    %240 = arith.addi %4, %c1_i32_68 : i32
    %241 = vector.broadcast %240 : i32 to vector<8x1xi32>
    %242 = arith.cmpi sgt, %3, %241 : vector<8x1xi32>
    %cst_74 = arith.constant 0.000000e+00 : f32
    %243 = vector.shape_cast %242 : vector<8x1xi1> to vector<8x1xi1>
    %244 = vector.broadcast %243 : vector<8x1xi1> to vector<8x128xi1>
    %245 = vector.broadcast %cst_74 : f32 to vector<8x128xf32>
    %246 = arith.select %244, %239, %245 : vector<8x128xi1>, vector<8x128xf32>
    %247 = arith.index_cast %209 : i32 to index
    %c0_75 = arith.constant 0 : index
    %248 = vector.load %arg15[%247, %c0_75] : memref<32x128xf32, #tpu.memory_space<vmem>>, vector<8x128xf32>
    tpu.vector_store %arg15[%247, %c0_75], %246 {strides = array<i32>} : memref<32x128xf32, #tpu.memory_space<vmem>>, vector<8x128xf32>,
    %c2_i32_76 = arith.constant 2 : i32
    %c8_i32_77 = arith.constant 8 : i32
    %249 = arith.muli %c2_i32_76, %c8_i32_77 : i32
    %250 = tpu.assume_multiple %249, 8 : i32
    %251 = arith.index_cast %250 : i32 to index
    %c0_78 = arith.constant 0 : index
    %252 = vector.load %arg14[%251, %c0_78] : memref<32x384xf32, #tpu.memory_space<vmem>>, vector<8x384xf32>
    %253 = arith.truncf %239 : vector<8x128xf32> to vector<8x128xbf16>
    %cst_79 = arith.constant dense<0.000000e+00> : vector<8x384xf32>
    %254 = tpu.matmul %253, %163, %cst_79 {dimension_numbers = #tpu.dot_dimension_numbers<[1], [0], [0], [1], [0, 0, 1, 1], [], []>} : vector<8x128xbf16>, vector<128x384xbf16>, vector<8x384xf32> -> vector<8x384xf32>
    %255 = vector.extract_strided_slice %252 {offsets = [0, 0], sizes = [8, 128], strides = [1, 1]} : vector<8x384xf32> to vector<8x128xf32>
    %256 = vector.extract_strided_slice %254 {offsets = [0, 0], sizes = [8, 128], strides = [1, 1]} : vector<8x384xf32> to vector<8x128xf32>
    %257 = arith.addf %255, %256 : vector<8x128xf32>
    %258 = arith.negf %257 : vector<8x128xf32>
    %259 = math.exp %258 : vector<8x128xf32>
    %cst_80 = arith.constant 1.000000e+00 : f32
    %260 = vector.broadcast %cst_80 : f32 to vector<8x128xf32>
    %261 = arith.addf %260, %259 : vector<8x128xf32>
    %262 = arith.divf %260, %261 : vector<8x128xf32>
    %263 = vector.extract_strided_slice %252 {offsets = [0, 128], sizes = [8, 128], strides = [1, 1]} : vector<8x384xf32> to vector<8x128xf32>
    %264 = vector.extract_strided_slice %254 {offsets = [0, 128], sizes = [8, 128], strides = [1, 1]} : vector<8x384xf32> to vector<8x128xf32>
    %265 = arith.addf %263, %264 : vector<8x128xf32>
    %266 = arith.negf %265 : vector<8x128xf32>
    %267 = math.exp %266 : vector<8x128xf32>
    %cst_81 = arith.constant 1.000000e+00 : f32
    %268 = vector.broadcast %cst_81 : f32 to vector<8x128xf32>
    %269 = arith.addf %268, %267 : vector<8x128xf32>
    %270 = arith.divf %268, %269 : vector<8x128xf32>
    %271 = vector.extract_strided_slice %252 {offsets = [0, 256], sizes = [8, 128], strides = [1, 1]} : vector<8x384xf32> to vector<8x128xf32>
    %272 = vector.extract_strided_slice %254 {offsets = [0, 256], sizes = [8, 128], strides = [1, 1]} : vector<8x384xf32> to vector<8x128xf32>
    %273 = vector.broadcast %164 : vector<1x128xf32> to vector<8x128xf32>
    %274 = arith.addf %272, %273 : vector<8x128xf32>
    %275 = arith.mulf %262, %274 : vector<8x128xf32>
    %276 = arith.addf %271, %275 : vector<8x128xf32>
    %277 = math.tanh %276 : vector<8x128xf32>
    %278 = arith.subf %239, %277 : vector<8x128xf32>
    %279 = arith.mulf %270, %278 : vector<8x128xf32>
    %280 = arith.addf %277, %279 : vector<8x128xf32>
    %281 = arith.addi %4, %c2_i32_76 : i32
    %282 = vector.broadcast %281 : i32 to vector<8x1xi32>
    %283 = arith.cmpi sgt, %3, %282 : vector<8x1xi32>
    %cst_82 = arith.constant 0.000000e+00 : f32
    %284 = vector.shape_cast %283 : vector<8x1xi1> to vector<8x1xi1>
    %285 = vector.broadcast %284 : vector<8x1xi1> to vector<8x128xi1>
    %286 = vector.broadcast %cst_82 : f32 to vector<8x128xf32>
    %287 = arith.select %285, %280, %286 : vector<8x128xi1>, vector<8x128xf32>
    %288 = arith.index_cast %250 : i32 to index
    %c0_83 = arith.constant 0 : index
    %289 = vector.load %arg15[%288, %c0_83] : memref<32x128xf32, #tpu.memory_space<vmem>>, vector<8x128xf32>
    tpu.vector_store %arg15[%288, %c0_83], %287 {strides = array<i32>} : memref<32x128xf32, #tpu.memory_space<vmem>>, vector<8x128xf32>,
    %c3_i32_84 = arith.constant 3 : i32
    %c8_i32_85 = arith.constant 8 : i32
    %290 = arith.muli %c3_i32_84, %c8_i32_85 : i32
    %291 = tpu.assume_multiple %290, 8 : i32
    %292 = arith.index_cast %291 : i32 to index
    %c0_86 = arith.constant 0 : index
    %293 = vector.load %arg14[%292, %c0_86] : memref<32x384xf32, #tpu.memory_space<vmem>>, vector<8x384xf32>
    %294 = arith.truncf %280 : vector<8x128xf32> to vector<8x128xbf16>
    %cst_87 = arith.constant dense<0.000000e+00> : vector<8x384xf32>
    %295 = tpu.matmul %294, %163, %cst_87 {dimension_numbers = #tpu.dot_dimension_numbers<[1], [0], [0], [1], [0, 0, 1, 1], [], []>} : vector<8x128xbf16>, vector<128x384xbf16>, vector<8x384xf32> -> vector<8x384xf32>
    %296 = vector.extract_strided_slice %293 {offsets = [0, 0], sizes = [8, 128], strides = [1, 1]} : vector<8x384xf32> to vector<8x128xf32>
    %297 = vector.extract_strided_slice %295 {offsets = [0, 0], sizes = [8, 128], strides = [1, 1]} : vector<8x384xf32> to vector<8x128xf32>
    %298 = arith.addf %296, %297 : vector<8x128xf32>
    %299 = arith.negf %298 : vector<8x128xf32>
    %300 = math.exp %299 : vector<8x128xf32>
    %cst_88 = arith.constant 1.000000e+00 : f32
    %301 = vector.broadcast %cst_88 : f32 to vector<8x128xf32>
    %302 = arith.addf %301, %300 : vector<8x128xf32>
    %303 = arith.divf %301, %302 : vector<8x128xf32>
    %304 = vector.extract_strided_slice %293 {offsets = [0, 128], sizes = [8, 128], strides = [1, 1]} : vector<8x384xf32> to vector<8x128xf32>
    %305 = vector.extract_strided_slice %295 {offsets = [0, 128], sizes = [8, 128], strides = [1, 1]} : vector<8x384xf32> to vector<8x128xf32>
    %306 = arith.addf %304, %305 : vector<8x128xf32>
    %307 = arith.negf %306 : vector<8x128xf32>
    %308 = math.exp %307 : vector<8x128xf32>
    %cst_89 = arith.constant 1.000000e+00 : f32
    %309 = vector.broadcast %cst_89 : f32 to vector<8x128xf32>
    %310 = arith.addf %309, %308 : vector<8x128xf32>
    %311 = arith.divf %309, %310 : vector<8x128xf32>
    %312 = vector.extract_strided_slice %293 {offsets = [0, 256], sizes = [8, 128], strides = [1, 1]} : vector<8x384xf32> to vector<8x128xf32>
    %313 = vector.extract_strided_slice %295 {offsets = [0, 256], sizes = [8, 128], strides = [1, 1]} : vector<8x384xf32> to vector<8x128xf32>
    %314 = vector.broadcast %164 : vector<1x128xf32> to vector<8x128xf32>
    %315 = arith.addf %313, %314 : vector<8x128xf32>
    %316 = arith.mulf %303, %315 : vector<8x128xf32>
    %317 = arith.addf %312, %316 : vector<8x128xf32>
    %318 = math.tanh %317 : vector<8x128xf32>
    %319 = arith.subf %280, %318 : vector<8x128xf32>
    %320 = arith.mulf %311, %319 : vector<8x128xf32>
    %321 = arith.addf %318, %320 : vector<8x128xf32>
    %322 = arith.addi %4, %c3_i32_84 : i32
    %323 = vector.broadcast %322 : i32 to vector<8x1xi32>
    %324 = arith.cmpi sgt, %3, %323 : vector<8x1xi32>
    %cst_90 = arith.constant 0.000000e+00 : f32
    %325 = vector.shape_cast %324 : vector<8x1xi1> to vector<8x1xi1>
    %326 = vector.broadcast %325 : vector<8x1xi1> to vector<8x128xi1>
    %327 = vector.broadcast %cst_90 : f32 to vector<8x128xf32>
    %328 = arith.select %326, %321, %327 : vector<8x128xi1>, vector<8x128xf32>
    %329 = arith.index_cast %291 : i32 to index
    %c0_91 = arith.constant 0 : index
    %330 = vector.load %arg15[%329, %c0_91] : memref<32x128xf32, #tpu.memory_space<vmem>>, vector<8x128xf32>
    tpu.vector_store %arg15[%329, %c0_91], %328 {strides = array<i32>} : memref<32x128xf32, #tpu.memory_space<vmem>>, vector<8x128xf32>,
    %c4_i32_92 = arith.constant 4 : i32
    %c1_93 = arith.constant 1 : index
    %c0_94 = arith.constant 0 : index
    %c0_95 = arith.constant 0 : index
    %331 = vector.load %arg16[%c1_93, %c0_94, %c0_95] : memref<2x8x128xf32, #tpu.memory_space<vmem>>, vector<1x8x128xf32>
    %332 = vector.shape_cast %331 : vector<1x8x128xf32> to vector<8x128xf32>
    %333 = vector.shape_cast %321 : vector<8x128xf32> to vector<1x8x128xf32>
    tpu.vector_store %arg16[%c1_93, %c0_94, %c0_95], %333 {strides = array<i32>} : memref<2x8x128xf32, #tpu.memory_space<vmem>>, vector<1x8x128xf32>,
    %c0_96 = arith.constant 0 : index
    %c0_97 = arith.constant 0 : index
    %334 = vector.load %arg15[%c0_96, %c0_97] : memref<32x128xf32, #tpu.memory_space<vmem>>, vector<32x128xf32>
    %335 = arith.truncf %334 : vector<32x128xf32> to vector<32x128xbf16>
    %c0_98 = arith.constant 0 : index
    %c0_99 = arith.constant 0 : index
    %336 = vector.load %arg11[%c0_98, %c0_99] : memref<128x128xbf16, #tpu.memory_space<vmem>>, vector<128x128xbf16>
    %cst_100 = arith.constant dense<0.000000e+00> : vector<32x128xf32>
    %337 = tpu.matmul %335, %336, %cst_100 {dimension_numbers = #tpu.dot_dimension_numbers<[1], [0], [0], [1], [0, 0, 1, 1], [], []>} : vector<32x128xbf16>, vector<128x128xbf16>, vector<32x128xf32> -> vector<32x128xf32>
    %c0_101 = arith.constant 0 : index
    %c0_102 = arith.constant 0 : index
    %338 = vector.load %arg12[%c0_101, %c0_102] : memref<1x128xf32, #tpu.memory_space<vmem>>, vector<1x128xf32>
    %339 = vector.broadcast %338 : vector<1x128xf32> to vector<32x128xf32>
    %340 = arith.addf %337, %339 : vector<32x128xf32>
    %c0_103 = arith.constant 0 : index
    %c0_104 = arith.constant 0 : index
    %341 = vector.load %arg13[%c0_103, %c0_104] : memref<32x128xf32, #tpu.memory_space<vmem>>, vector<32x128xf32>
    tpu.vector_store %arg13[%c0_103, %c0_104], %340 {strides = array<i32>} : memref<32x128xf32, #tpu.memory_space<vmem>>, vector<32x128xf32>,
    return
  }
  func.func @transform_0(%arg0: i32) -> (i32, i32) {
    %c0_i32 = arith.constant 0 : i32
    %c0_i32_0 = arith.constant 0 : i32
    %c0_i32_1 = arith.constant 0 : i32
    return %c0_i32, %c0_i32_0 : i32, i32
  }
  func.func @transform_1(%arg0: i32) -> (i32, i32) {
    %c0_i32 = arith.constant 0 : i32
    %c0_i32_0 = arith.constant 0 : i32
    return %arg0, %c0_i32 : i32, i32
  }
  func.func @transform_2(%arg0: i32) -> (i32, i32) {
    %c0_i32 = arith.constant 0 : i32
    %c0_i32_0 = arith.constant 0 : i32
    %c0_i32_1 = arith.constant 0 : i32
    return %c0_i32, %c0_i32_0 : i32, i32
  }
  func.func @transform_3(%arg0: i32) -> (i32, i32) {
    %c0_i32 = arith.constant 0 : i32
    %c0_i32_0 = arith.constant 0 : i32
    %c0_i32_1 = arith.constant 0 : i32
    return %c0_i32, %c0_i32_0 : i32, i32
  }
  func.func @transform_4(%arg0: i32) -> (i32, i32) {
    %c0_i32 = arith.constant 0 : i32
    %c0_i32_0 = arith.constant 0 : i32
    %c0_i32_1 = arith.constant 0 : i32
    return %c0_i32, %c0_i32_0 : i32, i32
  }
  func.func @transform_5(%arg0: i32) -> (i32, i32) {
    %c0_i32 = arith.constant 0 : i32
    %c0_i32_0 = arith.constant 0 : i32
    %c0_i32_1 = arith.constant 0 : i32
    return %c0_i32, %c0_i32_0 : i32, i32
  }
  func.func @transform_6(%arg0: i32) -> (i32, i32) {
    %c0_i32 = arith.constant 0 : i32
    %c0_i32_0 = arith.constant 0 : i32
    %c0_i32_1 = arith.constant 0 : i32
    return %c0_i32, %c0_i32_0 : i32, i32
  }
  func.func @transform_7(%arg0: i32) -> (i32, i32) {
    %c0_i32 = arith.constant 0 : i32
    %c0_i32_0 = arith.constant 0 : i32
    %c0_i32_1 = arith.constant 0 : i32
    return %c0_i32, %c0_i32_0 : i32, i32
  }
  func.func @transform_8(%arg0: i32) -> (i32, i32) {
    %c0_i32 = arith.constant 0 : i32
    %c0_i32_0 = arith.constant 0 : i32
    %c0_i32_1 = arith.constant 0 : i32
    return %c0_i32, %c0_i32_0 : i32, i32
  }
  func.func @transform_9(%arg0: i32) -> (i32, i32) {
    %c0_i32 = arith.constant 0 : i32
    %c0_i32_0 = arith.constant 0 : i32
    %c0_i32_1 = arith.constant 0 : i32
    return %c0_i32, %c0_i32_0 : i32, i32
  }
  func.func @transform_10(%arg0: i32) -> (i32, i32) {
    %c0_i32 = arith.constant 0 : i32
    %c0_i32_0 = arith.constant 0 : i32
    %c0_i32_1 = arith.constant 0 : i32
    return %c0_i32, %c0_i32_0 : i32, i32
  }
  func.func @transform_11(%arg0: i32) -> (i32, i32) {
    %c0_i32 = arith.constant 0 : i32
    %c0_i32_0 = arith.constant 0 : i32
    %c0_i32_1 = arith.constant 0 : i32
    return %c0_i32, %c0_i32_0 : i32, i32
  }
  func.func @transform_12(%arg0: i32) -> (i32, i32) {
    %c0_i32 = arith.constant 0 : i32
    %c0_i32_0 = arith.constant 0 : i32
    return %arg0, %c0_i32 : i32, i32
  }
}

module attributes {stable_mosaic.version = 11 : i64} {
  func.func @kernel(%arg0: i32, %arg1: memref<8x1xi32, #tpu.memory_space<vmem>>, %arg2: memref<32x32xbf16, #tpu.memory_space<vmem>>, %arg3: memref<32x384xbf16, #tpu.memory_space<vmem>>, %arg4: memref<128x384xbf16, #tpu.memory_space<vmem>>, %arg5: memref<1x384xf32, #tpu.memory_space<vmem>>, %arg6: memref<1x128xf32, #tpu.memory_space<vmem>>, %arg7: memref<128x384xbf16, #tpu.memory_space<vmem>>, %arg8: memref<128x384xbf16, #tpu.memory_space<vmem>>, %arg9: memref<1x384xf32, #tpu.memory_space<vmem>>, %arg10: memref<1x128xf32, #tpu.memory_space<vmem>>, %arg11: memref<128x128xbf16, #tpu.memory_space<vmem>>, %arg12: memref<1x128xf32, #tpu.memory_space<vmem>>, %arg13: memref<32x128xf32, #tpu.memory_space<vmem>>, %arg14: memref<32x384xf32, #tpu.memory_space<vmem>>, %arg15: memref<32x128xf32, #tpu.memory_space<vmem>>, %arg16: memref<2x8x128xf32, #tpu.memory_space<vmem>>) attributes {dimension_semantics = [#tpu.dimension_semantics<arbitrary>], iteration_bounds = array<i64: 2>, scalar_prefetch = 0 : i64, scratch_operands = 3 : i64, tpu.core_type = #tpu.core_type<tc>, window_params = [{pipeline_mode = #tpu.pipeline_mode<synchronous>, transform_indices = @transform_0, window_bounds = array<i64: 8, 1>}, {transform_indices = @transform_1, window_bounds = array<i64: 32, 32>}, {pipeline_mode = #tpu.pipeline_mode<synchronous>, transform_indices = @transform_2, window_bounds = array<i64: 32, 384>}, {pipeline_mode = #tpu.pipeline_mode<synchronous>, transform_indices = @transform_3, window_bounds = array<i64: 128, 384>}, {pipeline_mode = #tpu.pipeline_mode<synchronous>, transform_indices = @transform_4, window_bounds = array<i64: 1, 384>}, {pipeline_mode = #tpu.pipeline_mode<synchronous>, transform_indices = @transform_5, window_bounds = array<i64: 1, 128>}, {pipeline_mode = #tpu.pipeline_mode<synchronous>, transform_indices = @transform_6, window_bounds = array<i64: 128, 384>}, {pipeline_mode = #tpu.pipeline_mode<synchronous>, transform_indices = @transform_7, window_bounds = array<i64: 128, 384>}, {pipeline_mode = #tpu.pipeline_mode<synchronous>, transform_indices = @transform_8, window_bounds = array<i64: 1, 384>}, {pipeline_mode = #tpu.pipeline_mode<synchronous>, transform_indices = @transform_9, window_bounds = array<i64: 1, 128>}, {pipeline_mode = #tpu.pipeline_mode<synchronous>, transform_indices = @transform_10, window_bounds = array<i64: 128, 128>}, {pipeline_mode = #tpu.pipeline_mode<synchronous>, transform_indices = @transform_11, window_bounds = array<i64: 1, 128>}, {transform_indices = @transform_12, window_bounds = array<i64: 32, 128>}]} {
    %c0_i32 = arith.constant 0 : i32
    %0 = arith.cmpi eq, %arg0, %c0_i32 : i32
    %1 = arith.extui %0 : i1 to i32
    %c0_i32_0 = arith.constant 0 : i32
    %2 = arith.cmpi ne, %1, %c0_i32_0 : i32
    scf.if %2 {
      %cst_105 = arith.constant 0.000000e+00 : f32
      %342 = vector.broadcast %cst_105 : f32 to vector<2x8x128xf32>
      %c0_106 = arith.constant 0 : index
      %c0_107 = arith.constant 0 : index
      %c0_108 = arith.constant 0 : index
      %343 = vector.load %arg16[%c0_106, %c0_107, %c0_108] : memref<2x8x128xf32, #tpu.memory_space<vmem>>, vector<2x8x128xf32>
      tpu.vector_store %arg16[%c0_106, %c0_107, %c0_108], %342 {strides = array<i32>} : memref<2x8x128xf32, #tpu.memory_space<vmem>>, vector<2x8x128xf32>,
    } else {
    }
    %c0 = arith.constant 0 : index
    %c0_1 = arith.constant 0 : index
    %3 = vector.load %arg1[%c0, %c0_1] : memref<8x1xi32, #tpu.memory_space<vmem>>, vector<8x1xi32>
    %c4_i32 = arith.constant 4 : i32
    %4 = arith.muli %arg0, %c4_i32 : i32
    %c0_2 = arith.constant 0 : index
    %c0_3 = arith.constant 0 : index
    %5 = vector.load %arg2[%c0_2, %c0_3] : memref<32x32xbf16, #tpu.memory_space<vmem>>, vector<32x32xbf16>
    %c0_4 = arith.constant 0 : index
    %c0_5 = arith.constant 0 : index
    %6 = vector.load %arg3[%c0_4, %c0_5] : memref<32x384xbf16, #tpu.memory_space<vmem>>, vector<32x384xbf16>
    %cst = arith.constant dense<0.000000e+00> : vector<32x384xf32>
    %7 = tpu.matmul %5, %6, %cst {dimension_numbers = #tpu.dot_dimension_numbers<[1], [0], [0], [1], [0, 0, 1, 1], [], []>} : vector<32x32xbf16>, vector<32x384xbf16>, vector<32x384xf32> -> vector<32x384xf32>
    %c0_6 = arith.constant 0 : index
    %c0_7 = arith.constant 0 : index
    %8 = vector.load %arg5[%c0_6, %c0_7] : memref<1x384xf32, #tpu.memory_space<vmem>>, vector<1x384xf32>
    %9 = vector.broadcast %8 : vector<1x384xf32> to vector<32x384xf32>
    %10 = arith.addf %7, %9 : vector<32x384xf32>
    %c0_8 = arith.constant 0 : index
    %c0_9 = arith.constant 0 : index
    %11 = vector.load %arg14[%c0_8, %c0_9] : memref<32x384xf32, #tpu.memory_space<vmem>>, vector<32x384xf32>
    tpu.vector_store %arg14[%c0_8, %c0_9], %10 {strides = array<i32>} : memref<32x384xf32, #tpu.memory_space<vmem>>, vector<32x384xf32>,
    %c0_10 = arith.constant 0 : index
    %c0_11 = arith.constant 0 : index
    %12 = vector.load %arg4[%c0_10, %c0_11] : memref<128x384xbf16, #tpu.memory_space<vmem>>, vector<128x384xbf16>
    %c0_12 = arith.constant 0 : index
    %c0_13 = arith.constant 0 : index
    %13 = vector.load %arg6[%c0_12, %c0_13] : memref<1x128xf32, #tpu.memory_space<vmem>>, vector<1x128xf32>
    %c0_14 = arith.constant 0 : index
    %c0_15 = arith.constant 0 : index
    %c0_16 = arith.constant 0 : index
    %14 = vector.load %arg16[%c0_14, %c0_15, %c0_16] : memref<2x8x128xf32, #tpu.memory_space<vmem>>, vector<1x8x128xf32>
    %15 = vector.shape_cast %14 : vector<1x8x128xf32> to vector<8x128xf32>
    %c0_i32_17 = arith.constant 0 : i32
    %c8_i32 = arith.constant 8 : i32
    %16 = arith.muli %c0_i32_17, %c8_i32 : i32
    %17 = tpu.assume_multiple %16, 8 : i32
    %18 = arith.index_cast %17 : i32 to index
    %c0_18 = arith.constant 0 : index
    %19 = vector.load %arg14[%18, %c0_18] : memref<32x384xf32, #tpu.memory_space<vmem>>, vector<8x384xf32>
    %20 = arith.truncf %15 : vector<8x128xf32> to vector<8x128xbf16>
    %cst_19 = arith.constant dense<0.000000e+00> : vector<8x384xf32>
    %21 = tpu.matmul %20, %12, %cst_19 {dimension_numbers = #tpu.dot_dimension_numbers<[1], [0], [0], [1], [0, 0, 1, 1], [], []>} : vector<8x128xbf16>, vector<128x384xbf16>, vector<8x384xf32> -> vector<8x384xf32>
    %22 = vector.extract_strided_slice %19 {offsets = [0, 0], sizes = [8, 128], strides = [1, 1]} : vector<8x384xf32> to vector<8x128xf32>
    %23 = vector.extract_strided_slice %21 {offsets = [0, 0], sizes = [8, 128], strides = [1, 1]} : vector<8x384xf32> to vector<8x128xf32>
    %24 = arith.addf %22, %23 : vector<8x128xf32>
    %25 = arith.negf %24 : vector<8x128xf32>
    %26 = math.exp %25 : vector<8x128xf32>
    %cst_20 = arith.constant 1.000000e+00 : f32
    %27 = vector.broadcast %cst_20 : f32 to vector<8x128xf32>
    %28 = arith.addf %27, %26 : vector<8x128xf32>
    %29 = arith.divf %27, %28 : vector<8x128xf32>
    %30 = vector.extract_strided_slice %19 {offsets = [0, 128], sizes = [8, 128], strides = [1, 1]} : vector<8x384xf32> to vector<8x128xf32>
    %31 = vector.extract_strided_slice %21 {offsets = [0, 128], sizes = [8, 128], strides = [1, 1]} : vector<8x384xf32> to vector<8x128xf32>
    %32 = arith.addf %30, %31 : vector<8x128xf32>
    %33 = arith.negf %32 : vector<8x128xf32>
    %34 = math.exp %33 : vector<8x128xf32>
    %cst_21 = arith.constant 1.000000e+00 : f32
    %35 = vector.broadcast %cst_21 : f32 to vector<8x128xf32>
    %36 = arith.addf %35, %34 : vector<8x128xf32>
    %37 = arith.divf %35, %36 : vector<8x128xf32>
    %38 = vector.extract_strided_slice %19 {offsets = [0, 256], sizes = [8, 128], strides = [1, 1]} : vector<8x384xf32> to vector<8x128xf32>
    %39 = vector.extract_strided_slice %21 {offsets = [0, 256], sizes = [8, 128], strides = [1, 1]} : vector<8x384xf32> to vector<8x128xf32>
    %40 = vector.broadcast %13 : vector<1x128xf32> to vector<8x128xf32>
    %41 = arith.addf %39, %40 : vector<8x128xf32>
    %42 = arith.mulf %29, %41 : vector<8x128xf32>
    %43 = arith.addf %38, %42 : vector<8x128xf32>
    %44 = math.tanh %43 : vector<8x128xf32>
    %45 = arith.subf %15, %44 : vector<8x128xf32>
    %46 = arith.mulf %37, %45 : vector<8x128xf32>
    %47 = arith.addf %44, %46 : vector<8x128xf32>
    %48 = arith.index_cast %17 : i32 to index
    %c0_22 = arith.constant 0 : index
    %49 = vector.load %arg15[%48, %c0_22] : memref<32x128xf32, #tpu.memory_space<vmem>>, vector<8x128xf32>
    tpu.vector_store %arg15[%48, %c0_22], %47 {strides = array<i32>} : memref<32x128xf32, #tpu.memory_space<vmem>>, vector<8x128xf32>,
    %c1_i32 = arith.constant 1 : i32
    %c8_i32_23 = arith.constant 8 : i32
    %50 = arith.muli %c1_i32, %c8_i32_23 : i32
    %51 = tpu.assume_multiple %50, 8 : i32
    %52 = arith.index_cast %51 : i32 to index
    %c0_24 = arith.constant 0 : index
    %53 = vector.load %arg14[%52, %c0_24] : memref<32x384xf32, #tpu.memory_space<vmem>>, vector<8x384xf32>
    %54 = arith.truncf %47 : vector<8x128xf32> to vector<8x128xbf16>
    %cst_25 = arith.constant dense<0.000000e+00> : vector<8x384xf32>
    %55 = tpu.matmul %54, %12, %cst_25 {dimension_numbers = #tpu.dot_dimension_numbers<[1], [0], [0], [1], [0, 0, 1, 1], [], []>} : vector<8x128xbf16>, vector<128x384xbf16>, vector<8x384xf32> -> vector<8x384xf32>
    %56 = vector.extract_strided_slice %53 {offsets = [0, 0], sizes = [8, 128], strides = [1, 1]} : vector<8x384xf32> to vector<8x128xf32>
    %57 = vector.extract_strided_slice %55 {offsets = [0, 0], sizes = [8, 128], strides = [1, 1]} : vector<8x384xf32> to vector<8x128xf32>
    %58 = arith.addf %56, %57 : vector<8x128xf32>
    %59 = arith.negf %58 : vector<8x128xf32>
    %60 = math.exp %59 : vector<8x128xf32>
    %cst_26 = arith.constant 1.000000e+00 : f32
    %61 = vector.broadcast %cst_26 : f32 to vector<8x128xf32>
    %62 = arith.addf %61, %60 : vector<8x128xf32>
    %63 = arith.divf %61, %62 : vector<8x128xf32>
    %64 = vector.extract_strided_slice %53 {offsets = [0, 128], sizes = [8, 128], strides = [1, 1]} : vector<8x384xf32> to vector<8x128xf32>
    %65 = vector.extract_strided_slice %55 {offsets = [0, 128], sizes = [8, 128], strides = [1, 1]} : vector<8x384xf32> to vector<8x128xf32>
    %66 = arith.addf %64, %65 : vector<8x128xf32>
    %67 = arith.negf %66 : vector<8x128xf32>
    %68 = math.exp %67 : vector<8x128xf32>
    %cst_27 = arith.constant 1.000000e+00 : f32
    %69 = vector.broadcast %cst_27 : f32 to vector<8x128xf32>
    %70 = arith.addf %69, %68 : vector<8x128xf32>
    %71 = arith.divf %69, %70 : vector<8x128xf32>
    %72 = vector.extract_strided_slice %53 {offsets = [0, 256], sizes = [8, 128], strides = [1, 1]} : vector<8x384xf32> to vector<8x128xf32>
    %73 = vector.extract_strided_slice %55 {offsets = [0, 256], sizes = [8, 128], strides = [1, 1]} : vector<8x384xf32> to vector<8x128xf32>
    %74 = vector.broadcast %13 : vector<1x128xf32> to vector<8x128xf32>
    %75 = arith.addf %73, %74 : vector<8x128xf32>
    %76 = arith.mulf %63, %75 : vector<8x128xf32>
    %77 = arith.addf %72, %76 : vector<8x128xf32>
    %78 = math.tanh %77 : vector<8x128xf32>
    %79 = arith.subf %47, %78 : vector<8x128xf32>
    %80 = arith.mulf %71, %79 : vector<8x128xf32>
    %81 = arith.addf %78, %80 : vector<8x128xf32>
    %82 = arith.index_cast %51 : i32 to index
    %c0_28 = arith.constant 0 : index
    %83 = vector.load %arg15[%82, %c0_28] : memref<32x128xf32, #tpu.memory_space<vmem>>, vector<8x128xf32>
    tpu.vector_store %arg15[%82, %c0_28], %81 {strides = array<i32>} : memref<32x128xf32, #tpu.memory_space<vmem>>, vector<8x128xf32>,
    %c2_i32 = arith.constant 2 : i32
    %c8_i32_29 = arith.constant 8 : i32
    %84 = arith.muli %c2_i32, %c8_i32_29 : i32
    %85 = tpu.assume_multiple %84, 8 : i32
    %86 = arith.index_cast %85 : i32 to index
    %c0_30 = arith.constant 0 : index
    %87 = vector.load %arg14[%86, %c0_30] : memref<32x384xf32, #tpu.memory_space<vmem>>, vector<8x384xf32>
    %88 = arith.truncf %81 : vector<8x128xf32> to vector<8x128xbf16>
    %cst_31 = arith.constant dense<0.000000e+00> : vector<8x384xf32>
    %89 = tpu.matmul %88, %12, %cst_31 {dimension_numbers = #tpu.dot_dimension_numbers<[1], [0], [0], [1], [0, 0, 1, 1], [], []>} : vector<8x128xbf16>, vector<128x384xbf16>, vector<8x384xf32> -> vector<8x384xf32>
    %90 = vector.extract_strided_slice %87 {offsets = [0, 0], sizes = [8, 128], strides = [1, 1]} : vector<8x384xf32> to vector<8x128xf32>
    %91 = vector.extract_strided_slice %89 {offsets = [0, 0], sizes = [8, 128], strides = [1, 1]} : vector<8x384xf32> to vector<8x128xf32>
    %92 = arith.addf %90, %91 : vector<8x128xf32>
    %93 = arith.negf %92 : vector<8x128xf32>
    %94 = math.exp %93 : vector<8x128xf32>
    %cst_32 = arith.constant 1.000000e+00 : f32
    %95 = vector.broadcast %cst_32 : f32 to vector<8x128xf32>
    %96 = arith.addf %95, %94 : vector<8x128xf32>
    %97 = arith.divf %95, %96 : vector<8x128xf32>
    %98 = vector.extract_strided_slice %87 {offsets = [0, 128], sizes = [8, 128], strides = [1, 1]} : vector<8x384xf32> to vector<8x128xf32>
    %99 = vector.extract_strided_slice %89 {offsets = [0, 128], sizes = [8, 128], strides = [1, 1]} : vector<8x384xf32> to vector<8x128xf32>
    %100 = arith.addf %98, %99 : vector<8x128xf32>
    %101 = arith.negf %100 : vector<8x128xf32>
    %102 = math.exp %101 : vector<8x128xf32>
    %cst_33 = arith.constant 1.000000e+00 : f32
    %103 = vector.broadcast %cst_33 : f32 to vector<8x128xf32>
    %104 = arith.addf %103, %102 : vector<8x128xf32>
    %105 = arith.divf %103, %104 : vector<8x128xf32>
    %106 = vector.extract_strided_slice %87 {offsets = [0, 256], sizes = [8, 128], strides = [1, 1]} : vector<8x384xf32> to vector<8x128xf32>
    %107 = vector.extract_strided_slice %89 {offsets = [0, 256], sizes = [8, 128], strides = [1, 1]} : vector<8x384xf32> to vector<8x128xf32>
    %108 = vector.broadcast %13 : vector<1x128xf32> to vector<8x128xf32>
    %109 = arith.addf %107, %108 : vector<8x128xf32>
    %110 = arith.mulf %97, %109 : vector<8x128xf32>
    %111 = arith.addf %106, %110 : vector<8x128xf32>
    %112 = math.tanh %111 : vector<8x128xf32>
    %113 = arith.subf %81, %112 : vector<8x128xf32>
    %114 = arith.mulf %105, %113 : vector<8x128xf32>
    %115 = arith.addf %112, %114 : vector<8x128xf32>
    %116 = arith.index_cast %85 : i32 to index
    %c0_34 = arith.constant 0 : index
    %117 = vector.load %arg15[%116, %c0_34] : memref<32x128xf32, #tpu.memory_space<vmem>>, vector<8x128xf32>
    tpu.vector_store %arg15[%116, %c0_34], %115 {strides = array<i32>} : memref<32x128xf32, #tpu.memory_space<vmem>>, vector<8x128xf32>,
    %c3_i32 = arith.constant 3 : i32
    %c8_i32_35 = arith.constant 8 : i32
    %118 = arith.muli %c3_i32, %c8_i32_35 : i32
    %119 = tpu.assume_multiple %118, 8 : i32
    %120 = arith.index_cast %119 : i32 to index
    %c0_36 = arith.constant 0 : index
    %121 = vector.load %arg14[%120, %c0_36] : memref<32x384xf32, #tpu.memory_space<vmem>>, vector<8x384xf32>
    %122 = arith.truncf %115 : vector<8x128xf32> to vector<8x128xbf16>
    %cst_37 = arith.constant dense<0.000000e+00> : vector<8x384xf32>
    %123 = tpu.matmul %122, %12, %cst_37 {dimension_numbers = #tpu.dot_dimension_numbers<[1], [0], [0], [1], [0, 0, 1, 1], [], []>} : vector<8x128xbf16>, vector<128x384xbf16>, vector<8x384xf32> -> vector<8x384xf32>
    %124 = vector.extract_strided_slice %121 {offsets = [0, 0], sizes = [8, 128], strides = [1, 1]} : vector<8x384xf32> to vector<8x128xf32>
    %125 = vector.extract_strided_slice %123 {offsets = [0, 0], sizes = [8, 128], strides = [1, 1]} : vector<8x384xf32> to vector<8x128xf32>
    %126 = arith.addf %124, %125 : vector<8x128xf32>
    %127 = arith.negf %126 : vector<8x128xf32>
    %128 = math.exp %127 : vector<8x128xf32>
    %cst_38 = arith.constant 1.000000e+00 : f32
    %129 = vector.broadcast %cst_38 : f32 to vector<8x128xf32>
    %130 = arith.addf %129, %128 : vector<8x128xf32>
    %131 = arith.divf %129, %130 : vector<8x128xf32>
    %132 = vector.extract_strided_slice %121 {offsets = [0, 128], sizes = [8, 128], strides = [1, 1]} : vector<8x384xf32> to vector<8x128xf32>
    %133 = vector.extract_strided_slice %123 {offsets = [0, 128], sizes = [8, 128], strides = [1, 1]} : vector<8x384xf32> to vector<8x128xf32>
    %134 = arith.addf %132, %133 : vector<8x128xf32>
    %135 = arith.negf %134 : vector<8x128xf32>
    %136 = math.exp %135 : vector<8x128xf32>
    %cst_39 = arith.constant 1.000000e+00 : f32
    %137 = vector.broadcast %cst_39 : f32 to vector<8x128xf32>
    %138 = arith.addf %137, %136 : vector<8x128xf32>
    %139 = arith.divf %137, %138 : vector<8x128xf32>
    %140 = vector.extract_strided_slice %121 {offsets = [0, 256], sizes = [8, 128], strides = [1, 1]} : vector<8x384xf32> to vector<8x128xf32>
    %141 = vector.extract_strided_slice %123 {offsets = [0, 256], sizes = [8, 128], strides = [1, 1]} : vector<8x384xf32> to vector<8x128xf32>
    %142 = vector.broadcast %13 : vector<1x128xf32> to vector<8x128xf32>
    %143 = arith.addf %141, %142 : vector<8x128xf32>
    %144 = arith.mulf %131, %143 : vector<8x128xf32>
    %145 = arith.addf %140, %144 : vector<8x128xf32>
    %146 = math.tanh %145 : vector<8x128xf32>
    %147 = arith.subf %115, %146 : vector<8x128xf32>
    %148 = arith.mulf %139, %147 : vector<8x128xf32>
    %149 = arith.addf %146, %148 : vector<8x128xf32>
    %150 = arith.index_cast %119 : i32 to index
    %c0_40 = arith.constant 0 : index
    %151 = vector.load %arg15[%150, %c0_40] : memref<32x128xf32, #tpu.memory_space<vmem>>, vector<8x128xf32>
    tpu.vector_store %arg15[%150, %c0_40], %149 {strides = array<i32>} : memref<32x128xf32, #tpu.memory_space<vmem>>, vector<8x128xf32>,
    %c4_i32_41 = arith.constant 4 : i32
    %c0_42 = arith.constant 0 : index
    %c0_43 = arith.constant 0 : index
    %c0_44 = arith.constant 0 : index
    %152 = vector.load %arg16[%c0_42, %c0_43, %c0_44] : memref<2x8x128xf32, #tpu.memory_space<vmem>>, vector<1x8x128xf32>
    %153 = vector.shape_cast %152 : vector<1x8x128xf32> to vector<8x128xf32>
    %154 = vector.shape_cast %149 : vector<8x128xf32> to vector<1x8x128xf32>
    tpu.vector_store %arg16[%c0_42, %c0_43, %c0_44], %154 {strides = array<i32>} : memref<2x8x128xf32, #tpu.memory_space<vmem>>, vector<1x8x128xf32>,
    %c0_45 = arith.constant 0 : index
    %c0_46 = arith.constant 0 : index
    %155 = vector.load %arg15[%c0_45, %c0_46] : memref<32x128xf32, #tpu.memory_space<vmem>>, vector<32x128xf32>
    %156 = arith.truncf %155 : vector<32x128xf32> to vector<32x128xbf16>
    %c0_47 = arith.constant 0 : index
    %c0_48 = arith.constant 0 : index
    %157 = vector.load %arg7[%c0_47, %c0_48] : memref<128x384xbf16, #tpu.memory_space<vmem>>, vector<128x384xbf16>
    %cst_49 = arith.constant dense<0.000000e+00> : vector<32x384xf32>
    %158 = tpu.matmul %156, %157, %cst_49 {dimension_numbers = #tpu.dot_dimension_numbers<[1], [0], [0], [1], [0, 0, 1, 1], [], []>} : vector<32x128xbf16>, vector<128x384xbf16>, vector<32x384xf32> -> vector<32x384xf32>
    %c0_50 = arith.constant 0 : index
    %c0_51 = arith.constant 0 : index
    %159 = vector.load %arg9[%c0_50, %c0_51] : memref<1x384xf32, #tpu.memory_space<vmem>>, vector<1x384xf32>
    %160 = vector.broadcast %159 : vector<1x384xf32> to vector<32x384xf32>
    %161 = arith.addf %158, %160 : vector<32x384xf32>
    %c0_52 = arith.constant 0 : index
    %c0_53 = arith.constant 0 : index
    %162 = vector.load %arg14[%c0_52, %c0_53] : memref<32x384xf32, #tpu.memory_space<vmem>>, vector<32x384xf32>
    tpu.vector_store %arg14[%c0_52, %c0_53], %161 {strides = array<i32>} : memref<32x384xf32, #tpu.memory_space<vmem>>, vector<32x384xf32>,
    %c0_54 = arith.constant 0 : index
    %c0_55 = arith.constant 0 : index
    %163 = vector.load %arg8[%c0_54, %c0_55] : memref<128x384xbf16, #tpu.memory_space<vmem>>, vector<128x384xbf16>
    %c0_56 = arith.constant 0 : index
    %c0_57 = arith.constant 0 : index
    %164 = vector.load %arg10[%c0_56, %c0_57] : memref<1x128xf32, #tpu.memory_space<vmem>>, vector<1x128xf32>
    %c1 = arith.constant 1 : index
    %c0_58 = arith.constant 0 : index
    %c0_59 = arith.constant 0 : index
    %165 = vector.load %arg16[%c1, %c0_58, %c0_59] : memref<2x8x128xf32, #tpu.memory_space<vmem>>, vector<1x8x128xf32>
    %166 = vector.shape_cast %165 : vector<1x8x128xf32> to vector<8x128xf32>
    %c0_i32_60 = arith.constant 0 : i32
    %c8_i32_61 = arith.constant 8 : i32
    %167 = arith.muli %c0_i32_60, %c8_i32_61 : i32
    %168 = tpu.assume_multiple %167, 8 : i32
    %169 = arith.index_cast %168 : i32 to index
    %c0_62 = arith.constant 0 : index
    %170 = vector.load %arg14[%169, %c0_62] : memref<32x384xf32, #tpu.memory_space<vmem>>, vector<8x384xf32>
    %171 = arith.truncf %166 : vector<8x128xf32> to vector<8x128xbf16>
    %cst_63 = arith.constant dense<0.000000e+00> : vector<8x384xf32>
    %172 = tpu.matmul %171, %163, %cst_63 {dimension_numbers = #tpu.dot_dimension_numbers<[1], [0], [0], [1], [0, 0, 1, 1], [], []>} : vector<8x128xbf16>, vector<128x384xbf16>, vector<8x384xf32> -> vector<8x384xf32>
    %173 = vector.extract_strided_slice %170 {offsets = [0, 0], sizes = [8, 128], strides = [1, 1]} : vector<8x384xf32> to vector<8x128xf32>
    %174 = vector.extract_strided_slice %172 {offsets = [0, 0], sizes = [8, 128], strides = [1, 1]} : vector<8x384xf32> to vector<8x128xf32>
    %175 = arith.addf %173, %174 : vector<8x128xf32>
    %176 = arith.negf %175 : vector<8x128xf32>
    %177 = math.exp %176 : vector<8x128xf32>
    %cst_64 = arith.constant 1.000000e+00 : f32
    %178 = vector.broadcast %cst_64 : f32 to vector<8x128xf32>
    %179 = arith.addf %178, %177 : vector<8x128xf32>
    %180 = arith.divf %178, %179 : vector<8x128xf32>
    %181 = vector.extract_strided_slice %170 {offsets = [0, 128], sizes = [8, 128], strides = [1, 1]} : vector<8x384xf32> to vector<8x128xf32>
    %182 = vector.extract_strided_slice %172 {offsets = [0, 128], sizes = [8, 128], strides = [1, 1]} : vector<8x384xf32> to vector<8x128xf32>
    %183 = arith.addf %181, %182 : vector<8x128xf32>
    %184 = arith.negf %183 : vector<8x128xf32>
    %185 = math.exp %184 : vector<8x128xf32>
    %cst_65 = arith.constant 1.000000e+00 : f32
    %186 = vector.broadcast %cst_65 : f32 to vector<8x128xf32>
    %187 = arith.addf %186, %185 : vector<8x128xf32>
    %188 = arith.divf %186, %187 : vector<8x128xf32>
    %189 = vector.extract_strided_slice %170 {offsets = [0, 256], sizes = [8, 128], strides = [1, 1]} : vector<8x384xf32> to vector<8x128xf32>
    %190 = vector.extract_strided_slice %172 {offsets = [0, 256], sizes = [8, 128], strides = [1, 1]} : vector<8x384xf32> to vector<8x128xf32>
    %191 = vector.broadcast %164 : vector<1x128xf32> to vector<8x128xf32>
    %192 = arith.addf %190, %191 : vector<8x128xf32>
    %193 = arith.mulf %180, %192 : vector<8x128xf32>
    %194 = arith.addf %189, %193 : vector<8x128xf32>
    %195 = math.tanh %194 : vector<8x128xf32>
    %196 = arith.subf %166, %195 : vector<8x128xf32>
    %197 = arith.mulf %188, %196 : vector<8x128xf32>
    %198 = arith.addf %195, %197 : vector<8x128xf32>
    %199 = arith.addi %4, %c0_i32_60 : i32
    %200 = vector.broadcast %199 : i32 to vector<8x1xi32>
    %201 = arith.cmpi sgt, %3, %200 : vector<8x1xi32>
    %cst_66 = arith.constant 0.000000e+00 : f32
    %202 = vector.shape_cast %201 : vector<8x1xi1> to vector<8x1xi1>
    %203 = vector.broadcast %202 : vector<8x1xi1> to vector<8x128xi1>
    %204 = vector.broadcast %cst_66 : f32 to vector<8x128xf32>
    %205 = arith.select %203, %198, %204 : vector<8x128xi1>, vector<8x128xf32>
    %206 = arith.index_cast %168 : i32 to index
    %c0_67 = arith.constant 0 : index
    %207 = vector.load %arg15[%206, %c0_67] : memref<32x128xf32, #tpu.memory_space<vmem>>, vector<8x128xf32>
    tpu.vector_store %arg15[%206, %c0_67], %205 {strides = array<i32>} : memref<32x128xf32, #tpu.memory_space<vmem>>, vector<8x128xf32>,
    %c1_i32_68 = arith.constant 1 : i32
    %c8_i32_69 = arith.constant 8 : i32
    %208 = arith.muli %c1_i32_68, %c8_i32_69 : i32
    %209 = tpu.assume_multiple %208, 8 : i32
    %210 = arith.index_cast %209 : i32 to index
    %c0_70 = arith.constant 0 : index
    %211 = vector.load %arg14[%210, %c0_70] : memref<32x384xf32, #tpu.memory_space<vmem>>, vector<8x384xf32>
    %212 = arith.truncf %198 : vector<8x128xf32> to vector<8x128xbf16>
    %cst_71 = arith.constant dense<0.000000e+00> : vector<8x384xf32>
    %213 = tpu.matmul %212, %163, %cst_71 {dimension_numbers = #tpu.dot_dimension_numbers<[1], [0], [0], [1], [0, 0, 1, 1], [], []>} : vector<8x128xbf16>, vector<128x384xbf16>, vector<8x384xf32> -> vector<8x384xf32>
    %214 = vector.extract_strided_slice %211 {offsets = [0, 0], sizes = [8, 128], strides = [1, 1]} : vector<8x384xf32> to vector<8x128xf32>
    %215 = vector.extract_strided_slice %213 {offsets = [0, 0], sizes = [8, 128], strides = [1, 1]} : vector<8x384xf32> to vector<8x128xf32>
    %216 = arith.addf %214, %215 : vector<8x128xf32>
    %217 = arith.negf %216 : vector<8x128xf32>
    %218 = math.exp %217 : vector<8x128xf32>
    %cst_72 = arith.constant 1.000000e+00 : f32
    %219 = vector.broadcast %cst_72 : f32 to vector<8x128xf32>
    %220 = arith.addf %219, %218 : vector<8x128xf32>
    %221 = arith.divf %219, %220 : vector<8x128xf32>
    %222 = vector.extract_strided_slice %211 {offsets = [0, 128], sizes = [8, 128], strides = [1, 1]} : vector<8x384xf32> to vector<8x128xf32>
    %223 = vector.extract_strided_slice %213 {offsets = [0, 128], sizes = [8, 128], strides = [1, 1]} : vector<8x384xf32> to vector<8x128xf32>
    %224 = arith.addf %222, %223 : vector<8x128xf32>
    %225 = arith.negf %224 : vector<8x128xf32>
    %226 = math.exp %225 : vector<8x128xf32>
    %cst_73 = arith.constant 1.000000e+00 : f32
    %227 = vector.broadcast %cst_73 : f32 to vector<8x128xf32>
    %228 = arith.addf %227, %226 : vector<8x128xf32>
    %229 = arith.divf %227, %228 : vector<8x128xf32>
    %230 = vector.extract_strided_slice %211 {offsets = [0, 256], sizes = [8, 128], strides = [1, 1]} : vector<8x384xf32> to vector<8x128xf32>
    %231 = vector.extract_strided_slice %213 {offsets = [0, 256], sizes = [8, 128], strides = [1, 1]} : vector<8x384xf32> to vector<8x128xf32>
    %232 = vector.broadcast %164 : vector<1x128xf32> to vector<8x128xf32>
    %233 = arith.addf %231, %232 : vector<8x128xf32>
    %234 = arith.mulf %221, %233 : vector<8x128xf32>
    %235 = arith.addf %230, %234 : vector<8x128xf32>
    %236 = math.tanh %235 : vector<8x128xf32>
    %237 = arith.subf %198, %236 : vector<8x128xf32>
    %238 = arith.mulf %229, %237 : vector<8x128xf32>
    %239 = arith.addf %236, %238 : vector<8x128xf32>
    %240 = arith.addi %4, %c1_i32_68 : i32
    %241 = vector.broadcast %240 : i32 to vector<8x1xi32>
    %242 = arith.cmpi sgt, %3, %241 : vector<8x1xi32>
    %cst_74 = arith.constant 0.000000e+00 : f32
    %243 = vector.shape_cast %242 : vector<8x1xi1> to vector<8x1xi1>
    %244 = vector.broadcast %243 : vector<8x1xi1> to vector<8x128xi1>
    %245 = vector.broadcast %cst_74 : f32 to vector<8x128xf32>
    %246 = arith.select %244, %239, %245 : vector<8x128xi1>, vector<8x128xf32>
    %247 = arith.index_cast %209 : i32 to index
    %c0_75 = arith.constant 0 : index
    %248 = vector.load %arg15[%247, %c0_75] : memref<32x128xf32, #tpu.memory_space<vmem>>, vector<8x128xf32>
    tpu.vector_store %arg15[%247, %c0_75], %246 {strides = array<i32>} : memref<32x128xf32, #tpu.memory_space<vmem>>, vector<8x128xf32>,
    %c2_i32_76 = arith.constant 2 : i32
    %c8_i32_77 = arith.constant 8 : i32
    %249 = arith.muli %c2_i32_76, %c8_i32_77 : i32
    %250 = tpu.assume_multiple %249, 8 : i32
    %251 = arith.index_cast %250 : i32 to index
    %c0_78 = arith.constant 0 : index
    %252 = vector.load %arg14[%251, %c0_78] : memref<32x384xf32, #tpu.memory_space<vmem>>, vector<8x384xf32>
    %253 = arith.truncf %239 : vector<8x128xf32> to vector<8x128xbf16>
    %cst_79 = arith.constant dense<0.000000e+00> : vector<8x384xf32>
    %254 = tpu.matmul %253, %163, %cst_79 {dimension_numbers = #tpu.dot_dimension_numbers<[1], [0], [0], [1], [0, 0, 1, 1], [], []>} : vector<8x128xbf16>, vector<128x384xbf16>, vector<8x384xf32> -> vector<8x384xf32>
    %255 = vector.extract_strided_slice %252 {offsets = [0, 0], sizes = [8, 128], strides = [1, 1]} : vector<8x384xf32> to vector<8x128xf32>
    %256 = vector.extract_strided_slice %254 {offsets = [0, 0], sizes = [8, 128], strides = [1, 1]} : vector<8x384xf32> to vector<8x128xf32>
    %257 = arith.addf %255, %256 : vector<8x128xf32>
    %258 = arith.negf %257 : vector<8x128xf32>
    %259 = math.exp %258 : vector<8x128xf32>
    %cst_80 = arith.constant 1.000000e+00 : f32
    %260 = vector.broadcast %cst_80 : f32 to vector<8x128xf32>
    %261 = arith.addf %260, %259 : vector<8x128xf32>
    %262 = arith.divf %260, %261 : vector<8x128xf32>
    %263 = vector.extract_strided_slice %252 {offsets = [0, 128], sizes = [8, 128], strides = [1, 1]} : vector<8x384xf32> to vector<8x128xf32>
    %264 = vector.extract_strided_slice %254 {offsets = [0, 128], sizes = [8, 128], strides = [1, 1]} : vector<8x384xf32> to vector<8x128xf32>
    %265 = arith.addf %263, %264 : vector<8x128xf32>
    %266 = arith.negf %265 : vector<8x128xf32>
    %267 = math.exp %266 : vector<8x128xf32>
    %cst_81 = arith.constant 1.000000e+00 : f32
    %268 = vector.broadcast %cst_81 : f32 to vector<8x128xf32>
    %269 = arith.addf %268, %267 : vector<8x128xf32>
    %270 = arith.divf %268, %269 : vector<8x128xf32>
    %271 = vector.extract_strided_slice %252 {offsets = [0, 256], sizes = [8, 128], strides = [1, 1]} : vector<8x384xf32> to vector<8x128xf32>
    %272 = vector.extract_strided_slice %254 {offsets = [0, 256], sizes = [8, 128], strides = [1, 1]} : vector<8x384xf32> to vector<8x128xf32>
    %273 = vector.broadcast %164 : vector<1x128xf32> to vector<8x128xf32>
    %274 = arith.addf %272, %273 : vector<8x128xf32>
    %275 = arith.mulf %262, %274 : vector<8x128xf32>
    %276 = arith.addf %271, %275 : vector<8x128xf32>
    %277 = math.tanh %276 : vector<8x128xf32>
    %278 = arith.subf %239, %277 : vector<8x128xf32>
    %279 = arith.mulf %270, %278 : vector<8x128xf32>
    %280 = arith.addf %277, %279 : vector<8x128xf32>
    %281 = arith.addi %4, %c2_i32_76 : i32
    %282 = vector.broadcast %281 : i32 to vector<8x1xi32>
    %283 = arith.cmpi sgt, %3, %282 : vector<8x1xi32>
    %cst_82 = arith.constant 0.000000e+00 : f32
    %284 = vector.shape_cast %283 : vector<8x1xi1> to vector<8x1xi1>
    %285 = vector.broadcast %284 : vector<8x1xi1> to vector<8x128xi1>
    %286 = vector.broadcast %cst_82 : f32 to vector<8x128xf32>
    %287 = arith.select %285, %280, %286 : vector<8x128xi1>, vector<8x128xf32>
    %288 = arith.index_cast %250 : i32 to index
    %c0_83 = arith.constant 0 : index
    %289 = vector.load %arg15[%288, %c0_83] : memref<32x128xf32, #tpu.memory_space<vmem>>, vector<8x128xf32>
    tpu.vector_store %arg15[%288, %c0_83], %287 {strides = array<i32>} : memref<32x128xf32, #tpu.memory_space<vmem>>, vector<8x128xf32>,
    %c3_i32_84 = arith.constant 3 : i32
    %c8_i32_85 = arith.constant 8 : i32
    %290 = arith.muli %c3_i32_84, %c8_i32_85 : i32
    %291 = tpu.assume_multiple %290, 8 : i32
    %292 = arith.index_cast %291 : i32 to index
    %c0_86 = arith.constant 0 : index
    %293 = vector.load %arg14[%292, %c0_86] : memref<32x384xf32, #tpu.memory_space<vmem>>, vector<8x384xf32>
    %294 = arith.truncf %280 : vector<8x128xf32> to vector<8x128xbf16>
    %cst_87 = arith.constant dense<0.000000e+00> : vector<8x384xf32>
    %295 = tpu.matmul %294, %163, %cst_87 {dimension_numbers = #tpu.dot_dimension_numbers<[1], [0], [0], [1], [0, 0, 1, 1], [], []>} : vector<8x128xbf16>, vector<128x384xbf16>, vector<8x384xf32> -> vector<8x384xf32>
    %296 = vector.extract_strided_slice %293 {offsets = [0, 0], sizes = [8, 128], strides = [1, 1]} : vector<8x384xf32> to vector<8x128xf32>
    %297 = vector.extract_strided_slice %295 {offsets = [0, 0], sizes = [8, 128], strides = [1, 1]} : vector<8x384xf32> to vector<8x128xf32>
    %298 = arith.addf %296, %297 : vector<8x128xf32>
    %299 = arith.negf %298 : vector<8x128xf32>
    %300 = math.exp %299 : vector<8x128xf32>
    %cst_88 = arith.constant 1.000000e+00 : f32
    %301 = vector.broadcast %cst_88 : f32 to vector<8x128xf32>
    %302 = arith.addf %301, %300 : vector<8x128xf32>
    %303 = arith.divf %301, %302 : vector<8x128xf32>
    %304 = vector.extract_strided_slice %293 {offsets = [0, 128], sizes = [8, 128], strides = [1, 1]} : vector<8x384xf32> to vector<8x128xf32>
    %305 = vector.extract_strided_slice %295 {offsets = [0, 128], sizes = [8, 128], strides = [1, 1]} : vector<8x384xf32> to vector<8x128xf32>
    %306 = arith.addf %304, %305 : vector<8x128xf32>
    %307 = arith.negf %306 : vector<8x128xf32>
    %308 = math.exp %307 : vector<8x128xf32>
    %cst_89 = arith.constant 1.000000e+00 : f32
    %309 = vector.broadcast %cst_89 : f32 to vector<8x128xf32>
    %310 = arith.addf %309, %308 : vector<8x128xf32>
    %311 = arith.divf %309, %310 : vector<8x128xf32>
    %312 = vector.extract_strided_slice %293 {offsets = [0, 256], sizes = [8, 128], strides = [1, 1]} : vector<8x384xf32> to vector<8x128xf32>
    %313 = vector.extract_strided_slice %295 {offsets = [0, 256], sizes = [8, 128], strides = [1, 1]} : vector<8x384xf32> to vector<8x128xf32>
    %314 = vector.broadcast %164 : vector<1x128xf32> to vector<8x128xf32>
    %315 = arith.addf %313, %314 : vector<8x128xf32>
    %316 = arith.mulf %303, %315 : vector<8x128xf32>
    %317 = arith.addf %312, %316 : vector<8x128xf32>
    %318 = math.tanh %317 : vector<8x128xf32>
    %319 = arith.subf %280, %318 : vector<8x128xf32>
    %320 = arith.mulf %311, %319 : vector<8x128xf32>
    %321 = arith.addf %318, %320 : vector<8x128xf32>
    %322 = arith.addi %4, %c3_i32_84 : i32
    %323 = vector.broadcast %322 : i32 to vector<8x1xi32>
    %324 = arith.cmpi sgt, %3, %323 : vector<8x1xi32>
    %cst_90 = arith.constant 0.000000e+00 : f32
    %325 = vector.shape_cast %324 : vector<8x1xi1> to vector<8x1xi1>
    %326 = vector.broadcast %325 : vector<8x1xi1> to vector<8x128xi1>
    %327 = vector.broadcast %cst_90 : f32 to vector<8x128xf32>
    %328 = arith.select %326, %321, %327 : vector<8x128xi1>, vector<8x128xf32>
    %329 = arith.index_cast %291 : i32 to index
    %c0_91 = arith.constant 0 : index
    %330 = vector.load %arg15[%329, %c0_91] : memref<32x128xf32, #tpu.memory_space<vmem>>, vector<8x128xf32>
    tpu.vector_store %arg15[%329, %c0_91], %328 {strides = array<i32>} : memref<32x128xf32, #tpu.memory_space<vmem>>, vector<8x128xf32>,
    %c4_i32_92 = arith.constant 4 : i32
    %c1_93 = arith.constant 1 : index
    %c0_94 = arith.constant 0 : index
    %c0_95 = arith.constant 0 : index
    %331 = vector.load %arg16[%c1_93, %c0_94, %c0_95] : memref<2x8x128xf32, #tpu.memory_space<vmem>>, vector<1x8x128xf32>
    %332 = vector.shape_cast %331 : vector<1x8x128xf32> to vector<8x128xf32>
    %333 = vector.shape_cast %321 : vector<8x128xf32> to vector<1x8x128xf32>
    tpu.vector_store %arg16[%c1_93, %c0_94, %c0_95], %333 {strides = array<i32>} : memref<2x8x128xf32, #tpu.memory_space<vmem>>, vector<1x8x128xf32>,
    %c0_96 = arith.constant 0 : index
    %c0_97 = arith.constant 0 : index
    %334 = vector.load %arg15[%c0_96, %c0_97] : memref<32x128xf32, #tpu.memory_space<vmem>>, vector<32x128xf32>
    %335 = arith.truncf %334 : vector<32x128xf32> to vector<32x128xbf16>
    %c0_98 = arith.constant 0 : index
    %c0_99 = arith.constant 0 : index
    %336 = vector.load %arg11[%c0_98, %c0_99] : memref<128x128xbf16, #tpu.memory_space<vmem>>, vector<128x128xbf16>
    %cst_100 = arith.constant dense<0.000000e+00> : vector<32x128xf32>
    %337 = tpu.matmul %335, %336, %cst_100 {dimension_numbers = #tpu.dot_dimension_numbers<[1], [0], [0], [1], [0, 0, 1, 1], [], []>} : vector<32x128xbf16>, vector<128x128xbf16>, vector<32x128xf32> -> vector<32x128xf32>
    %c0_101 = arith.constant 0 : index
    %c0_102 = arith.constant 0 : index
    %338 = vector.load %arg12[%c0_101, %c0_102] : memref<1x128xf32, #tpu.memory_space<vmem>>, vector<1x128xf32>
    %339 = vector.broadcast %338 : vector<1x128xf32> to vector<32x128xf32>
    %340 = arith.addf %337, %339 : vector<32x128xf32>
    %c0_103 = arith.constant 0 : index
    %c0_104 = arith.constant 0 : index
    %341 = vector.load %arg13[%c0_103, %c0_104] : memref<32x128xf32, #tpu.memory_space<vmem>>, vector<32x128xf32>
    tpu.vector_store %arg13[%c0_103, %c0_104], %340 {strides = array<i32>} : memref<32x128xf32, #tpu.memory_space<vmem>>, vector<32x128xf32>,
    return
  }
  func.func @transform_0(%arg0: i32) -> (i32, i32) {
    %c0_i32 = arith.constant 0 : i32
    %c0_i32_0 = arith.constant 0 : i32
    %c0_i32_1 = arith.constant 0 : i32
    return %c0_i32, %c0_i32_0 : i32, i32
  }
  func.func @transform_1(%arg0: i32) -> (i32, i32) {
    %c0_i32 = arith.constant 0 : i32
    %c0_i32_0 = arith.constant 0 : i32
    return %arg0, %c0_i32 : i32, i32
  }
  func.func @transform_2(%arg0: i32) -> (i32, i32) {
    %c0_i32 = arith.constant 0 : i32
    %c0_i32_0 = arith.constant 0 : i32
    %c0_i32_1 = arith.constant 0 : i32
    return %c0_i32, %c0_i32_0 : i32, i32
  }
  func.func @transform_3(%arg0: i32) -> (i32, i32) {
    %c0_i32 = arith.constant 0 : i32
    %c0_i32_0 = arith.constant 0 : i32
    %c0_i32_1 = arith.constant 0 : i32
    return %c0_i32, %c0_i32_0 : i32, i32
  }
  func.func @transform_4(%arg0: i32) -> (i32, i32) {
    %c0_i32 = arith.constant 0 : i32
    %c0_i32_0 = arith.constant 0 : i32
    %c0_i32_1 = arith.constant 0 : i32
    return %c0_i32, %c0_i32_0 : i32, i32
  }
  func.func @transform_5(%arg0: i32) -> (i32, i32) {
    %c0_i32 = arith.constant 0 : i32
    %c0_i32_0 = arith.constant 0 : i32
    %c0_i32_1 = arith.constant 0 : i32
    return %c0_i32, %c0_i32_0 : i32, i32
  }
  func.func @transform_6(%arg0: i32) -> (i32, i32) {
    %c0_i32 = arith.constant 0 : i32
    %c0_i32_0 = arith.constant 0 : i32
    %c0_i32_1 = arith.constant 0 : i32
    return %c0_i32, %c0_i32_0 : i32, i32
  }
  func.func @transform_7(%arg0: i32) -> (i32, i32) {
    %c0_i32 = arith.constant 0 : i32
    %c0_i32_0 = arith.constant 0 : i32
    %c0_i32_1 = arith.constant 0 : i32
    return %c0_i32, %c0_i32_0 : i32, i32
  }
  func.func @transform_8(%arg0: i32) -> (i32, i32) {
    %c0_i32 = arith.constant 0 : i32
    %c0_i32_0 = arith.constant 0 : i32
    %c0_i32_1 = arith.constant 0 : i32
    return %c0_i32, %c0_i32_0 : i32, i32
  }
  func.func @transform_9(%arg0: i32) -> (i32, i32) {
    %c0_i32 = arith.constant 0 : i32
    %c0_i32_0 = arith.constant 0 : i32
    %c0_i32_1 = arith.constant 0 : i32
    return %c0_i32, %c0_i32_0 : i32, i32
  }
  func.func @transform_10(%arg0: i32) -> (i32, i32) {
    %c0_i32 = arith.constant 0 : i32
    %c0_i32_0 = arith.constant 0 : i32
    %c0_i32_1 = arith.constant 0 : i32
    return %c0_i32, %c0_i32_0 : i32, i32
  }
  func.func @transform_11(%arg0: i32) -> (i32, i32) {
    %c0_i32 = arith.constant 0 : i32
    %c0_i32_0 = arith.constant 0 : i32
    %c0_i32_1 = arith.constant 0 : i32
    return %c0_i32, %c0_i32_0 : i32, i32
  }
  func.func @transform_12(%arg0: i32) -> (i32, i32) {
    %c0_i32 = arith.constant 0 : i32
    %c0_i32_0 = arith.constant 0 : i32
    return %arg0, %c0_i32 : i32, i32
  }
}

</mosaic_0001>

<bundles_post_ra>
// kernel: tpu_custom_call.1
= control target key start
LH: loop header
LB: loop body
LE: loop exit
PB: predicated region body
PF: predicated region fallthrough
CT: control target
= control target key end

     0   :  { %s4308_s0 = inlined_call_operand.vmem [shape: s32[8,1], index: 0, kind: input, shape index: {}]   ;;  %s4309_s1 = inlined_call_operand.vmem [shape: bf16[64,32], index: 1, kind: input, shape index: {}]   ;;  %s4310_s2 = inlined_call_operand.hbm [shape: bf16[32,384], index: 2, kind: input, shape index: {}]   ;;  %s4311_s3 = inlined_call_operand.hbm [shape: bf16[128,384], index: 3, kind: input, shape index: {}]   ;;  %s4312_s4 = inlined_call_operand.vmem [shape: f32[1,384], index: 4, kind: input, shape index: {}]   ;;  %s4313_s5 = inlined_call_operand.vmem [shape: f32[1,128], index: 5, kind: input, shape index: {}]   ;;  %s4314_s6 = inlined_call_operand.hbm [shape: bf16[128,384], index: 6, kind: input, shape index: {}]   ;;  %s4315_s7 = inlined_call_operand.hbm [shape: bf16[128,384], index: 7, kind: input, shape index: {}]   ;;  %s4316_s8 = inlined_call_operand.vmem [shape: f32[1,384], index: 8, kind: input, shape index: {}]   ;;  %s4317_s9 = inlined_call_operand.vmem [shape: f32[1,128], index: 9, kind: input, shape index: {}]   ;;  %s4318_s10 = inlined_call_operand.vmem [shape: bf16[128,128], index: 10, kind: input, shape index: {}]   ;;  %s4319_s11 = inlined_call_operand.vmem [shape: f32[1,128], index: 11, kind: input, shape index: {}]   ;;  %s4320_s12 = inlined_call_operand.hbm [shape: f32[64,128], index: 12, kind: output, shape index: {}]  }
   0x1   :  { %4333 = sst [smem:[#allocation25_spill]] %s4320_s12 }
   0x2   :  { %17 = vsyncpa [#allocation6], 0 }
   0x3   :  { %18 = vsyncpa [#allocation9], 0 }
   0x4   :  { %19 = vsyncpa [#allocation12], 0 }
   0x5   :  { %20 = vsyncpa [#allocation7], 0 }
   0x6   :  { %22 = vsyncpa [#allocation7 + $0x1], 0  ;;  %s3461_s21 = smov 0   ;;  %s3463_s22 = smov 0  }
   0x7   :  { %s3465_s23 = smov 0   ;;  %s3467_s24 = smov 0  }
   0x8 LB: > { %4334 = sst [smem:[#allocation18_spill]] %s3369_s21  ;;  %s3482_s25 = sadd.s32 4294967295, %s3381_s24   ;;  %s3381_s24 = sphi %s3467_s24, %s4361_s24   ;;  %s3377_s23 = sphi %s3465_s23, %s4363_s23   ;;  %s3373_s22 = sphi %s3463_s22, %s4365_s22   ;;  %s3369_s21 = sphi %s3461_s21, %s4364_s21  }
   0x9   : > { %4335 = sst [smem:[#allocation19_spill]] %s3377_s23  ;;  %s2467_s26 = sadd.s32 4294967294, %s3381_s24  }
   0xa   : > { %4336 = sst [smem:[#allocation20_spill]] %s3381_s24  ;;  %s3486_s27 = sadd.s32 1, %s3381_s24  }
   0xb   : > { %4337 = sst [smem:[#allocation21_spill]] %s3486_s27  ;;  %s292_s28 = sadd.s32 1, %s3377_s23 }
   0xc   : > { %s289_s29 = ssub.s32 %s3381_s24, %s3486_s27  ;;  %p302_p0 = scmp.ne.s32.totalorder %s3377_s23, %s3373_s22 }
   0xd   : > { %p290_p1 = scmp.eq.s32.totalorder %s289_s29, 0  ;;  %p303_p2 = scmp.eq.s32.totalorder %s3482_s25, 1 }
   0xe   : > { %p308_p3 = scmp.ne.s32.totalorder %s3373_s22, %s3369_s21  ;;  %p309_p4 = scmp.eq.s32.totalorder %s2467_s26, 1 }
   0xf   : > { %s3497_s30 = scalar_select %p290_p1, %s3377_s23, %s292_s28  }
  0x10   : > { %p3499_p5 = por %p303_p2, %p302_p0  ;;  %p3503_p6 = por %p309_p4, %p308_p3 }
  0x11   : > { %4338 = sst [smem:[#allocation22_spill]] %s3497_s30  ;;  %p2468_p7 = scmp.ge.s32.totalorder %s3381_s24, 1 }
  0x12   : > { %s4339_s13 = scalar_select %p3499_p5, 1, 0 }
  0x13   : > { %s4341_s14 = scalar_select %p3503_p6, 1, 0 }
  0x14   : > { %4340 = sst [smem:[#allocation23_spill]] %s4339_s13  ;;  %p316_p8 = scmp.lt.s32.totalorder %s3381_s24, 3 }
  0x15   : > { %4342 = sst [smem:[#allocation24_spill]] %s4341_s14  ;;  %p4325_p10 = scmp.eq.s32.totalorder %s3482_s25, 0 }
  0x16   : > { %p3511_p11 = pnand %p2468_p7, %p316_p8  ;;  %s3383_s16 = smov [#allocation8]  }
  0x17   : > { %s344_s17 = sshll.u32 %s3383_s16, 4  ;;  %s3384_s19 = smov [#allocation5]   ;;  %s3517_s17 = int_to_ptr.vmem [resolvable:$true] %s344_s17 }
  0x18   : > { %s4343_s15 = scalar_select %p3511_p11, 1, 0 }
  0x19   : > { %p2929_p12 = pneg %p3511_p11  ;;  %s331_s20 = sshll.u32 %s3384_s19, 4  ;;  %s3525_s20 = int_to_ptr.vmem [resolvable:$true] %s331_s20 }
  0x1a   : > { %s3385_s26 = smov [#allocation10]   ;;  %s3195_s23 = scalar_lea.hbm %s4311_s3, 3072 }
  0x1b   : > { %p3521_p13 = pnand %p4325_p10, %p2929_p12  ;;  %s3527_s28 = sshll.u32 %s3385_s26, 4  ;;  %s364_s28 = int_to_ptr.vmem [resolvable:$true] %s3527_s28 }
  0x1c   : > { %p3196_p0 = scmp.ne.s32.totalorder %s4311_s3, %s3195_s23  ;;  %p3202_p4 = scmp.lt.u32.totalorder %s3195_s23, %s4311_s3 }
  0x1d   : > { %p3537_p1 = pneg %p3521_p13 }
  0x1f   : > { %p3198_p2 = pnand %p3537_p1, %p3196_p0 }
  0x21   : > { %p3199_p3 = pneg %p3198_p2 }
  0x23   : > { %p3204_p7 = pnand %p3202_p4, %p3199_p3 }
  0x25   : > { %3207 = shalt.err (!%p3204_p7)
}
  0x26   : > { %s3208_s27 = scalar_lea.vmem %s3517_s17, 3072  ;;  %p3216_p10 = scmp.lt.s32.totalorder %s3517_s17, %s3517_s17 }
  0x27   : > { %p3209_p8 = scmp.ne.s32.totalorder %s3517_s17, %s3208_s27  ;;  %p3217_p6 = scmp.lt.s32.totalorder %s3208_s27, %s3208_s27 }
  0x29   : > { %p3211_p12 = pnand %p3209_p8, %p3537_p1  ;;  %p3218_p0 = por %p3217_p6, %p3216_p10 }
  0x2b   : > { %p3212_p9 = pneg %p3211_p12 }
  0x2d   : > { %p3219_p2 = pnand %p3218_p0, %p3212_p9 }
  0x2f   : > { %3222 = shalt.err (!%p3219_p2)
}
  0x30   : > { %s3386_s30 = smov 192   ;;  %s3387_s23 = smov 12  }
  0x31   : > { %2935 = dma.hbm_to_vmem [thread:$0]  (!%p3521_p13), %s4311_s3, 3072, %s3517_s17, [#allocation9], %s3386_s30, %s3386_s30, %s3387_s23  }
  0x32   : > { %s3223_s27 = scalar_lea.hbm %s4310_s2, 768 }
  0x33   : > { %p3224_p6 = scmp.ne.s32.totalorder %s4310_s2, %s3223_s27  ;;  %p3230_p3 = scmp.lt.u32.totalorder %s3223_s27, %s4310_s2 }
  0x35   : > { %p3226_p9 = pnand %p3224_p6, %p3537_p1 }
  0x37   : > { %p3227_p10 = pneg %p3226_p9 }
  0x39   : > { %p3232_p4 = pnand %p3230_p3, %p3227_p10 }
  0x3b   : > { %3235 = shalt.err (!%p3232_p4)
}
  0x3c   : > { %s3236_s17 = scalar_lea.vmem %s3525_s20, 768  ;;  %p3244_p0 = scmp.lt.s32.totalorder %s3525_s20, %s3525_s20 }
  0x3d   : > { %p3237_p7 = scmp.ne.s32.totalorder %s3525_s20, %s3236_s17  ;;  %p3245_p2 = scmp.lt.s32.totalorder %s3236_s17, %s3236_s17 }
  0x3f   : > { %p3239_p8 = pnand %p3237_p7, %p3537_p1  ;;  %p3246_p6 = por %p3245_p2, %p3244_p0 }
  0x41   : > { %p3240_p12 = pneg %p3239_p8 }
  0x43   : > { %p3247_p9 = pnand %p3246_p6, %p3240_p12 }
  0x45   : > { %3250 = shalt.err (!%p3247_p9)
}
  0x46   : > { %2932 = dma.hbm_to_vmem [thread:$0]  (!%p3521_p13), %s4310_s2, 768, %s3525_s20, [#allocation6], %s3386_s30, %s3386_s30, %s3387_s23  }
  0x47   : > { %s3251_s29 = scalar_lea.hbm %s4314_s6, 3072 }
  0x48   : > { %p3252_p10 = scmp.ne.s32.totalorder %s4314_s6, %s3251_s29  ;;  %p3258_p7 = scmp.lt.u32.totalorder %s3251_s29, %s4314_s6 }
  0x4a   : > { %p3254_p3 = pnand %p3252_p10, %p3537_p1 }
  0x4c   : > { %p3255_p4 = pneg %p3254_p3 }
  0x4e   : > { %p3260_p8 = pnand %p3258_p7, %p3255_p4 }
  0x50   : > { %3263 = shalt.err (!%p3260_p8)
}
  0x51   : > { %s3264_s17 = scalar_lea.vmem %s364_s28, 3072  ;;  %p3272_p6 = scmp.lt.s32.totalorder %s364_s28, %s364_s28 }
  0x52   : > { %p3265_p12 = scmp.ne.s32.totalorder %s364_s28, %s3264_s17  ;;  %p3273_p9 = scmp.lt.s32.totalorder %s3264_s17, %s3264_s17 }
  0x54   : > { %p3267_p0 = pnand %p3265_p12, %p3537_p1  ;;  %p3274_p5 = por %p3273_p9, %p3272_p6 }
  0x56   : > { %p3268_p2 = pneg %p3267_p0 }
  0x58   : > { %p3275_p11 = pnand %p3274_p5, %p3268_p2 }
  0x5a   : > { %3278 = shalt.err (!%p3275_p11)
}
  0x5b   : > { %2938 = dma.hbm_to_vmem [thread:$0]  (!%p3521_p13), %s4314_s6, 3072, %s364_s28, [#allocation9], %s3386_s30, %s3386_s30, %s3387_s23  }
  0x5c   : > { %s3388_s21 = smov [#allocation11]   ;;  %s3279_s16 = scalar_lea.hbm %s4315_s7, 3072 }
  0x5d   : > { %s376_s24 = sshll.u32 %s3388_s21, 4  ;;  %p3280_p5 = scmp.ne.s32.totalorder %s4315_s7, %s3279_s16  ;;  %s377_s24 = int_to_ptr.vmem [resolvable:$true] %s376_s24 }
  0x5e   : > { %p3286_p3 = scmp.lt.u32.totalorder %s3279_s16, %s4315_s7 }
  0x5f   : > { %p3282_p11 = pnand %p3280_p5, %p3537_p1 }
  0x61   : > { %p3283_p10 = pneg %p3282_p11 }
  0x63   : > { %p3288_p4 = pnand %p3286_p3, %p3283_p10 }
  0x65   : > { %3291 = shalt.err (!%p3288_p4)
}
  0x66   : > { %s3292_s28 = scalar_lea.vmem %s377_s24, 3072  ;;  %p3300_p0 = scmp.lt.s32.totalorder %s377_s24, %s377_s24 }
  0x67   : > { %p3293_p7 = scmp.ne.s32.totalorder %s377_s24, %s3292_s28  ;;  %p3301_p2 = scmp.lt.s32.totalorder %s3292_s28, %s3292_s28 }
  0x69   : > { %p3295_p8 = pnand %p3293_p7, %p3537_p1  ;;  %p3302_p6 = por %p3301_p2, %p3300_p0 }
  0x6b   : > { %p3296_p12 = pneg %p3295_p8 }
  0x6d   : > { %p3303_p9 = pnand %p3302_p6, %p3296_p12 }
  0x6f   : > { %3306 = shalt.err (!%p3303_p9)
}
  0x70   : > { %2941 = dma.hbm_to_vmem [thread:$0]  (!%p3521_p13), %s4315_s7, 3072, %s377_s24, [#allocation12], %s3386_s30, %s3386_s30, %s3387_s23  }
  0x71   : > { %p4346_p5 = scmp.ne.s32.totalorder %s4343_s15, 0 }
  0x72   : > { %p4347_p1 = scmp.eq.s32.totalorder (!%p4346_p5), %s3482_s25, 0 }
  0x73   : > { %413 = sbr.rel (%p4346_p5) target bundleno = 2519 (0x9d7), region = 68 }
  0x7a   : > { %3352 = dma.done.wait (%p4347_p1), [#allocation6], 768   ;;  %p4348_p11 = pmov %p4347_p1 }
  0x7b   : > { %p4349_p10 = pmov %p4347_p1 }
  0x7c   : > { %3354 = vsyncadd (%p4348_p11), [#allocation6], 4294966528 }
  0x7d   : > { %3356 = dma.done.wait (%p4349_p10), [#allocation9], 6144   ;;  %p4350_p3 = pmov %p4347_p1 }
  0x7e   : > { %p4351_p4 = pmov %p4347_p1 }
  0x7f   : > { %3358 = vsyncadd (%p4350_p3), [#allocation9], 4294961152 }
  0x80   : > { %3360 = dma.done.wait (%p4351_p4), [#allocation12], 3072   ;;  %p4352_p13 = pmov %p4347_p1 }
  0x81   : > { %s464_s14 = sand.u32 1, %s3373_s22   ;;  %s3646_s15 = sshll.u32 %s3482_s25, 2 }
  0x82   : > { %3362 = vsyncadd (%p4352_p13), [#allocation12], 4294964224  ;;  %s2479_s18 = sshll.u32 %s464_s14, 5  ;;  %p468_p7 = scmp.lt.s32.totalorder %s3646_s15, 7 }
  0x83   : > { %s3657_s29 = scalar_lea.vmem [#allocation13], %s2479_s18  ;;  %p4353_p8 = scmp.ne.s32.totalorder %s3482_s25, 0 }
  0x84   : > { %s469_s30 = scalar_select %p468_p7, %s3646_s15, 7 }
  0x85   : > { %478 = sbr.rel (%p4353_p8) target bundleno = 140 (0x8c), region = 88  ;;  %v3389_v0 = vmov (!%p4353_p8), 0.0  }
  0x86   : > { %s2481_s23 = sshll.u32 %s469_s30, 2  ;;  %479 = vst [vmem:[#allocation4] sm:$0xff] (!%p4353_p8), %v3389_v0  ;;  %480 = vst [vmem:[#allocation4 + $0x8] sm:$0xff] (!%p4353_p8), %v3389_v0 }
  0x87   : > { %s3655_s13 = scalar_lea.vmem %s4309_s1, %s2481_s23 }
  0x8c PF: > { %v3001_v1 = vld [vmem:[#allocation5 + $0x4] ss:$12 sps:$4 sm:$0xff]   ;;  %v3661_v2 = vld [vmem:[#allocation8 + $0x4] ss:$12 sps:$4 sm:$0xff]   ;;  %v3390_v3 = vmov 0   ;;  %v3013_v10 = vld [vmem:[%s3655_s13] sm:$0xff]   ;;  %v497_v37 = vlaneseq }
  0x8d   : > { %593 = vmatprep.mubr.bf16.mxu1 %v3390_v3  ;;  %876 = vmatprep.mubr.bf16.mxu0 %v3390_v3  ;;  %v3005_v4 = vld [vmem:[#allocation5] ss:$12 sps:$4 sm:$0xff]   ;;  %v3665_v5 = vld [vmem:[#allocation8] ss:$12 sps:$4 sm:$0xff]   ;;  %v3011_v8 = vld [vmem:[#allocation5 + $0x18] ss:$12 sps:$4 sm:$0xff]  }
  0x8e   : > { %561 = vmatprep.subr.bf16.mxu1 %v3001_v1  ;;  %2999 = vset.pattern.permute.xlu0 %v3390_v3  ;;  %v3007_v6 = vld [vmem:[#allocation5 + $0x1c] ss:$12 sps:$4 sm:$0xff]   ;;  %v3671_v7 = vld [vmem:[#allocation8 + $0x1c] ss:$12 sps:$4 sm:$0xff]   ;;  %v3677_v11 = vld [vmem:[#allocation8 + $0x34] ss:$12 sps:$4 sm:$0xff]  }
  0x8f   : > { %844 = vmatprep.subr.bf16.mxu0 %v3661_v2  ;;  %3000 = vset.pattern.permute.xlu1 %v3390_v3  ;;  %v3673_v9 = vld [vmem:[#allocation8 + $0x18] ss:$12 sps:$4 sm:$0xff]   ;;  %v3679_v12 = vld [vmem:[#allocation8 + $0x30] ss:$12 sps:$4 sm:$0xff]   ;;  %vm554_vm0 = vcmask 261120   ;;  %v3391_v21 = vmov 0.0  }
  0x90   : > { %562 = vmatpush1.bf16.msra.mxu1 %v3005_v4  ;;  %845 = vmatpush1.bf16.msra.mxu0 %v3665_v5  ;;  %v3017_v13 = vld [vmem:[#allocation5 + $0x8] ss:$12 sps:$4 sm:$0xff]   ;;  %v3686_v15 = vld [vmem:[#allocation8 + $0x48] ss:$12 sps:$4 sm:$0xff]   ;;  %v3025_v17 = vld [vmem:[#allocation5 + $0x20] ss:$12 sps:$4 sm:$0xff]  }
  0x91   : > { %563 = vmatprep.subr.bf16.mxu1 %v3007_v6  ;;  %846 = vmatprep.subr.bf16.mxu0 %v3671_v7  ;;  %v3683_v14 = vld [vmem:[#allocation8 + $0x4c] ss:$12 sps:$4 sm:$0xff]   ;;  %v3689_v16 = vld [vmem:[#allocation8 + $0x64] ss:$12 sps:$4 sm:$0xff]   ;;  %v3698_v20 = vld [vmem:[#allocation8 + $0x7c] ss:$12 sps:$4 sm:$0xff]  }
  0x92   : > { %v3021_v18 = vld [vmem:[%s3655_s13 + $0x8] sm:$0xff]   ;;  %v3709_v24 = vld [vmem:[#allocation8 + $0x8] ss:$12 sps:$4 sm:$0xff]   ;;  %v3712_v25 = vld [vmem:[#allocation8 + $0x90] ss:$12 sps:$4 sm:$0xff]   ;;  %vm3392_vm1 = vmmov 0  }
  0x93   : > { %v3695_v19 = vld [vmem:[#allocation8 + $0x60] ss:$12 sps:$4 sm:$0xff]   ;;  %v3703_v22 = vld [vmem:[#allocation8 + $0x78] ss:$12 sps:$4 sm:$0xff]   ;;  %v3719_v28 = vld [vmem:[#allocation8 + $0xa8] ss:$12 sps:$4 sm:$0xff]  }
  0x94   : > { %564 = vmatpush1.bf16.msra.mxu1 %v3011_v8  ;;  %847 = vmatpush1.bf16.msra.mxu0 %v3673_v9  ;;  %v3707_v23 = vld [vmem:[#allocation8 + $0x94] ss:$12 sps:$4 sm:$0xff]   ;;  %v3715_v26 = vld [vmem:[#allocation8 + $0xac] ss:$12 sps:$4 sm:$0xff]   ;;  %v3738_v32 = vld [vmem:[#allocation8 + $0x50] ss:$12 sps:$4 sm:$0xff]  }
  0x95   : > { %848 = vmatprep.subr.bf16.mxu0 %v3677_v11  ;;  %2703 = vmatprep.subr.bf16.mxu1 %v3017_v13  ;;  %v3717_v27 = vld [vmem:[#allocation8 + $0x20] ss:$12 sps:$4 sm:$0xff]   ;;  %v3728_v30 = vld [vmem:[#allocation8 + $0x38] ss:$12 sps:$4 sm:$0xff]   ;;  %v3744_v33 = vld [vmem:[#allocation8 + $0x68] ss:$12 sps:$4 sm:$0xff]  }
  0x96   : > { %v3721_v29 = vld [vmem:[#allocation4] sm:$0xff]  ;;  %v3764_v36 = vld [vmem:[#allocation8 + $0xb0] ss:$12 sps:$4 sm:$0xff]   ;;  %v3795_v38 = vshrl.u32 %v497_v37, 7  ;;  %v495_v40 = vld [vmem:[%s4312_s4] sm:$0x7] }
  0x97   : > { %2492 = vmatmul.mubr.msk.bf16.vlgmr.msra.gmra.mrb[0].mxu1 %vm554_vm0, %v3013_v10  ;;  %v715_v31 = vpack.c.bf16 %v3721_v29, %v3721_v29  ;;  %v3751_v34 = vld [vmem:[#allocation8 + $0x80] ss:$12 sps:$4 sm:$0xff]   ;;  %v3757_v35 = vld [vmem:[#allocation8 + $0x98] ss:$12 sps:$4 sm:$0xff]   ;;  %s1974_s23 = sadd.s32 1, %s3646_s15  ;;  %s2090_s21 = sadd.s32 2, %s3646_s15 }
  0x98   : > { %849 = vmatpush1.bf16.msra.mxu0 %v3679_v12  ;;  %2704 = vmatpush3.bf16.msra.mxu1 %v3017_v13  ;;  %v499_v39 = vsub.s32 0, %v3795_v38  ;;  %v503_v41 = vsub.s32 1, %v3795_v38  ;;  %v507_v53 = vsub.s32 2, %v3795_v38  ;;  %s2206_s24 = sadd.s32 3, %s3646_s15  ;;  %s2600_s19 = sshll.u32 %s3482_s25, 9 }
  0x99   : > { %850 = vmatprep.subr.bf16.mxu0 %v3683_v14  ;;  %603 = vmatprep.mubr.bf16.mxu1 %v3390_v3  ;;  %s2361_s26 = sshll.u32 %s3657_s29, 4  ;;  %s4354_s27 = sld [smem:[#allocation23_spill]]  ;;  %s4260_s26 = int_to_ptr.vmem [resolvable:$true] %s2361_s26 }
  0x9a   : > { %2705 = vmatprep.subr.bf16.mxu1 %v3025_v17  ;;  %v500_v42 = vrot.slane %v495_v40, %v499_v39  ;;  %v504_v44 = vrot.slane %v495_v40, %v503_v41  ;;  %v508_v59 = vrot.slane %v495_v40, %v507_v53  ;;  %s4355_s20 = sld [smem:[#allocation25_spill]]  ;;  %s4267_s25 = scalar_lea.sflag [#allocation7], %s464_s14 }
  0x9b   : > { %s3307_s18 = scalar_lea.vmem %s4260_s26, 512  ;;  %s3393_s30 = smov [#allocation13]  }
  0x9c   : > { %851 = vmatpush1.bf16.msra.mxu0 %v3686_v15  ;;  %2706 = vmatpush3.bf16.msra.mxu1 %v3025_v17  ;;  %p3308_p12 = scmp.ne.s32.totalorder %s4260_s26, %s3307_s18 }
  0x9d   : > { %852 = vmatprep.subr.bf16.mxu0 %v3689_v16  ;;  %2711 = vmatprep.subr.bf16.mxu1 %v3391_v21 }
  0x9f   : > { %2493 = vmatmul.mubr.msk.bf16.gmra.mrb[4].mxu1 %vm554_vm0, %v3021_v18  ;;  %p4356_p0 = scmp.ne.s32.totalorder %s4354_s27, 0 }
  0xa0   : > { %853 = vmatpush1.bf16.msra.mxu0 %v3695_v19  ;;  %2707 = vmatprep.mubr.msk.bf16.mxu1 %vm554_vm0, %v3013_v10  ;;  %s4258_s12 = scalar_lea.hbm %s4355_s20, %s2600_s19 }
  0xa1   : > { %854 = vmatprep.subr.bf16.mxu0 %v3698_v20  ;;  %p3309_p2 = pnand %p3308_p12, %p4356_p0 }
  0xa3   : > { %p3310_p6 = pneg %p3309_p2 }
  0xa4   : > { %855 = vmatpush1.bf16.msra.mxu0 %v3703_v22 }
  0xa5   : > { %856 = vmatprep.subr.bf16.mxu0 %v3707_v23 }
  0xa7   : > { %2708 = vmatmul.mubr.msk.bf16.vlgmr.msra.gmra.mrb[8].mxu1 %vm554_vm0, %v3021_v18 }
  0xa8   : > { %2712 = vmatpush3.bf16.msra.mxu1 %v3709_v24  ;;  %857 = vmatpush1.bf16.msra.mxu0 %v3712_v25 }
  0xa9   : > { %2713 = vmatprep.subr.bf16.mxu1 %v3391_v21  ;;  %858 = vmatprep.subr.bf16.mxu0 %v3715_v26 }
  0xaa   : > { %2727 = vmatprep.mubr.msk.bf16.mxu1 %vm3392_vm1, %v3391_v21 }
  0xac   : > { %2714 = vmatpush3.bf16.msra.mxu1 %v3717_v27  ;;  %859 = vmatpush1.bf16.msra.mxu0 %v3719_v28 }
  0xad   : > { %2715 = vmatprep.subr.bf16.mxu1 %v3391_v21  ;;  %960 = vmatprep.subr.bf16.mxu0 %v3661_v2 }
  0xaf   : > { %877 = vmatmul.mubr.bf16.vlgmr.msra.gmra.mrb[0].mxu0 %v715_v31 }
  0xb0   : > { %2716 = vmatpush3.bf16.msra.mxu1 %v3728_v30  ;;  %961 = vmatpush1.bf16.msra.mxu0 %v3665_v5 }
  0xb1   : > { %2717 = vmatprep.subr.bf16.mxu1 %v3391_v21  ;;  %962 = vmatprep.subr.bf16.mxu0 %v3671_v7 }
  0xb2   : > { %992 = vmatprep.mubr.bf16.mxu0 %v3390_v3 }
  0xb4   : > { %2718 = vmatpush3.bf16.msra.mxu1 %v3738_v32  ;;  %963 = vmatpush1.bf16.msra.mxu0 %v3673_v9 }
  0xb5   : > { %2719 = vmatprep.subr.bf16.mxu1 %v3391_v21  ;;  %964 = vmatprep.subr.bf16.mxu0 %v3677_v11 }
  0xb8   : > { %2720 = vmatpush3.bf16.msra.mxu1 %v3744_v33  ;;  %965 = vmatpush1.bf16.msra.mxu0 %v3679_v12 }
  0xb9   : > { %2721 = vmatprep.subr.bf16.mxu1 %v3391_v21  ;;  %966 = vmatprep.subr.bf16.mxu0 %v3683_v14 }
  0xbc   : > { %2722 = vmatpush3.bf16.msra.mxu1 %v3751_v34  ;;  %967 = vmatpush1.bf16.msra.mxu0 %v3686_v15 }
  0xbd   : > { %2723 = vmatprep.subr.bf16.mxu1 %v3391_v21  ;;  %968 = vmatprep.subr.bf16.mxu0 %v3689_v16 }
  0xc0   : > { %2724 = vmatpush3.bf16.msra.mxu1 %v3757_v35  ;;  %969 = vmatpush1.bf16.msra.mxu0 %v3695_v19 }
  0xc1   : > { %2725 = vmatprep.subr.bf16.mxu1 %v3391_v21  ;;  %970 = vmatprep.subr.bf16.mxu0 %v3698_v20 }
  0xc4   : > { %2726 = vmatpush3.bf16.msra.mxu1 %v3764_v36  ;;  %971 = vmatpush1.bf16.msra.mxu0 %v3703_v22 }
  0xc5   : > { %2731 = vmatprep.subr.bf16.mxu1 %v3391_v21  ;;  %972 = vmatprep.subr.bf16.mxu0 %v3707_v23 }
  0xc7   : > { %2728 = vmatmul.mubr.bf16.vlgmr.msra.gmra.mrb[12].mxu1 %v715_v31 }
  0xc8   : > { %2732 = vmatpush3.bf16.msra.mxu1 %v3709_v24  ;;  %973 = vmatpush1.bf16.msra.mxu0 %v3712_v25 }
  0xc9   : > { %2733 = vmatprep.subr.bf16.mxu1 %v3391_v21  ;;  %974 = vmatprep.subr.bf16.mxu0 %v3715_v26 }
  0xca   : > { %2747 = vmatprep.mubr.msk.bf16.mxu1 %vm3392_vm1, %v3391_v21 }
  0xcc   : > { %2734 = vmatpush3.bf16.msra.mxu1 %v3717_v27  ;;  %975 = vmatpush1.bf16.msra.mxu0 %v3719_v28 }
  0xcd   : > { %2735 = vmatprep.subr.bf16.mxu1 %v3391_v21  ;;  %1071 = vmatprep.subr.bf16.mxu0 %v3661_v2 }
  0xd0   : > { %2736 = vmatpush3.bf16.msra.mxu1 %v3728_v30 }
  0xd1   : > { %2737 = vmatprep.subr.bf16.mxu1 %v3391_v21 }
  0xd4   : > { %2738 = vmatpush3.bf16.msra.mxu1 %v3738_v32 }
  0xd5   : > { %2739 = vmatprep.subr.bf16.mxu1 %v3391_v21 }
  0xd8   : > { %2740 = vmatpush3.bf16.msra.mxu1 %v3744_v33 }
  0xd9   : > { %2741 = vmatprep.subr.bf16.mxu1 %v3391_v21 }
  0xdc   : > { %2742 = vmatpush3.bf16.msra.mxu1 %v3751_v34 }
  0xdd   : > { %2743 = vmatprep.subr.bf16.mxu1 %v3391_v21 }
  0xe0   : > { %2744 = vmatpush3.bf16.msra.mxu1 %v3757_v35 }
  0xe1   : > { %2745 = vmatprep.subr.bf16.mxu1 %v3391_v21 }
  0xe4   : > { %2746 = vmatpush3.bf16.msra.mxu1 %v3764_v36 }
  0xe5   : > { %2751 = vmatprep.subr.bf16.mxu1 %v3391_v21 }
 0x16a   : > { %v595_v43 = vpop.f32.mrb[0].mxu1 }
 0x16b   : > { %v597_v45 = vpop.f32.mrb[1].mxu1  ;;  %v596_v6 = vadd.f32 %v595_v43, %v500_v42 }
 0x16c   : > { %v599_v46 = vpop.f32.mrb[2].mxu1  ;;  %v598_v8 = vadd.f32 %v597_v45, %v504_v44 }
 0x16d   : > { %v3806_v47 = vadd.f32 %v599_v46, %v500_v42  ;;  %v601_v48 = vpop.f32.mrb[3].mxu1 }
 0x16e   : > { %v3808_v49 = vadd.f32 %v601_v48, %v504_v44 }
 0x172   : > { %v605_v50 = vpop.f32.mrb[4].mxu1 }
 0x173   : > { %v3810_v51 = vadd.f32 %v605_v50, %v500_v42  ;;  %v607_v52 = vpop.f32.mrb[5].mxu1 }
 0x174   : > { %v3813_v54 = vadd.f32 %v607_v52, %v504_v44  ;;  %v609_v55 = vpop.f32.mrb[6].mxu1  ;;  %v3830_v52 = vld [vmem:[%s4313_s5] ss:$0 sm:$0xff] }
 0x175   : > { %v3815_v56 = vadd.f32 %v609_v55, %v500_v42  ;;  %v611_v57 = vpop.f32.mrb[7].mxu1 }
 0x176   : > { %v3817_v58 = vadd.f32 %v611_v57, %v504_v44 }
 0x17a   : > { %v2709_v60 = vpop.f32.mrb[8].mxu1 }
 0x17b   : > { %v3821_v61 = vadd.f32 %v2709_v60, %v508_v59  ;;  %v648_v62 = vpop.f32.mrb[9].mxu1 }
 0x17c   : > { %v2710_v63 = vpop.f32.mrb[10].mxu1 }
 0x17d   : > { %v3823_v0 = vadd.f32 %v2710_v63, %v508_v59  ;;  %v651_v1 = vpop.f32.mrb[11].mxu1  ;;  %v649_v63 = vadd.f32 %v648_v62, %v508_v59 }
 0x17e   : > { %v3825_v4 = vadd.f32 %v651_v1, %v508_v59 }
 0x182   : > { %v878_v10 = vpop.f32.mrb[0].mxu0 }
 0x183   : > { %v925_v13 = vadd.f32 %v878_v10, %v596_v6  ;;  %v880_v17 = vpop.f32.mrb[1].mxu0 }
 0x184   : > { %v932_v18 = vadd.f32 %v880_v17, %v598_v8  ;;  %v882_v31 = vpop.f32.mrb[2].mxu0 }
 0x185   : > { %v2520_v37 = vmul.f32 -1.442695, %v925_v13  ;;  %v883_v46 = vpop.f32.mrb[3].mxu0 }
 0x186   : > { %v2521_v40 = vmul.f32 -1.442695, %v932_v18 }
 0x187   : > { %3115 = vpow2.f32 %v2520_v37 }
 0x188   : > { %3117 = vpow2.f32 %v2521_v40 }
 0x191   : > { %v3116_v48 = vpop.eup %3115 }
 0x192   : > { %v929_v50 = vadd.f32 1.0, %v3116_v48  ;;  %v3118_v55 = vpop.eup %3117 }
 0x193   : > { %v936_v6 = vadd.f32 1.0, %v3118_v55 }
 0x194   : > { %3119 = vrcp.f32 %v929_v50 }
 0x19a   : > { %v919_v42 = vpop.f32.mrb[12].mxu1 }
 0x19b   : > { %v945_v43 = vadd.f32 %v3830_v52, %v919_v42  ;;  %v2729_v44 = vpop.f32.mrb[13].mxu1 }
 0x19c   : > { %v922_v45 = vpop.f32.mrb[14].mxu1 }
 0x19d   : > { %v2730_v57 = vpop.f32.mrb[15].mxu1 }
 0x19e   : > { %v3120_v60 = vpop.eup %3119 }
 0x19f   : > { %v946_v1 = vmul.f32 %v3120_v60, %v945_v43 }
 0x1a1   : > { %v947_v8 = vadd.f32 %v946_v1, %v649_v63 }
 0x1a3   : > { %3121 = vtanh.f32 %v947_v8 }
 0x1a4   : > { %3123 = vrcp.f32 %v936_v6 }
 0x1ad   : > { %v3122_v10 = vpop.eup %3121 }
 0x1ae   : > { %v949_v13 = vsub.f32 %v3721_v29, %v3122_v10  ;;  %v3124_v17 = vpop.eup %3123 }
 0x1b0   : > { %v950_v18 = vmul.f32 %v3124_v17, %v949_v13 }
 0x1b2   : > { %v3834_v31 = vadd.f32 %v3122_v10, %v950_v18 }
 0x1b4   : > { %v959_v37 = vpack.c.bf16 %v3834_v31, %v3834_v31 }
 0x1b6   : > { %993 = vmatmul.mubr.bf16.vlgmr.msra.gmra.mrb[4].mxu0 %v959_v37  ;;  %2748 = vmatmul.mubr.bf16.vlgmr.msra.gmra.mrb[16].mxu1 %v959_v37 }
 0x1b7   : > { %1072 = vmatpush1.bf16.msra.mxu0 %v3665_v5  ;;  %2752 = vmatpush3.bf16.msra.mxu1 %v3709_v24 }
 0x1b8   : > { %1073 = vmatprep.subr.bf16.mxu0 %v3671_v7  ;;  %2753 = vmatprep.subr.bf16.mxu1 %v3391_v21 }
 0x1b9   : > { %1103 = vmatprep.mubr.bf16.mxu0 %v3390_v3  ;;  %2767 = vmatprep.mubr.msk.bf16.mxu1 %vm3392_vm1, %v3391_v21 }
 0x1bb   : > { %1074 = vmatpush1.bf16.msra.mxu0 %v3673_v9  ;;  %2754 = vmatpush3.bf16.msra.mxu1 %v3717_v27 }
 0x1bc   : > { %1075 = vmatprep.subr.bf16.mxu0 %v3677_v11  ;;  %2755 = vmatprep.subr.bf16.mxu1 %v3391_v21 }
 0x1bf   : > { %1076 = vmatpush1.bf16.msra.mxu0 %v3679_v12  ;;  %2756 = vmatpush3.bf16.msra.mxu1 %v3728_v30 }
 0x1c0   : > { %1077 = vmatprep.subr.bf16.mxu0 %v3683_v14  ;;  %2757 = vmatprep.subr.bf16.mxu1 %v3391_v21 }
 0x1c3   : > { %1078 = vmatpush1.bf16.msra.mxu0 %v3686_v15  ;;  %2758 = vmatpush3.bf16.msra.mxu1 %v3738_v32 }
 0x1c4   : > { %1079 = vmatprep.subr.bf16.mxu0 %v3689_v16  ;;  %2759 = vmatprep.subr.bf16.mxu1 %v3391_v21 }
 0x1c7   : > { %1080 = vmatpush1.bf16.msra.mxu0 %v3695_v19  ;;  %2760 = vmatpush3.bf16.msra.mxu1 %v3744_v33 }
 0x1c8   : > { %1081 = vmatprep.subr.bf16.mxu0 %v3698_v20  ;;  %2761 = vmatprep.subr.bf16.mxu1 %v3391_v21 }
 0x1cb   : > { %1082 = vmatpush1.bf16.msra.mxu0 %v3703_v22  ;;  %2762 = vmatpush3.bf16.msra.mxu1 %v3751_v34 }
 0x1cc   : > { %1083 = vmatprep.subr.bf16.mxu0 %v3707_v23  ;;  %2763 = vmatprep.subr.bf16.mxu1 %v3391_v21 }
 0x1cf   : > { %1084 = vmatpush1.bf16.msra.mxu0 %v3712_v25  ;;  %2764 = vmatpush3.bf16.msra.mxu1 %v3757_v35 }
 0x1d0   : > { %1085 = vmatprep.subr.bf16.mxu0 %v3715_v26  ;;  %2765 = vmatprep.subr.bf16.mxu1 %v3391_v21 }
 0x1d3   : > { %1086 = vmatpush1.bf16.msra.mxu0 %v3719_v28  ;;  %2766 = vmatpush3.bf16.msra.mxu1 %v3764_v36 }
 0x1d4   : > { %1182 = vmatprep.subr.bf16.mxu0 %v3661_v2  ;;  %2771 = vmatprep.subr.bf16.mxu1 %v3391_v21 }
 0x289   : > { %v994_v29 = vpop.f32.mrb[4].mxu0  ;;  %v1035_v59 = vpop.f32.mrb[16].mxu1 }
 0x28a   : > { %v1041_v62 = vadd.f32 %v994_v29, %v3806_v47  ;;  %v996_v46 = vpop.f32.mrb[5].mxu0  ;;  %v2749_v40 = vpop.f32.mrb[17].mxu1  ;;  %v1055_v63 = vadd.f32 %v3830_v52, %v1035_v59  ;;  %v3043_v29 = vld [vmem:[#allocation10] ss:$12 sps:$4 sm:$0xff]  }
 0x28b   : > { %v1048_v48 = vadd.f32 %v996_v46, %v3808_v49  ;;  %v998_v50 = vpop.f32.mrb[6].mxu0  ;;  %v1038_v42 = vpop.f32.mrb[18].mxu1  ;;  %v3051_v40 = vld [vmem:[#allocation10 + $0x34] ss:$12 sps:$4 sm:$0xff]  }
 0x28c   : > { %v2523_v43 = vmul.f32 -1.442695, %v1041_v62  ;;  %v999_v44 = vpop.f32.mrb[7].mxu0  ;;  %v2750_v45 = vpop.f32.mrb[19].mxu1  ;;  %v3048_v62 = vld [vmem:[#allocation10 + $0x1c] ss:$12 sps:$4 sm:$0xff]  }
 0x28d   : > { %v2524_v55 = vmul.f32 -1.442695, %v1048_v48  ;;  %v3049_v48 = vld [vmem:[#allocation10 + $0x30] ss:$12 sps:$4 sm:$0xff]   ;;  %v3054_v50 = vld [vmem:[#allocation10 + $0x4c] ss:$12 sps:$4 sm:$0xff]  }
 0x28e   : > { %3125 = vpow2.f32 %v2523_v43  ;;  %v3052_v42 = vld [vmem:[#allocation10 + $0x48] ss:$12 sps:$4 sm:$0xff]   ;;  %v3057_v43 = vld [vmem:[#allocation10 + $0x64] ss:$12 sps:$4 sm:$0xff]   ;;  %v3055_v44 = vld [vmem:[#allocation10 + $0x60] ss:$12 sps:$4 sm:$0xff]  }
 0x28f   : > { %3127 = vpow2.f32 %v2524_v55  ;;  %v3058_v45 = vld [vmem:[#allocation10 + $0x78] ss:$12 sps:$4 sm:$0xff]   ;;  %v3063_v55 = vld [vmem:[#allocation10 + $0x94] ss:$12 sps:$4 sm:$0xff]  }
 0x298   : > { %v3126_v57 = vpop.eup %3125 }
 0x299   : > { %v1045_v60 = vadd.f32 1.0, %v3126_v57  ;;  %v3128_v2 = vpop.eup %3127  ;;  %v3061_v57 = vld [vmem:[#allocation10 + $0x90] ss:$12 sps:$4 sm:$0xff]  }
 0x29a   : > { %v1052_v8 = vadd.f32 1.0, %v3128_v2  ;;  %v3064_v2 = vld [vmem:[#allocation10 + $0xa8] ss:$12 sps:$4 sm:$0xff]  }
 0x29b   : > { %3129 = vrcp.f32 %v1045_v60  ;;  %v3066_v60 = vld [vmem:[#allocation10 + $0xac] ss:$12 sps:$4 sm:$0xff]  }
 0x2a5   : > { %v3130_v1 = vpop.eup %3129 }
 0x2a6   : > { %v1056_v47 = vmul.f32 %v3130_v1, %v1055_v63  ;;  %v3067_v63 = vld [vmem:[#allocation10 + $0x8] ss:$12 sps:$4 sm:$0xff]   ;;  %v3068_v1 = vld [vmem:[#allocation10 + $0x20] ss:$12 sps:$4 sm:$0xff]  }
 0x2a8   : > { %v1057_v6 = vadd.f32 %v1056_v47, %v3825_v4  ;;  %v3069_v47 = vld [vmem:[#allocation10 + $0x38] ss:$12 sps:$4 sm:$0xff]  }
 0x2aa   : > { %3131 = vtanh.f32 %v1057_v6  ;;  %v3928_v6 = vld [vmem:[#allocation11 + $0x4] ss:$12 sps:$4 sm:$0xff]  }
 0x2ab   : > { %3133 = vrcp.f32 %v1052_v8  ;;  %v3930_v8 = vld [vmem:[#allocation11] ss:$12 sps:$4 sm:$0xff]  }
 0x2b4   : > { %v3132_v49 = vpop.eup %3131 }
 0x2b5   : > { %v1059_v10 = vsub.f32 %v3834_v31, %v3132_v49  ;;  %v3134_v13 = vpop.eup %3133 }
 0x2b7   : > { %v1060_v17 = vmul.f32 %v3134_v13, %v1059_v10  ;;  %v3934_v10 = vld [vmem:[#allocation11 + $0x1c] ss:$12 sps:$4 sm:$0xff]   ;;  %v3936_v13 = vld [vmem:[#allocation11 + $0x18] ss:$12 sps:$4 sm:$0xff]  }
 0x2b9   : > { %v3878_v18 = vadd.f32 %v3132_v49, %v1060_v17  ;;  %v3073_v49 = vld [vmem:[#allocation10 + $0x50] ss:$12 sps:$4 sm:$0xff]   ;;  %v3077_v17 = vld [vmem:[#allocation10 + $0x68] ss:$12 sps:$4 sm:$0xff]  }
 0x2bb   : > { %v1070_v37 = vpack.c.bf16 %v3878_v18, %v3878_v18  ;;  %v1291_v46 = vpack.c.bf16 %v3878_v18, %v3834_v31  ;;  %v3060_v31 = vld [vmem:[#allocation10 + $0x7c] ss:$12 sps:$4 sm:$0xff]  }
 0x2bd   : > { %1104 = vmatmul.mubr.bf16.vlgmr.msra.gmra.mrb[8].mxu0 %v1070_v37  ;;  %2768 = vmatmul.mubr.bf16.vlgmr.msra.gmra.mrb[20].mxu1 %v1070_v37  ;;  %v3942_v37 = vld [vmem:[#allocation11 + $0x30] ss:$12 sps:$4 sm:$0xff]  }
 0x2be   : > { %1183 = vmatpush1.bf16.msra.mxu0 %v3665_v5  ;;  %2772 = vmatpush3.bf16.msra.mxu1 %v3709_v24  ;;  %v3045_v5 = vld [vmem:[#allocation10 + $0x4] ss:$12 sps:$4 sm:$0xff]  }
 0x2bf   : > { %1184 = vmatprep.subr.bf16.mxu0 %v3671_v7  ;;  %2773 = vmatprep.subr.bf16.mxu1 %v3391_v21 }
 0x2c0   : > { %1214 = vmatprep.mubr.bf16.mxu0 %v3390_v3  ;;  %2787 = vmatprep.mubr.msk.bf16.mxu1 %vm3392_vm1, %v3391_v21 }
 0x2c2   : > { %1185 = vmatpush1.bf16.msra.mxu0 %v3673_v9  ;;  %2774 = vmatpush3.bf16.msra.mxu1 %v3717_v27 }
 0x2c3   : > { %1186 = vmatprep.subr.bf16.mxu0 %v3677_v11  ;;  %2775 = vmatprep.subr.bf16.mxu1 %v3391_v21 }
 0x2c6   : > { %1187 = vmatpush1.bf16.msra.mxu0 %v3679_v12  ;;  %2776 = vmatpush3.bf16.msra.mxu1 %v3728_v30 }
 0x2c7   : > { %1188 = vmatprep.subr.bf16.mxu0 %v3683_v14  ;;  %2777 = vmatprep.subr.bf16.mxu1 %v3391_v21 }
 0x2ca   : > { %1189 = vmatpush1.bf16.msra.mxu0 %v3686_v15  ;;  %2778 = vmatpush3.bf16.msra.mxu1 %v3738_v32 }
 0x2cb   : > { %1190 = vmatprep.subr.bf16.mxu0 %v3689_v16  ;;  %2779 = vmatprep.subr.bf16.mxu1 %v3391_v21 }
 0x2ce   : > { %1191 = vmatpush1.bf16.msra.mxu0 %v3695_v19  ;;  %2780 = vmatpush3.bf16.msra.mxu1 %v3744_v33 }
 0x2cf   : > { %1192 = vmatprep.subr.bf16.mxu0 %v3698_v20  ;;  %2781 = vmatprep.subr.bf16.mxu1 %v3391_v21 }
 0x2d2   : > { %1193 = vmatpush1.bf16.msra.mxu0 %v3703_v22  ;;  %2782 = vmatpush3.bf16.msra.mxu1 %v3751_v34 }
 0x2d3   : > { %1194 = vmatprep.subr.bf16.mxu0 %v3707_v23  ;;  %2783 = vmatprep.subr.bf16.mxu1 %v3391_v21 }
 0x2d6   : > { %1195 = vmatpush1.bf16.msra.mxu0 %v3712_v25  ;;  %2784 = vmatpush3.bf16.msra.mxu1 %v3757_v35 }
 0x2d7   : > { %1196 = vmatprep.subr.bf16.mxu0 %v3715_v26  ;;  %2785 = vmatprep.subr.bf16.mxu1 %v3391_v21 }
 0x2da   : > { %1197 = vmatpush1.bf16.msra.mxu0 %v3719_v28  ;;  %2786 = vmatpush3.bf16.msra.mxu1 %v3764_v36 }
 0x2db   : > { %1470 = vmatprep.subr.bf16.mxu0 %v3045_v5  ;;  %2791 = vmatprep.subr.bf16.mxu1 %v3067_v63  ;;  %v3081_v5 = vld [vmem:[#allocation10 + $0x80] ss:$12 sps:$4 sm:$0xff]  }
 0x390   : > { %v1105_v7 = vpop.f32.mrb[8].mxu0  ;;  %v1146_v9 = vpop.f32.mrb[20].mxu1 }
 0x391   : > { %v1152_v11 = vadd.f32 %v1105_v7, %v3810_v51  ;;  %v1107_v12 = vpop.f32.mrb[9].mxu0  ;;  %v2769_v14 = vpop.f32.mrb[21].mxu1  ;;  %v1166_v28 = vadd.f32 %v3830_v52, %v1146_v9  ;;  %v3944_v7 = vld [vmem:[#allocation11 + $0x4c] ss:$12 sps:$4 sm:$0xff]   ;;  %v3948_v9 = vld [vmem:[#allocation11 + $0x48] ss:$12 sps:$4 sm:$0xff]  }
 0x392   : > { %v1159_v15 = vadd.f32 %v1107_v12, %v3813_v54  ;;  %v1109_v16 = vpop.f32.mrb[10].mxu0  ;;  %v1149_v19 = vpop.f32.mrb[22].mxu1  ;;  %v3951_v12 = vld [vmem:[#allocation11 + $0x64] ss:$12 sps:$4 sm:$0xff]   ;;  %v3954_v14 = vld [vmem:[#allocation11 + $0x60] ss:$12 sps:$4 sm:$0xff]  }
 0x393   : > { %v2525_v20 = vmul.f32 -1.442695, %v1152_v11  ;;  %v1110_v22 = vpop.f32.mrb[11].mxu0  ;;  %v2770_v23 = vpop.f32.mrb[23].mxu1  ;;  %v3085_v11 = vld [vmem:[#allocation10 + $0x98] ss:$12 sps:$4 sm:$0xff]  }
 0x394   : > { %v2526_v24 = vmul.f32 -1.442695, %v1159_v15  ;;  %v3089_v15 = vld [vmem:[#allocation10 + $0xb0] ss:$12 sps:$4 sm:$0xff]   ;;  %v3960_v19 = vld [vmem:[#allocation11 + $0x78] ss:$12 sps:$4 sm:$0xff]  }
 0x395   : > { %3135 = vpow2.f32 %v2525_v20  ;;  %v3957_v16 = vld [vmem:[#allocation11 + $0x7c] ss:$12 sps:$4 sm:$0xff]   ;;  %v3965_v20 = vld [vmem:[#allocation11 + $0x94] ss:$12 sps:$4 sm:$0xff]   ;;  %v3971_v23 = vld [vmem:[#allocation11 + $0xac] ss:$12 sps:$4 sm:$0xff]  }
 0x396   : > { %3137 = vpow2.f32 %v2526_v24  ;;  %v3967_v22 = vld [vmem:[#allocation11 + $0x90] ss:$12 sps:$4 sm:$0xff]   ;;  %v3974_v24 = vld [vmem:[#allocation11 + $0xa8] ss:$12 sps:$4 sm:$0xff]  }
 0x39f   : > { %v3136_v25 = vpop.eup %3135 }
 0x3a0   : > { %v1156_v26 = vadd.f32 1.0, %v3136_v25  ;;  %v3138_v27 = vpop.eup %3137 }
 0x3a1   : > { %v1163_v34 = vadd.f32 1.0, %v3138_v27 }
 0x3a2   : > { %3139 = vrcp.f32 %v1156_v26 }
 0x3ac   : > { %v3140_v30 = vpop.eup %3139 }
 0x3ad   : > { %v1167_v32 = vmul.f32 %v3140_v30, %v1166_v28 }
 0x3af   : > { %v1168_v33 = vadd.f32 %v1167_v32, %v3821_v61  ;;  %v3046_v61 = vld [vmem:[#allocation10 + $0x18] ss:$12 sps:$4 sm:$0xff]  }
 0x3b1   : > { %3141 = vtanh.f32 %v1168_v33 }
 0x3b2   : > { %3143 = vrcp.f32 %v1163_v34 }
 0x3bb   : > { %v3142_v35 = vpop.eup %3141 }
 0x3bc   : > { %v1170_v36 = vsub.f32 %v3878_v18, %v3142_v35  ;;  %v3144_v51 = vpop.eup %3143  ;;  %v3940_v18 = vld [vmem:[#allocation11 + $0x34] ss:$12 sps:$4 sm:$0xff]  }
 0x3be   : > { %v1171_v54 = vmul.f32 %v3144_v51, %v1170_v36 }
 0x3c0   : > { %v3920_v4 = vadd.f32 %v3142_v35, %v1171_v54 }
 0x3c2   : > { %v1181_v59 = vpack.c.bf16 %v3920_v4, %v3920_v4 }
 0x3c4   : > { %1215 = vmatmul.mubr.bf16.vlgmr.msra.gmra.mrb[12].mxu0 %v1181_v59  ;;  %2788 = vmatmul.mubr.bf16.vlgmr.msra.gmra.mrb[24].mxu1 %v1181_v59 }
 0x3c5   : > { %1471 = vmatpush1.bf16.msra.mxu0 %v3043_v29  ;;  %2807 = vmatprep.mubr.bf16.mxu1 %v1291_v46 }
 0x3c6   : > { %1472 = vmatprep.subr.bf16.mxu0 %v3048_v62  ;;  %1502 = vmatprep.mubr.bf16.mxu0 %v3390_v3 }
 0x3c7   : > { %2792 = vmatpush3.bf16.msra.mxu1 %v3067_v63 }
 0x3c8   : > { %2793 = vmatprep.subr.bf16.mxu1 %v3068_v1 }
 0x3c9   : > { %1473 = vmatpush1.bf16.msra.mxu0 %v3046_v61 }
 0x3ca   : > { %1474 = vmatprep.subr.bf16.mxu0 %v3051_v40 }
 0x3cb   : > { %2794 = vmatpush3.bf16.msra.mxu1 %v3068_v1  ;;  %v4010_v1 = vld [vmem:[#allocation11 + $0x50] ss:$12 sps:$4 sm:$0xff]  }
 0x3cc   : > { %2795 = vmatprep.subr.bf16.mxu1 %v3069_v47 }
 0x3cd   : > { %1475 = vmatpush1.bf16.msra.mxu0 %v3049_v48 }
 0x3ce   : > { %1476 = vmatprep.subr.bf16.mxu0 %v3054_v50 }
 0x3cf   : > { %2796 = vmatpush3.bf16.msra.mxu1 %v3069_v47  ;;  %v4017_v47 = vld [vmem:[#allocation11 + $0x68] ss:$12 sps:$4 sm:$0xff]  }
 0x3d0   : > { %2797 = vmatprep.subr.bf16.mxu1 %v3073_v49 }
 0x3d1   : > { %1477 = vmatpush1.bf16.msra.mxu0 %v3052_v42 }
 0x3d2   : > { %1478 = vmatprep.subr.bf16.mxu0 %v3057_v43 }
 0x3d3   : > { %2798 = vmatpush3.bf16.msra.mxu1 %v3073_v49  ;;  %v4023_v49 = vld [vmem:[#allocation11 + $0x80] ss:$12 sps:$4 sm:$0xff]  }
 0x3d4   : > { %2799 = vmatprep.subr.bf16.mxu1 %v3077_v17 }
 0x3d5   : > { %1479 = vmatpush1.bf16.msra.mxu0 %v3055_v44 }
 0x3d6   : > { %1480 = vmatprep.subr.bf16.mxu0 %v3060_v31 }
 0x3d7   : > { %2800 = vmatpush3.bf16.msra.mxu1 %v3077_v17  ;;  %v4029_v17 = vld [vmem:[#allocation11 + $0x98] ss:$12 sps:$4 sm:$0xff]  }
 0x3d8   : > { %2801 = vmatprep.subr.bf16.mxu1 %v3081_v5 }
 0x3d9   : > { %1481 = vmatpush1.bf16.msra.mxu0 %v3058_v45 }
 0x3da   : > { %1482 = vmatprep.subr.bf16.mxu0 %v3063_v55 }
 0x3db   : > { %2802 = vmatpush3.bf16.msra.mxu1 %v3081_v5  ;;  %v4035_v5 = vld [vmem:[#allocation11 + $0xb0] ss:$12 sps:$4 sm:$0xff]  }
 0x3dc   : > { %2803 = vmatprep.subr.bf16.mxu1 %v3085_v11 }
 0x3dd   : > { %1483 = vmatpush1.bf16.msra.mxu0 %v3061_v57  ;;  %v3991_v57 = vld [vmem:[#allocation11 + $0x8] ss:$12 sps:$4 sm:$0xff]  }
 0x3de   : > { %1484 = vmatprep.subr.bf16.mxu0 %v3066_v60  ;;  %v3995_v60 = vld [vmem:[#allocation11 + $0x20] ss:$12 sps:$4 sm:$0xff]  }
 0x3df   : > { %2804 = vmatpush3.bf16.msra.mxu1 %v3085_v11  ;;  %v1325_v11 = vld [vmem:[%s4316_s8] sm:$0x7] }
 0x3e0   : > { %2805 = vmatprep.subr.bf16.mxu1 %v3089_v15 }
 0x3e1   : > { %1485 = vmatpush1.bf16.msra.mxu0 %v3064_v2  ;;  %v3998_v2 = vld [vmem:[#allocation4 + $0x8] sm:$0xff] }
 0x3e2   : > { %1751 = vmatprep.subr.bf16.mxu0 %v3928_v6  ;;  %v1622_v63 = vpack.c.bf16 %v3998_v2, %v3998_v2 }
 0x3e3   : > { %2806 = vmatpush3.bf16.msra.mxu1 %v3089_v15  ;;  %v1338_v15 = vrot.slane %v1325_v11, %v507_v53 }
 0x3e4   : > { %1503 = vmatmul.mubr.bf16.vlgmr.msra.gmra.mrb[16].mxu0 %v1291_v46  ;;  %2811 = vmatprep.subr.bf16.mxu1 %v3391_v21 }
 0x3e5   : > { %1512 = vmatprep.mubr.bf16.mxu0 %v3390_v3  ;;  %1752 = vmatpush1.bf16.msra.mxu0 %v3930_v8 }
 0x3e6   : > { %1753 = vmatprep.subr.bf16.mxu0 %v3934_v10 }
 0x3e9   : > { %1754 = vmatpush1.bf16.msra.mxu0 %v3936_v13 }
 0x3ea   : > { %1755 = vmatprep.subr.bf16.mxu0 %v3940_v18 }
 0x3ed   : > { %1756 = vmatpush1.bf16.msra.mxu0 %v3942_v37 }
 0x3ee   : > { %1757 = vmatprep.subr.bf16.mxu0 %v3944_v7 }
 0x3f1   : > { %1758 = vmatpush1.bf16.msra.mxu0 %v3948_v9 }
 0x3f2   : > { %1759 = vmatprep.subr.bf16.mxu0 %v3951_v12 }
 0x3f5   : > { %1760 = vmatpush1.bf16.msra.mxu0 %v3954_v14 }
 0x3f6   : > { %1761 = vmatprep.subr.bf16.mxu0 %v3957_v16 }
 0x3f9   : > { %1762 = vmatpush1.bf16.msra.mxu0 %v3960_v19 }
 0x3fa   : > { %1763 = vmatprep.subr.bf16.mxu0 %v3965_v20 }
 0x3fd   : > { %1764 = vmatpush1.bf16.msra.mxu0 %v3967_v22 }
 0x3fe   : > { %1765 = vmatprep.subr.bf16.mxu0 %v3971_v23 }
 0x401   : > { %1766 = vmatpush1.bf16.msra.mxu0 %v3974_v24 }
 0x402   : > { %1872 = vmatprep.subr.bf16.mxu0 %v3928_v6 }
 0x497   : > { %v1216_v25 = vpop.f32.mrb[12].mxu0  ;;  %v1257_v26 = vpop.f32.mrb[24].mxu1 }
 0x498   : > { %v1263_v27 = vadd.f32 %v1216_v25, %v3815_v56  ;;  %v1218_v28 = vpop.f32.mrb[13].mxu0  ;;  %v2789_v30 = vpop.f32.mrb[25].mxu1  ;;  %v1277_v46 = vadd.f32 %v3830_v52, %v1257_v26 }
 0x499   : > { %v1270_v32 = vadd.f32 %v1218_v28, %v3817_v58  ;;  %v1220_v33 = vpop.f32.mrb[14].mxu0  ;;  %v1260_v34 = vpop.f32.mrb[26].mxu1 }
 0x49a   : > { %v2527_v35 = vmul.f32 -1.442695, %v1263_v27  ;;  %v1221_v36 = vpop.f32.mrb[15].mxu0  ;;  %v2790_v51 = vpop.f32.mrb[27].mxu1  ;;  %v4081_v34 = vrot.slane %v1325_v11, %v499_v39 }
 0x49b   : > { %v2528_v54 = vmul.f32 -1.442695, %v1270_v32  ;;  %v4089_v51 = vrot.slane %v1325_v11, %v503_v41 }
 0x49c   : > { %3145 = vpow2.f32 %v2527_v35 }
 0x49d   : > { %3147 = vpow2.f32 %v2528_v54 }
 0x4a6   : > { %v3146_v29 = vpop.eup %3145 }
 0x4a7   : > { %v1267_v59 = vadd.f32 1.0, %v3146_v29  ;;  %v3148_v62 = vpop.eup %3147 }
 0x4a8   : > { %v1274_v48 = vadd.f32 1.0, %v3148_v62 }
 0x4a9   : > { %3149 = vrcp.f32 %v1267_v59 }
 0x4b3   : > { %v3150_v61 = vpop.eup %3149 }
 0x4b4   : > { %v1278_v56 = vmul.f32 %v3150_v61, %v1277_v46 }
 0x4b6   : > { %v1279_v40 = vadd.f32 %v1278_v56, %v3823_v0 }
 0x4b7   : > { %v3982_v58 = vpop.f32.mrb[16].mxu0 }
 0x4b8   : > { %3151 = vtanh.f32 %v1279_v40  ;;  %v3984_v50 = vpop.f32.mrb[17].mxu0  ;;  %v1505_v29 = vadd.f32 %v3982_v58, %v4081_v34  ;;  %v4100_v58 = vld [vmem:[%s4317_s9] ss:$0 sm:$0xff] }
 0x4b9   : > { %v3986_v42 = vpop.f32.mrb[18].mxu0  ;;  %3153 = vrcp.f32 %v1274_v48  ;;  %v1507_v59 = vadd.f32 %v3984_v50, %v4089_v51 }
 0x4ba   : > { %v3988_v43 = vpop.f32.mrb[19].mxu0 }
 0x4c2   : > { %v3152_v44 = vpop.eup %3151 }
 0x4c3   : > { %v1281_v31 = vsub.f32 %v3920_v4, %v3152_v44  ;;  %v3154_v45 = vpop.eup %3153 }
 0x4c5   : > { %v1282_v52 = vmul.f32 %v3154_v45, %v1281_v31 }
 0x4c7   : > { %v1283_v55 = vadd.f32 %v3152_v44, %v1282_v52 }
 0x4c9   : > { %1286 = vst [vmem:[#allocation4] sm:$0xff] %v1283_v55  ;;  %v1292_v0 = vpack.c.bf16 %v1283_v55, %v3920_v4  ;;  %v4006_v4 = vld [vmem:[#allocation11 + $0x38] ss:$12 sps:$4 sm:$0xff]  }
 0x4cb   : > { %1513 = vmatmul.mubr.bf16.gmra.mrb[20].mxu0 %v1292_v0  ;;  %2808 = vmatmul.mubr.bf16.vlgmr.msra.gmra.mrb[28].mxu1 %v1292_v0 }
 0x4cc   : > { %2812 = vmatpush3.bf16.msra.mxu1 %v3991_v57  ;;  %1783 = vmatprep.mubr.bf16.mxu0 %v3390_v3 }
 0x4cd   : > { %2813 = vmatprep.subr.bf16.mxu1 %v3391_v21  ;;  %2827 = vmatprep.mubr.msk.bf16.mxu1 %vm3392_vm1, %v3391_v21 }
 0x4d0   : > { %2814 = vmatpush3.bf16.msra.mxu1 %v3995_v60 }
 0x4d1   : > { %2815 = vmatprep.subr.bf16.mxu1 %v3391_v21 }
 0x4d3   : > { %1784 = vmatmul.mubr.bf16.vlgmr.msra.gmra.mrb[24].mxu0 %v1622_v63 }
 0x4d4   : > { %2816 = vmatpush3.bf16.msra.mxu1 %v4006_v4  ;;  %1873 = vmatpush1.bf16.msra.mxu0 %v3930_v8 }
 0x4d5   : > { %2817 = vmatprep.subr.bf16.mxu1 %v3391_v21  ;;  %1874 = vmatprep.subr.bf16.mxu0 %v3934_v10 }
 0x4d6   : > { %1904 = vmatprep.mubr.bf16.mxu0 %v3390_v3 }
 0x4d8   : > { %2818 = vmatpush3.bf16.msra.mxu1 %v4010_v1  ;;  %1875 = vmatpush1.bf16.msra.mxu0 %v3936_v13 }
 0x4d9   : > { %2819 = vmatprep.subr.bf16.mxu1 %v3391_v21  ;;  %1876 = vmatprep.subr.bf16.mxu0 %v3940_v18 }
 0x4dc   : > { %2820 = vmatpush3.bf16.msra.mxu1 %v4017_v47  ;;  %1877 = vmatpush1.bf16.msra.mxu0 %v3942_v37 }
 0x4dd   : > { %2821 = vmatprep.subr.bf16.mxu1 %v3391_v21  ;;  %1878 = vmatprep.subr.bf16.mxu0 %v3944_v7 }
 0x4e0   : > { %2822 = vmatpush3.bf16.msra.mxu1 %v4023_v49  ;;  %1879 = vmatpush1.bf16.msra.mxu0 %v3948_v9 }
 0x4e1   : > { %2823 = vmatprep.subr.bf16.mxu1 %v3391_v21  ;;  %1880 = vmatprep.subr.bf16.mxu0 %v3951_v12 }
 0x4e4   : > { %2824 = vmatpush3.bf16.msra.mxu1 %v4029_v17  ;;  %1881 = vmatpush1.bf16.msra.mxu0 %v3954_v14 }
 0x4e5   : > { %2825 = vmatprep.subr.bf16.mxu1 %v3391_v21  ;;  %1882 = vmatprep.subr.bf16.mxu0 %v3957_v16 }
 0x4e8   : > { %2826 = vmatpush3.bf16.msra.mxu1 %v4035_v5  ;;  %1883 = vmatpush1.bf16.msra.mxu0 %v3960_v19 }
 0x4e9   : > { %2831 = vmatprep.subr.bf16.mxu1 %v3391_v21  ;;  %1884 = vmatprep.subr.bf16.mxu0 %v3965_v20 }
 0x4eb   : > { %2828 = vmatmul.mubr.bf16.vlgmr.msra.gmra.mrb[32].mxu1 %v1622_v63 }
 0x4ec   : > { %2832 = vmatpush3.bf16.msra.mxu1 %v3991_v57  ;;  %1885 = vmatpush1.bf16.msra.mxu0 %v3967_v22 }
 0x4ed   : > { %2833 = vmatprep.subr.bf16.mxu1 %v3391_v21  ;;  %1886 = vmatprep.subr.bf16.mxu0 %v3971_v23 }
 0x4ee   : > { %2847 = vmatprep.mubr.msk.bf16.mxu1 %vm3392_vm1, %v3391_v21 }
 0x4f0   : > { %2834 = vmatpush3.bf16.msra.mxu1 %v3995_v60  ;;  %1887 = vmatpush1.bf16.msra.mxu0 %v3974_v24 }
 0x4f1   : > { %2835 = vmatprep.subr.bf16.mxu1 %v3391_v21  ;;  %1988 = vmatprep.subr.bf16.mxu0 %v3928_v6 }
 0x4f4   : > { %2836 = vmatpush3.bf16.msra.mxu1 %v4006_v4 }
 0x4f5   : > { %2837 = vmatprep.subr.bf16.mxu1 %v3391_v21 }
 0x4f8   : > { %2838 = vmatpush3.bf16.msra.mxu1 %v4010_v1 }
 0x4f9   : > { %2839 = vmatprep.subr.bf16.mxu1 %v3391_v21 }
 0x4fc   : > { %2840 = vmatpush3.bf16.msra.mxu1 %v4017_v47 }
 0x4fd   : > { %2841 = vmatprep.subr.bf16.mxu1 %v3391_v21 }
 0x500   : > { %2842 = vmatpush3.bf16.msra.mxu1 %v4023_v49 }
 0x501   : > { %2843 = vmatprep.subr.bf16.mxu1 %v3391_v21 }
 0x504   : > { %2844 = vmatpush3.bf16.msra.mxu1 %v4029_v17 }
 0x505   : > { %2845 = vmatprep.subr.bf16.mxu1 %v3391_v21 }
 0x508   : > { %2846 = vmatpush3.bf16.msra.mxu1 %v4035_v5 }
 0x509   : > { %2851 = vmatprep.subr.bf16.mxu1 %v3391_v21 }
 0x59e   : > { %v4071_v25 = vpop.f32.mrb[20].mxu0  ;;  %v2809_v26 = vpop.f32.mrb[28].mxu1 }
 0x59f   : > { %v4073_v27 = vadd.f32 %v2809_v26, %v1338_v15  ;;  %v4075_v28 = vpop.f32.mrb[21].mxu0  ;;  %v1557_v30 = vpop.f32.mrb[29].mxu1 }
 0x5a0   : > { %v4077_v32 = vpop.f32.mrb[22].mxu0  ;;  %v2810_v33 = vpop.f32.mrb[30].mxu1  ;;  %v1558_v11 = vadd.f32 %v1557_v30, %v1338_v15  ;;  %v1975_v30 = vstv %s1974_s23  ;;  %s3311_s23 = sshll.u32 %s3393_s30, 4  ;;  %s3312_s23 = int_to_ptr.vmem [resolvable:$false] %s3311_s23 }
 0x5a1   : > { %v4083_v35 = vadd.f32 %v2810_v33, %v1338_v15  ;;  %v4085_v36 = vpop.f32.mrb[23].mxu0  ;;  %v1560_v53 = vpop.f32.mrb[31].mxu1  ;;  %p3314_p9 = scmp.lt.s32.totalorder %s4260_s26, %s3312_s23 }
 0x5a2   : > { %v4091_v54 = vadd.f32 %v1560_v53, %v1338_v15  ;;  %v1859_v15 = vstv %s3646_s15 }
 0x5a6   : > { %v1785_v62 = vpop.f32.mrb[24].mxu0 }
 0x5a7   : > { %v1832_v39 = vadd.f32 %v1785_v62, %v1505_v29  ;;  %v1787_v46 = vpop.f32.mrb[25].mxu0 }
 0x5a8   : > { %v1839_v61 = vadd.f32 %v1787_v46, %v1507_v59  ;;  %v1789_v56 = vpop.f32.mrb[26].mxu0 }
 0x5a9   : > { %v2577_v40 = vmul.f32 -1.442695, %v1832_v39  ;;  %v1790_v48 = vpop.f32.mrb[27].mxu0 }
 0x5aa   : > { %v2578_v44 = vmul.f32 -1.442695, %v1839_v61  ;;  %v1511_v48 = vadd.f32 %v3988_v43, %v4089_v51 }
 0x5ab   : > { %3155 = vpow2.f32 %v2577_v40 }
 0x5ac   : > { %3157 = vpow2.f32 %v2578_v44 }
 0x5b5   : > { %v3156_v38 = vpop.eup %3155 }
 0x5b6   : > { %v1836_v41 = vadd.f32 1.0, %v3156_v38  ;;  %v3158_v55 = vpop.eup %3157 }
 0x5b7   : > { %v1843_v33 = vadd.f32 1.0, %v3158_v55 }
 0x5b8   : > { %3159 = vrcp.f32 %v1836_v41 }
 0x5be   : > { %v1826_v31 = vpop.f32.mrb[32].mxu1 }
 0x5bf   : > { %v1852_v50 = vadd.f32 %v4100_v58, %v1826_v31  ;;  %v2829_v45 = vpop.f32.mrb[33].mxu1 }
 0x5c0   : > { %v1829_v52 = vpop.f32.mrb[34].mxu1 }
 0x5c1   : > { %v2830_v0 = vpop.f32.mrb[35].mxu1 }
 0x5c2   : > { %v3160_v63 = vpop.eup %3159 }
 0x5c3   : > { %v1853_v26 = vmul.f32 %v3160_v63, %v1852_v50 }
 0x5c5   : > { %v1854_v53 = vadd.f32 %v1853_v26, %v1558_v11 }
 0x5c7   : > { %3161 = vtanh.f32 %v1854_v53 }
 0x5c8   : > { %3163 = vrcp.f32 %v1843_v33 }
 0x5d1   : > { %v3162_v29 = vpop.eup %3161 }
 0x5d2   : > { %v1856_v59 = vsub.f32 %v3998_v2, %v3162_v29  ;;  %v3164_v62 = vpop.eup %3163  ;;  %v4146_v2 = vld [vmem:[%s4308_s0] sm:$0xff] }
 0x5d3   : > { %vm1860_vm2 = vcmp.gt.s32.totalorder %v4146_v2, %v1859_v15  ;;  %vm1976_vm3 = vcmp.gt.s32.totalorder %v4146_v2, %v1975_v30 }
 0x5d4   : > { %v1857_v39 = vmul.f32 %v3164_v62, %v1856_v59  ;;  %v1861_v56 = vsel %vm1860_vm2, 1, %v3390_v3  ;;  %v1977_v40 = vsel %vm1976_vm3, 1, %v3390_v3 }
 0x5d5   : > { %1863 = vperm.xlu0 %2999, %v1861_v56  }
 0x5d6   : > { %v4104_v46 = vadd.f32 %v3162_v29, %v1857_v39 }
 0x5d8   : > { %v1871_v61 = vpack.c.bf16 %v4104_v46, %v4104_v46 }
 0x5d9   : > { %1979 = vperm.xlu0 %2999, %v1977_v40  }
 0x5da   : > { %1905 = vmatmul.mubr.bf16.vlgmr.msra.gmra.mrb[28].mxu0 %v1871_v61  ;;  %2848 = vmatmul.mubr.bf16.vlgmr.msra.gmra.mrb[36].mxu1 %v1871_v61 }
 0x5db   : > { %1989 = vmatpush1.bf16.msra.mxu0 %v3930_v8  ;;  %2852 = vmatpush3.bf16.msra.mxu1 %v3991_v57 }
 0x5dc   : > { %1990 = vmatprep.subr.bf16.mxu0 %v3934_v10  ;;  %2853 = vmatprep.subr.bf16.mxu1 %v3391_v21 }
 0x5dd   : > { %2020 = vmatprep.mubr.bf16.mxu0 %v3390_v3  ;;  %2867 = vmatprep.mubr.msk.bf16.mxu1 %vm3392_vm1, %v3391_v21 }
 0x5df   : > { %1991 = vmatpush1.bf16.msra.mxu0 %v3936_v13  ;;  %2854 = vmatpush3.bf16.msra.mxu1 %v3995_v60 }
 0x5e0   : > { %1992 = vmatprep.subr.bf16.mxu0 %v3940_v18  ;;  %2855 = vmatprep.subr.bf16.mxu1 %v3391_v21 }
 0x5e3   : > { %1993 = vmatpush1.bf16.msra.mxu0 %v3942_v37  ;;  %2856 = vmatpush3.bf16.msra.mxu1 %v4006_v4 }
 0x5e4   : > { %1994 = vmatprep.subr.bf16.mxu0 %v3944_v7  ;;  %2857 = vmatprep.subr.bf16.mxu1 %v3391_v21 }
 0x5e7   : > { %1995 = vmatpush1.bf16.msra.mxu0 %v3948_v9  ;;  %2858 = vmatpush3.bf16.msra.mxu1 %v4010_v1 }
 0x5e8   : > { %1996 = vmatprep.subr.bf16.mxu0 %v3951_v12  ;;  %2859 = vmatprep.subr.bf16.mxu1 %v3391_v21 }
 0x5eb   : > { %1997 = vmatpush1.bf16.msra.mxu0 %v3954_v14  ;;  %2860 = vmatpush3.bf16.msra.mxu1 %v4017_v47 }
 0x5ec   : > { %1998 = vmatprep.subr.bf16.mxu0 %v3957_v16  ;;  %2861 = vmatprep.subr.bf16.mxu1 %v3391_v21 }
 0x5ef   : > { %1999 = vmatpush1.bf16.msra.mxu0 %v3960_v19  ;;  %2862 = vmatpush3.bf16.msra.mxu1 %v4023_v49 }
 0x5f0   : > { %2000 = vmatprep.subr.bf16.mxu0 %v3965_v20  ;;  %2863 = vmatprep.subr.bf16.mxu1 %v3391_v21 }
 0x5f3   : > { %2001 = vmatpush1.bf16.msra.mxu0 %v3967_v22  ;;  %2864 = vmatpush3.bf16.msra.mxu1 %v4029_v17 }
 0x5f4   : > { %2002 = vmatprep.subr.bf16.mxu0 %v3971_v23  ;;  %2865 = vmatprep.subr.bf16.mxu1 %v3391_v21 }
 0x5f7   : > { %2003 = vmatpush1.bf16.msra.mxu0 %v3974_v24  ;;  %2866 = vmatpush3.bf16.msra.mxu1 %v4035_v5 }
 0x5f8   : > { %2104 = vmatprep.subr.bf16.mxu0 %v3928_v6  ;;  %2871 = vmatprep.subr.bf16.mxu1 %v3391_v21  ;;  %v1509_v6 = vadd.f32 %v3986_v42, %v4081_v34 }
 0x6ad   : > { %v1906_v44 = vpop.f32.mrb[28].mxu0  ;;  %v1947_v38 = vpop.f32.mrb[36].mxu1 }
 0x6ae   : > { %v1953_v41 = vadd.f32 %v1906_v44, %v1509_v6  ;;  %v1908_v31 = vpop.f32.mrb[29].mxu0  ;;  %v2849_v50 = vpop.f32.mrb[37].mxu1  ;;  %v1967_v43 = vadd.f32 %v4100_v58, %v1947_v38 }
 0x6af   : > { %v1960_v45 = vadd.f32 %v1908_v31, %v1511_v48  ;;  %v1910_v52 = vpop.f32.mrb[30].mxu0  ;;  %v1950_v55 = vpop.f32.mrb[38].mxu1  ;;  %v3107_v50 = vld [vmem:[%s4318_s10] sm:$0xff]  }
 0x6b0   : > { %v2580_v0 = vmul.f32 -1.442695, %v1953_v41  ;;  %v1911_v63 = vpop.f32.mrb[31].mxu0  ;;  %v2850_v11 = vpop.f32.mrb[39].mxu1  ;;  %v3109_v52 = vld [vmem:[%s4318_s10 + $0x10] sm:$0xff]   ;;  %v3111_v55 = vld [vmem:[%s4318_s10 + $0x20] sm:$0xff]  }
 0x6b1   : > { %v2581_v26 = vmul.f32 -1.442695, %v1960_v45  ;;  %v3108_v45 = vld [vmem:[%s4318_s10 + $0x8] sm:$0xff]   ;;  %v3113_v63 = vld [vmem:[%s4318_s10 + $0x30] sm:$0xff]   ;;  %v3114_v11 = vld [vmem:[%s4318_s10 + $0x38] sm:$0xff]  }
 0x6b2   : > { %3165 = vpow2.f32 %v2580_v0  ;;  %v3112_v0 = vld [vmem:[%s4318_s10 + $0x28] sm:$0xff]  }
 0x6b3   : > { %3167 = vpow2.f32 %v2581_v26  ;;  %v1519_v26 = vadd.f32 %v4077_v32, %v4081_v34 }
 0x6bc   : > { %v3166_v33 = vpop.eup %3165 }
 0x6bd   : > { %v1957_v53 = vadd.f32 1.0, %v3166_v33  ;;  %v3168_v42 = vpop.eup %3167  ;;  %v1521_v33 = vadd.f32 %v4085_v36, %v4089_v51 }
 0x6be   : > { %v1964_v39 = vadd.f32 1.0, %v3168_v42 }
 0x6bf   : > { %3169 = vrcp.f32 %v1957_v53 }
 0x6c9   : > { %v3170_v29 = vpop.eup %3169 }
 0x6ca   : > { %v1968_v59 = vmul.f32 %v3170_v29, %v1967_v43 }
 0x6cc   : > { %v1969_v62 = vadd.f32 %v1968_v59, %v4091_v54 }
 0x6ce   : > { %3171 = vtanh.f32 %v1969_v62 }
 0x6cf   : > { %3173 = vrcp.f32 %v1964_v39 }
 0x6d8   : > { %v3172_v61 = vpop.eup %3171 }
 0x6d9   : > { %v1971_v15 = vsub.f32 %v4104_v46, %v3172_v61  ;;  %v3174_v30 = vpop.eup %3173 }
 0x6db   : > { %v1972_v56 = vmul.f32 %v3174_v30, %v1971_v15 }
 0x6dd   : > { %v4161_v40 = vadd.f32 %v3172_v61, %v1972_v56 }
 0x6df   : > { %v1987_v6 = vpack.c.bf16 %v4161_v40, %v4161_v40 }
 0x6e1   : > { %2021 = vmatmul.mubr.bf16.vlgmr.msra.gmra.mrb[32].mxu0 %v1987_v6  ;;  %2868 = vmatmul.mubr.bf16.vlgmr.msra.gmra.mrb[40].mxu1 %v1987_v6 }
 0x6e2   : > { %2105 = vmatpush1.bf16.msra.mxu0 %v3930_v8  ;;  %2872 = vmatpush3.bf16.msra.mxu1 %v3991_v57  ;;  %v2091_v8 = vstv %s2090_s21  ;;  %s3313_s21 = scalar_lea.vmem %s3312_s23, 1024 }
 0x6e3   : > { %2106 = vmatprep.subr.bf16.mxu0 %v3934_v10  ;;  %2873 = vmatprep.subr.bf16.mxu1 %v3391_v21  ;;  %v2207_v10 = vstv %s2206_s24  ;;  %vm2092_vm4 = vcmp.gt.s32.totalorder %v4146_v2, %v2091_v8  ;;  %p3315_p5 = scmp.lt.s32.totalorder %s3313_s21, %s3307_s18 }
 0x6e4   : > { %2136 = vmatprep.mubr.bf16.mxu0 %v3390_v3  ;;  %2887 = vmatprep.mubr.msk.bf16.mxu1 %vm3392_vm1, %v3391_v21  ;;  %vm2208_vm5 = vcmp.gt.s32.totalorder %v4146_v2, %v2207_v10 }
 0x6e5   : > { %p3316_p1 = por %p3315_p5, %p3314_p9 }
 0x6e6   : > { %2107 = vmatpush1.bf16.msra.mxu0 %v3936_v13  ;;  %2874 = vmatpush3.bf16.msra.mxu1 %v3995_v60  ;;  %v2093_v13 = vsel %vm2092_vm4, 1, %v3390_v3 }
 0x6e7   : > { %2108 = vmatprep.subr.bf16.mxu0 %v3940_v18  ;;  %2875 = vmatprep.subr.bf16.mxu1 %v3391_v21  ;;  %v2209_v18 = vsel %vm2208_vm5, 1, %v3390_v3  ;;  %p3317_p11 = pnand %p3316_p1, %p3310_p6 }
 0x6e8   : > { %2095 = vperm.xlu1 %3000, %v2093_v13  }
 0x6ea   : > { %2109 = vmatpush1.bf16.msra.mxu0 %v3942_v37  ;;  %2876 = vmatpush3.bf16.msra.mxu1 %v4006_v4  ;;  %v1517_v37 = vadd.f32 %v4075_v28, %v4089_v51  ;;  %v1864_v28 = vpop.permute.xlu0 %1863 }
 0x6eb   : > { %2110 = vmatprep.subr.bf16.mxu0 %v3944_v7  ;;  %2877 = vmatprep.subr.bf16.mxu1 %v3391_v21  ;;  %vm1865_vm6 = vcmp.eq.s32.totalorder %v1864_v28, 1 }
 0x6ec   : > { %2211 = vperm.xlu1 %3000, %v2209_v18  }
 0x6ee   : > { %2111 = vmatpush1.bf16.msra.mxu0 %v3948_v9  ;;  %2878 = vmatpush3.bf16.msra.mxu1 %v4010_v1  ;;  %v1980_v2 = vpop.permute.xlu0 %1979 }
 0x6ef   : > { %2112 = vmatprep.subr.bf16.mxu0 %v3951_v12  ;;  %2879 = vmatprep.subr.bf16.mxu1 %v3391_v21  ;;  %vm1981_vm7 = vcmp.eq.s32.totalorder %v1980_v2, 1 }
 0x6f0   : > { %vm2601_vm8 = vmpackc.low %vm1981_vm7, %vm1865_vm6 }
 0x6f2   : > { %2113 = vmatpush1.bf16.msra.mxu0 %v3954_v14  ;;  %2880 = vmatpush3.bf16.msra.mxu1 %v4017_v47 }
 0x6f3   : > { %2114 = vmatprep.subr.bf16.mxu0 %v3957_v16  ;;  %2881 = vmatprep.subr.bf16.mxu1 %v3391_v21 }
 0x6f6   : > { %2115 = vmatpush1.bf16.msra.mxu0 %v3960_v19  ;;  %2882 = vmatpush3.bf16.msra.mxu1 %v4023_v49 }
 0x6f7   : > { %2116 = vmatprep.subr.bf16.mxu0 %v3965_v20  ;;  %2883 = vmatprep.subr.bf16.mxu1 %v3391_v21 }
 0x6fa   : > { %2117 = vmatpush1.bf16.msra.mxu0 %v3967_v22  ;;  %2884 = vmatpush3.bf16.msra.mxu1 %v4029_v17 }
 0x6fb   : > { %2118 = vmatprep.subr.bf16.mxu0 %v3971_v23  ;;  %2885 = vmatprep.subr.bf16.mxu1 %v3391_v21  ;;  %v1515_v21 = vadd.f32 %v4071_v25, %v4081_v34 }
 0x6fe   : > { %2119 = vmatpush1.bf16.msra.mxu0 %v3974_v24  ;;  %2886 = vmatpush3.bf16.msra.mxu1 %v4035_v5 }
 0x6ff   : > { %2891 = vmatprep.subr.bf16.mxu0 %v3107_v50 }
 0x767   : > { %v2096_v18 = vpop.permute.xlu1 %2095 }
 0x768   : > { %vm2097_vm9 = vcmp.eq.s32.totalorder %v2096_v18, 1 }
 0x7b4   : > { %v2022_v7 = vpop.f32.mrb[32].mxu0  ;;  %v2063_v9 = vpop.f32.mrb[40].mxu1 }
 0x7b5   : > { %v2069_v12 = vadd.f32 %v2022_v7, %v1515_v21  ;;  %v2024_v14 = vpop.f32.mrb[33].mxu0  ;;  %v2869_v16 = vpop.f32.mrb[41].mxu1  ;;  %v2083_v47 = vadd.f32 %v4100_v58, %v2063_v9 }
 0x7b6   : > { %v2076_v19 = vadd.f32 %v2024_v14, %v1517_v37  ;;  %v2026_v20 = vpop.f32.mrb[34].mxu0  ;;  %v2066_v22 = vpop.f32.mrb[42].mxu1 }
 0x7b7   : > { %v2582_v23 = vmul.f32 -1.442695, %v2069_v12  ;;  %v2027_v24 = vpop.f32.mrb[35].mxu0  ;;  %v2870_v57 = vpop.f32.mrb[43].mxu1 }
 0x7b8   : > { %v2583_v3 = vmul.f32 -1.442695, %v2076_v19  ;;  %v2212_v9 = vpop.permute.xlu1 %2211 }
 0x7b9   : > { %3175 = vpow2.f32 %v2582_v23  ;;  %vm2213_vm10 = vcmp.eq.s32.totalorder %v2212_v9, 1 }
 0x7ba   : > { %3177 = vpow2.f32 %v2583_v3  ;;  %vm2604_vm11 = vmpackc.low %vm2213_vm10, %vm2097_vm9 }
 0x7c3   : > { %v3176_v60 = vpop.eup %3175 }
 0x7c4   : > { %v2073_v4 = vadd.f32 1.0, %v3176_v60  ;;  %v3178_v1 = vpop.eup %3177 }
 0x7c5   : > { %v2080_v25 = vadd.f32 1.0, %v3178_v1 }
 0x7c6   : > { %3179 = vrcp.f32 %v2073_v4 }
 0x7d0   : > { %v3180_v49 = vpop.eup %3179 }
 0x7d1   : > { %v2084_v17 = vmul.f32 %v3180_v49, %v2083_v47 }
 0x7d3   : > { %v2085_v5 = vadd.f32 %v2084_v17, %v4073_v27  ;;  %v2602_v27 = vpack.c.bf16 %v4161_v40, %v4104_v46  ;;  %v3110_v46 = vld [vmem:[%s4318_s10 + $0x18] sm:$0xff]  }
 0x7d5   : > { %3181 = vtanh.f32 %v2085_v5 }
 0x7d6   : > { %3183 = vrcp.f32 %v2080_v25 }
 0x7df   : > { %v3182_v54 = vpop.eup %3181 }
 0x7e0   : > { %v2087_v48 = vsub.f32 %v4161_v40, %v3182_v54  ;;  %v3184_v44 = vpop.eup %3183 }
 0x7e2   : > { %v2088_v38 = vmul.f32 %v3184_v44, %v2087_v48 }
 0x7e4   : > { %v4211_v41 = vadd.f32 %v3182_v54, %v2088_v38 }
 0x7e6   : > { %v2103_v31 = vpack.c.bf16 %v4211_v41, %v4211_v41 }
 0x7e8   : > { %2137 = vmatmul.mubr.bf16.vlgmr.msra.gmra.mrb[36].mxu0 %v2103_v31  ;;  %2888 = vmatmul.mubr.bf16.vlgmr.msra.gmra.mrb[44].mxu1 %v2103_v31 }
 0x7e9   : > { %2907 = vmatprep.mubr.msk.bf16.mxu0 %vm2601_vm8, %v2602_v27  ;;  %2892 = vmatpush3.bf16.msra.mxu0 %v3107_v50 }
 0x7ea   : > { %2893 = vmatprep.subr.bf16.mxu0 %v3108_v45 }
 0x7ed   : > { %2894 = vmatpush3.bf16.msra.mxu0 %v3108_v45 }
 0x7ee   : > { %2895 = vmatprep.subr.bf16.mxu0 %v3109_v52 }
 0x7f1   : > { %2896 = vmatpush3.bf16.msra.mxu0 %v3109_v52 }
 0x7f2   : > { %2897 = vmatprep.subr.bf16.mxu0 %v3110_v46 }
 0x7f5   : > { %2898 = vmatpush3.bf16.msra.mxu0 %v3110_v46 }
 0x7f6   : > { %2899 = vmatprep.subr.bf16.mxu0 %v3111_v55 }
 0x7f9   : > { %2900 = vmatpush3.bf16.msra.mxu0 %v3111_v55 }
 0x7fa   : > { %2901 = vmatprep.subr.bf16.mxu0 %v3112_v0 }
 0x7fd   : > { %2902 = vmatpush3.bf16.msra.mxu0 %v3112_v0 }
 0x7fe   : > { %2903 = vmatprep.subr.bf16.mxu0 %v3113_v63 }
 0x801   : > { %2904 = vmatpush3.bf16.msra.mxu0 %v3113_v63 }
 0x802   : > { %2905 = vmatprep.subr.bf16.mxu0 %v3114_v11 }
 0x805   : > { %2906 = vmatpush3.bf16.msra.mxu0 %v3114_v11 }
 0x8bb   : > { %v2138_v53 = vpop.f32.mrb[36].mxu0  ;;  %v2179_v42 = vpop.f32.mrb[44].mxu1 }
 0x8bc   : > { %v2185_v43 = vadd.f32 %v2138_v53, %v1519_v26  ;;  %v2140_v29 = vpop.f32.mrb[37].mxu0  ;;  %v2889_v59 = vpop.f32.mrb[45].mxu1  ;;  %v2199_v34 = vadd.f32 %v4100_v58, %v2179_v42 }
 0x8bd   : > { %v2192_v62 = vadd.f32 %v2140_v29, %v1521_v33  ;;  %v2142_v39 = vpop.f32.mrb[38].mxu0  ;;  %v2182_v61 = vpop.f32.mrb[46].mxu1 }
 0x8be   : > { %v2584_v15 = vmul.f32 -1.442695, %v2185_v43  ;;  %v2143_v30 = vpop.f32.mrb[39].mxu0  ;;  %v2890_v56 = vpop.f32.mrb[47].mxu1 }
 0x8bf   : > { %v2585_v40 = vmul.f32 -1.442695, %v2192_v62 }
 0x8c0   : > { %3185 = vpow2.f32 %v2584_v15 }
 0x8c1   : > { %3187 = vpow2.f32 %v2585_v40 }
 0x8ca   : > { %v3186_v6 = vpop.eup %3185 }
 0x8cb   : > { %v2189_v8 = vadd.f32 1.0, %v3186_v6  ;;  %v3188_v32 = vpop.eup %3187 }
 0x8cc   : > { %v2196_v13 = vadd.f32 1.0, %v3188_v32 }
 0x8cd   : > { %3189 = vrcp.f32 %v2189_v8 }
 0x8d7   : > { %v3190_v36 = vpop.eup %3189 }
 0x8d8   : > { %v2200_v51 = vmul.f32 %v3190_v36, %v2199_v34 }
 0x8da   : > { %v2201_v10 = vadd.f32 %v2200_v51, %v4083_v35  ;;  %v2586_v35 = vld [vmem:[%s4319_s11] ss:$0 sm:$0xff] }
 0x8dc   : > { %3191 = vtanh.f32 %v2201_v10 }
 0x8dd   : > { %3193 = vrcp.f32 %v2196_v13 }
 0x8e6   : > { %v3192_v21 = vpop.eup %3191 }
 0x8e7   : > { %v2203_v37 = vsub.f32 %v4211_v41, %v3192_v21  ;;  %v3194_v7 = vpop.eup %3193 }
 0x8e9   : > { %v2204_v12 = vmul.f32 %v3194_v7, %v2203_v37 }
 0x8eb   : > { %v2205_v58 = vadd.f32 %v3192_v21, %v2204_v12 }
 0x8ed   : > { %2216 = vst [vmem:[#allocation4 + $0x8] sm:$0xff] %v2205_v58  ;;  %v2605_v14 = vpack.c.bf16 %v2205_v58, %v4211_v41 }
 0x8ef   : > { %2908 = vmatmul.mubr.msk.bf16.vlgmr.msra.gmra.mrb[40].mxu0 %vm2604_vm11, %v2605_v14 }
 0x9c2   : > { %v2909_v16 = vpop.f32.mrb[40].mxu0 }
 0x9c3   : > { %v2337_v19 = vadd.f32 %v2909_v16, %v2586_v35  ;;  %v2328_v20 = vpop.f32.mrb[41].mxu0 }
 0x9c4   : > { %v2329_v22 = vadd.f32 %v2586_v35, %v2328_v20  ;;  %v2910_v23 = vpop.f32.mrb[42].mxu0 }
 0x9c5   : > { %2345 = vst [vmem:[%s3657_s29 + $0x10] sm:$0xff] %v2337_v19  ;;  %v2340_v24 = vadd.f32 %v2910_v23, %v2586_v35  ;;  %v2331_v57 = vpop.f32.mrb[43].mxu0 }
 0x9c6   : > { %2343 = vst [vmem:[%s3657_s29] sm:$0xff] %v2329_v22  ;;  %v2332_v3 = vadd.f32 %v2586_v35, %v2331_v57 }
 0x9c7   : > { %2346 = vst [vmem:[%s3657_s29 + $0x18] sm:$0xff] %v2340_v24 }
 0x9c8   : > { %2344 = vst [vmem:[%s3657_s29 + $0x8] sm:$0xff] %v2332_v3 }
 0x9c9   : > { %3320 = shalt.err (!%p3317_p11)
}
 0x9ca   : > { %s3321_s14 = scalar_lea.hbm %s4258_s12, 512  ;;  %s3325_s15 = scalar_lea.hbm %s4355_s20, 1024 }
 0x9cb   : > { %p3322_p10 = scmp.ne.s32.totalorder %s4258_s12, %s3321_s14  ;;  %p3326_p13 = scmp.lt.u32.totalorder %s4258_s12, %s4355_s20 }
 0x9cc   : > { %p3327_p7 = scmp.lt.u32.totalorder %s3325_s15, %s3321_s14  ;;  %p3329_p12 = scmp.lt.u32.totalorder %s3321_s14, %s4258_s12 }
 0x9cd   : > { %p3323_p3 = pnand %p3322_p10, %p4356_p0 }
 0x9ce   : > { %p3328_p8 = por %p3327_p7, %p3326_p13 }
 0x9cf   : > { %p3324_p4 = pneg %p3323_p3 }
 0x9d0   : > { %p3330_p2 = por %p3329_p12, %p3328_p8 }
 0x9d2   : > { %p3331_p6 = pnand %p3330_p2, %p3324_p4 }
 0x9d4   : > { %3334 = shalt.err (!%p3331_p6)
}
 0x9d5   : > { %s3394_s19 = smov 128   ;;  %s3395_s17 = smov 8  }
 0x9d6   : > { %2927 = dma.vmem_to_hbm [thread:$0]  (%p4356_p0), %s4260_s26, 512, %s4258_s12, %s4267_s25, %s3394_s19, %s3394_s19, %s3395_s17  }
 0x9d7 PF: > { %s4357_s28 = sld [smem:[#allocation20_spill]]  ;;  %s4358_s18 = sld [smem:[#allocation18_spill]] }
 0x9d8   : > { %s4359_s30 = sld [smem:[#allocation24_spill]] }
 0x9dd   : > { %p2954_p9 = scmp.ge.s32.totalorder %s4357_s28, 2  ;;  %s2376_s23 = sand.u32 1, %s4358_s18  }
 0x9de   : > { %p4360_p5 = scmp.ne.s32.totalorder %s4359_s30, 0  ;;  %s2377_s21 = scalar_lea.sflag [#allocation7], %s2376_s23 }
 0x9e0   : > { %p2943_p1 = pnand %p2954_p9, %p4360_p5 }
 0x9e2   : > { %3364 = dma.done.wait (!%p2943_p1), %s2377_s21, 512  }
 0x9e3   : > { %3366 = vsyncadd (!%p2943_p1), %s2377_s21, 4294966784  ;;  %s4361_s24 = sld [smem:[#allocation21_spill]]  ;;  %s4362_s14 = sld [smem:[#allocation19_spill]] }
 0x9e4   : > { %s4363_s23 = sld [smem:[#allocation22_spill]]  ;;  %s4364_s21 = smov %s3373_s22 }
 0x9e9   : > { %p25_p11 = scmp.ge.s32.totalorder %s4361_s24, 4   ;;  %s4365_s22 = smov %s4362_s14 }
 0x9eb   :  { %27 = sbr.rel (!%p25_p11) target bundleno = 8 (0x8), region = 132 }
 0x9f2   :  { %2382 = vsyncpa [#allocation6], 1 }
 0x9f3   :  { %2384 = vsyncpa [#allocation6 + $0x1], 1 }
 0x9f4   :  { %2385 = vsyncpa [#allocation9], 1 }
 0x9f5   :  { %2386 = vsyncpa [#allocation12], 1 }
 0x9f6   :  { %2387 = vsyncpa [#allocation7], 1 }
 0x9f7   :  { %2389 = vsyncpa [#allocation7 + $0x1], 1 }

// kernel: tpu_custom_call.1
= control target key start
LH: loop header
LB: loop body
LE: loop exit
PB: predicated region body
PF: predicated region fallthrough
CT: control target
= control target key end

     0   :  { %s4308_s0 = inlined_call_operand.vmem [shape: s32[8,1], index: 0, kind: input, shape index: {}]   ;;  %s4309_s1 = inlined_call_operand.vmem [shape: bf16[64,32], index: 1, kind: input, shape index: {}]   ;;  %s4310_s2 = inlined_call_operand.hbm [shape: bf16[32,384], index: 2, kind: input, shape index: {}]   ;;  %s4311_s3 = inlined_call_operand.hbm [shape: bf16[128,384], index: 3, kind: input, shape index: {}]   ;;  %s4312_s4 = inlined_call_operand.vmem [shape: f32[1,384], index: 4, kind: input, shape index: {}]   ;;  %s4313_s5 = inlined_call_operand.vmem [shape: f32[1,128], index: 5, kind: input, shape index: {}]   ;;  %s4314_s6 = inlined_call_operand.hbm [shape: bf16[128,384], index: 6, kind: input, shape index: {}]   ;;  %s4315_s7 = inlined_call_operand.hbm [shape: bf16[128,384], index: 7, kind: input, shape index: {}]   ;;  %s4316_s8 = inlined_call_operand.vmem [shape: f32[1,384], index: 8, kind: input, shape index: {}]   ;;  %s4317_s9 = inlined_call_operand.vmem [shape: f32[1,128], index: 9, kind: input, shape index: {}]   ;;  %s4318_s10 = inlined_call_operand.vmem [shape: bf16[128,128], index: 10, kind: input, shape index: {}]   ;;  %s4319_s11 = inlined_call_operand.vmem [shape: f32[1,128], index: 11, kind: input, shape index: {}]   ;;  %s4320_s12 = inlined_call_operand.hbm [shape: f32[64,128], index: 12, kind: output, shape index: {}]  }
   0x1   :  { %4333 = sst [smem:[#allocation25_spill]] %s4320_s12 }
   0x2   :  { %17 = vsyncpa [#allocation6], 0 }
   0x3   :  { %18 = vsyncpa [#allocation9], 0 }
   0x4   :  { %19 = vsyncpa [#allocation12], 0 }
   0x5   :  { %20 = vsyncpa [#allocation7], 0 }
   0x6   :  { %22 = vsyncpa [#allocation7 + $0x1], 0  ;;  %s3461_s21 = smov 0   ;;  %s3463_s22 = smov 0  }
   0x7   :  { %s3465_s23 = smov 0   ;;  %s3467_s24 = smov 0  }
   0x8 LB: > { %4334 = sst [smem:[#allocation18_spill]] %s3369_s21  ;;  %s3482_s25 = sadd.s32 4294967295, %s3381_s24   ;;  %s3381_s24 = sphi %s3467_s24, %s4361_s24   ;;  %s3377_s23 = sphi %s3465_s23, %s4363_s23   ;;  %s3373_s22 = sphi %s3463_s22, %s4365_s22   ;;  %s3369_s21 = sphi %s3461_s21, %s4364_s21  }
   0x9   : > { %4335 = sst [smem:[#allocation19_spill]] %s3377_s23  ;;  %s2467_s26 = sadd.s32 4294967294, %s3381_s24  }
   0xa   : > { %4336 = sst [smem:[#allocation20_spill]] %s3381_s24  ;;  %s3486_s27 = sadd.s32 1, %s3381_s24  }
   0xb   : > { %4337 = sst [smem:[#allocation21_spill]] %s3486_s27  ;;  %s292_s28 = sadd.s32 1, %s3377_s23 }
   0xc   : > { %s289_s29 = ssub.s32 %s3381_s24, %s3486_s27  ;;  %p302_p0 = scmp.ne.s32.totalorder %s3377_s23, %s3373_s22 }
   0xd   : > { %p290_p1 = scmp.eq.s32.totalorder %s289_s29, 0  ;;  %p303_p2 = scmp.eq.s32.totalorder %s3482_s25, 1 }
   0xe   : > { %p308_p3 = scmp.ne.s32.totalorder %s3373_s22, %s3369_s21  ;;  %p309_p4 = scmp.eq.s32.totalorder %s2467_s26, 1 }
   0xf   : > { %s3497_s30 = scalar_select %p290_p1, %s3377_s23, %s292_s28  }
  0x10   : > { %p3499_p5 = por %p303_p2, %p302_p0  ;;  %p3503_p6 = por %p309_p4, %p308_p3 }
  0x11   : > { %4338 = sst [smem:[#allocation22_spill]] %s3497_s30  ;;  %p2468_p7 = scmp.ge.s32.totalorder %s3381_s24, 1 }
  0x12   : > { %s4339_s13 = scalar_select %p3499_p5, 1, 0 }
  0x13   : > { %s4341_s14 = scalar_select %p3503_p6, 1, 0 }
  0x14   : > { %4340 = sst [smem:[#allocation23_spill]] %s4339_s13  ;;  %p316_p8 = scmp.lt.s32.totalorder %s3381_s24, 3 }
  0x15   : > { %4342 = sst [smem:[#allocation24_spill]] %s4341_s14  ;;  %p4325_p10 = scmp.eq.s32.totalorder %s3482_s25, 0 }
  0x16   : > { %p3511_p11 = pnand %p2468_p7, %p316_p8  ;;  %s3383_s16 = smov [#allocation8]  }
  0x17   : > { %s344_s17 = sshll.u32 %s3383_s16, 4  ;;  %s3384_s19 = smov [#allocation5]   ;;  %s3517_s17 = int_to_ptr.vmem [resolvable:$true] %s344_s17 }
  0x18   : > { %s4343_s15 = scalar_select %p3511_p11, 1, 0 }
  0x19   : > { %p2929_p12 = pneg %p3511_p11  ;;  %s331_s20 = sshll.u32 %s3384_s19, 4  ;;  %s3525_s20 = int_to_ptr.vmem [resolvable:$true] %s331_s20 }
  0x1a   : > { %s3385_s26 = smov [#allocation10]   ;;  %s3195_s23 = scalar_lea.hbm %s4311_s3, 3072 }
  0x1b   : > { %p3521_p13 = pnand %p4325_p10, %p2929_p12  ;;  %s3527_s28 = sshll.u32 %s3385_s26, 4  ;;  %s364_s28 = int_to_ptr.vmem [resolvable:$true] %s3527_s28 }
  0x1c   : > { %p3196_p0 = scmp.ne.s32.totalorder %s4311_s3, %s3195_s23  ;;  %p3202_p4 = scmp.lt.u32.totalorder %s3195_s23, %s4311_s3 }
  0x1d   : > { %p3537_p1 = pneg %p3521_p13 }
  0x1f   : > { %p3198_p2 = pnand %p3537_p1, %p3196_p0 }
  0x21   : > { %p3199_p3 = pneg %p3198_p2 }
  0x23   : > { %p3204_p7 = pnand %p3202_p4, %p3199_p3 }
  0x25   : > { %3207 = shalt.err (!%p3204_p7)
}
  0x26   : > { %s3208_s27 = scalar_lea.vmem %s3517_s17, 3072  ;;  %p3216_p10 = scmp.lt.s32.totalorder %s3517_s17, %s3517_s17 }
  0x27   : > { %p3209_p8 = scmp.ne.s32.totalorder %s3517_s17, %s3208_s27  ;;  %p3217_p6 = scmp.lt.s32.totalorder %s3208_s27, %s3208_s27 }
  0x29   : > { %p3211_p12 = pnand %p3209_p8, %p3537_p1  ;;  %p3218_p0 = por %p3217_p6, %p3216_p10 }
  0x2b   : > { %p3212_p9 = pneg %p3211_p12 }
  0x2d   : > { %p3219_p2 = pnand %p3218_p0, %p3212_p9 }
  0x2f   : > { %3222 = shalt.err (!%p3219_p2)
}
  0x30   : > { %s3386_s30 = smov 192   ;;  %s3387_s23 = smov 12  }
  0x31   : > { %2935 = dma.hbm_to_vmem [thread:$0]  (!%p3521_p13), %s4311_s3, 3072, %s3517_s17, [#allocation9], %s3386_s30, %s3386_s30, %s3387_s23  }
  0x32   : > { %s3223_s27 = scalar_lea.hbm %s4310_s2, 768 }
  0x33   : > { %p3224_p6 = scmp.ne.s32.totalorder %s4310_s2, %s3223_s27  ;;  %p3230_p3 = scmp.lt.u32.totalorder %s3223_s27, %s4310_s2 }
  0x35   : > { %p3226_p9 = pnand %p3224_p6, %p3537_p1 }
  0x37   : > { %p3227_p10 = pneg %p3226_p9 }
  0x39   : > { %p3232_p4 = pnand %p3230_p3, %p3227_p10 }
  0x3b   : > { %3235 = shalt.err (!%p3232_p4)
}
  0x3c   : > { %s3236_s17 = scalar_lea.vmem %s3525_s20, 768  ;;  %p3244_p0 = scmp.lt.s32.totalorder %s3525_s20, %s3525_s20 }
  0x3d   : > { %p3237_p7 = scmp.ne.s32.totalorder %s3525_s20, %s3236_s17  ;;  %p3245_p2 = scmp.lt.s32.totalorder %s3236_s17, %s3236_s17 }
  0x3f   : > { %p3239_p8 = pnand %p3237_p7, %p3537_p1  ;;  %p3246_p6 = por %p3245_p2, %p3244_p0 }
  0x41   : > { %p3240_p12 = pneg %p3239_p8 }
  0x43   : > { %p3247_p9 = pnand %p3246_p6, %p3240_p12 }
  0x45   : > { %3250 = shalt.err (!%p3247_p9)
}
  0x46   : > { %2932 = dma.hbm_to_vmem [thread:$0]  (!%p3521_p13), %s4310_s2, 768, %s3525_s20, [#allocation6], %s3386_s30, %s3386_s30, %s3387_s23  }
  0x47   : > { %s3251_s29 = scalar_lea.hbm %s4314_s6, 3072 }
  0x48   : > { %p3252_p10 = scmp.ne.s32.totalorder %s4314_s6, %s3251_s29  ;;  %p3258_p7 = scmp.lt.u32.totalorder %s3251_s29, %s4314_s6 }
  0x4a   : > { %p3254_p3 = pnand %p3252_p10, %p3537_p1 }
  0x4c   : > { %p3255_p4 = pneg %p3254_p3 }
  0x4e   : > { %p3260_p8 = pnand %p3258_p7, %p3255_p4 }
  0x50   : > { %3263 = shalt.err (!%p3260_p8)
}
  0x51   : > { %s3264_s17 = scalar_lea.vmem %s364_s28, 3072  ;;  %p3272_p6 = scmp.lt.s32.totalorder %s364_s28, %s364_s28 }
  0x52   : > { %p3265_p12 = scmp.ne.s32.totalorder %s364_s28, %s3264_s17  ;;  %p3273_p9 = scmp.lt.s32.totalorder %s3264_s17, %s3264_s17 }
  0x54   : > { %p3267_p0 = pnand %p3265_p12, %p3537_p1  ;;  %p3274_p5 = por %p3273_p9, %p3272_p6 }
  0x56   : > { %p3268_p2 = pneg %p3267_p0 }
  0x58   : > { %p3275_p11 = pnand %p3274_p5, %p3268_p2 }
  0x5a   : > { %3278 = shalt.err (!%p3275_p11)
}
  0x5b   : > { %2938 = dma.hbm_to_vmem [thread:$0]  (!%p3521_p13), %s4314_s6, 3072, %s364_s28, [#allocation9], %s3386_s30, %s3386_s30, %s3387_s23  }
  0x5c   : > { %s3388_s21 = smov [#allocation11]   ;;  %s3279_s16 = scalar_lea.hbm %s4315_s7, 3072 }
  0x5d   : > { %s376_s24 = sshll.u32 %s3388_s21, 4  ;;  %p3280_p5 = scmp.ne.s32.totalorder %s4315_s7, %s3279_s16  ;;  %s377_s24 = int_to_ptr.vmem [resolvable:$true] %s376_s24 }
  0x5e   : > { %p3286_p3 = scmp.lt.u32.totalorder %s3279_s16, %s4315_s7 }
  0x5f   : > { %p3282_p11 = pnand %p3280_p5, %p3537_p1 }
  0x61   : > { %p3283_p10 = pneg %p3282_p11 }
  0x63   : > { %p3288_p4 = pnand %p3286_p3, %p3283_p10 }
  0x65   : > { %3291 = shalt.err (!%p3288_p4)
}
  0x66   : > { %s3292_s28 = scalar_lea.vmem %s377_s24, 3072  ;;  %p3300_p0 = scmp.lt.s32.totalorder %s377_s24, %s377_s24 }
  0x67   : > { %p3293_p7 = scmp.ne.s32.totalorder %s377_s24, %s3292_s28  ;;  %p3301_p2 = scmp.lt.s32.totalorder %s3292_s28, %s3292_s28 }
  0x69   : > { %p3295_p8 = pnand %p3293_p7, %p3537_p1  ;;  %p3302_p6 = por %p3301_p2, %p3300_p0 }
  0x6b   : > { %p3296_p12 = pneg %p3295_p8 }
  0x6d   : > { %p3303_p9 = pnand %p3302_p6, %p3296_p12 }
  0x6f   : > { %3306 = shalt.err (!%p3303_p9)
}
  0x70   : > { %2941 = dma.hbm_to_vmem [thread:$0]  (!%p3521_p13), %s4315_s7, 3072, %s377_s24, [#allocation12], %s3386_s30, %s3386_s30, %s3387_s23  }
  0x71   : > { %p4346_p5 = scmp.ne.s32.totalorder %s4343_s15, 0 }
  0x72   : > { %p4347_p1 = scmp.eq.s32.totalorder (!%p4346_p5), %s3482_s25, 0 }
  0x73   : > { %413 = sbr.rel (%p4346_p5) target bundleno = 2519 (0x9d7), region = 68 }
  0x7a   : > { %3352 = dma.done.wait (%p4347_p1), [#allocation6], 768   ;;  %p4348_p11 = pmov %p4347_p1 }
  0x7b   : > { %p4349_p10 = pmov %p4347_p1 }
  0x7c   : > { %3354 = vsyncadd (%p4348_p11), [#allocation6], 4294966528 }
  0x7d   : > { %3356 = dma.done.wait (%p4349_p10), [#allocation9], 6144   ;;  %p4350_p3 = pmov %p4347_p1 }
  0x7e   : > { %p4351_p4 = pmov %p4347_p1 }
  0x7f   : > { %3358 = vsyncadd (%p4350_p3), [#allocation9], 4294961152 }
  0x80   : > { %3360 = dma.done.wait (%p4351_p4), [#allocation12], 3072   ;;  %p4352_p13 = pmov %p4347_p1 }
  0x81   : > { %s464_s14 = sand.u32 1, %s3373_s22   ;;  %s3646_s15 = sshll.u32 %s3482_s25, 2 }
  0x82   : > { %3362 = vsyncadd (%p4352_p13), [#allocation12], 4294964224  ;;  %s2479_s18 = sshll.u32 %s464_s14, 5  ;;  %p468_p7 = scmp.lt.s32.totalorder %s3646_s15, 7 }
  0x83   : > { %s3657_s29 = scalar_lea.vmem [#allocation13], %s2479_s18  ;;  %p4353_p8 = scmp.ne.s32.totalorder %s3482_s25, 0 }
  0x84   : > { %s469_s30 = scalar_select %p468_p7, %s3646_s15, 7 }
  0x85   : > { %478 = sbr.rel (%p4353_p8) target bundleno = 140 (0x8c), region = 88  ;;  %v3389_v0 = vmov (!%p4353_p8), 0.0  }
  0x86   : > { %s2481_s23 = sshll.u32 %s469_s30, 2  ;;  %479 = vst [vmem:[#allocation4] sm:$0xff] (!%p4353_p8), %v3389_v0  ;;  %480 = vst [vmem:[#allocation4 + $0x8] sm:$0xff] (!%p4353_p8), %v3389_v0 }
  0x87   : > { %s3655_s13 = scalar_lea.vmem %s4309_s1, %s2481_s23 }
  0x8c PF: > { %v3001_v1 = vld [vmem:[#allocation5 + $0x4] ss:$12 sps:$4 sm:$0xff]   ;;  %v3661_v2 = vld [vmem:[#allocation8 + $0x4] ss:$12 sps:$4 sm:$0xff]   ;;  %v3390_v3 = vmov 0   ;;  %v3013_v10 = vld [vmem:[%s3655_s13] sm:$0xff]   ;;  %v497_v37 = vlaneseq }
  0x8d   : > { %593 = vmatprep.mubr.bf16.mxu1 %v3390_v3  ;;  %876 = vmatprep.mubr.bf16.mxu0 %v3390_v3  ;;  %v3005_v4 = vld [vmem:[#allocation5] ss:$12 sps:$4 sm:$0xff]   ;;  %v3665_v5 = vld [vmem:[#allocation8] ss:$12 sps:$4 sm:$0xff]   ;;  %v3011_v8 = vld [vmem:[#allocation5 + $0x18] ss:$12 sps:$4 sm:$0xff]  }
  0x8e   : > { %561 = vmatprep.subr.bf16.mxu1 %v3001_v1  ;;  %2999 = vset.pattern.permute.xlu0 %v3390_v3  ;;  %v3007_v6 = vld [vmem:[#allocation5 + $0x1c] ss:$12 sps:$4 sm:$0xff]   ;;  %v3671_v7 = vld [vmem:[#allocation8 + $0x1c] ss:$12 sps:$4 sm:$0xff]   ;;  %v3677_v11 = vld [vmem:[#allocation8 + $0x34] ss:$12 sps:$4 sm:$0xff]  }
  0x8f   : > { %844 = vmatprep.subr.bf16.mxu0 %v3661_v2  ;;  %3000 = vset.pattern.permute.xlu1 %v3390_v3  ;;  %v3673_v9 = vld [vmem:[#allocation8 + $0x18] ss:$12 sps:$4 sm:$0xff]   ;;  %v3679_v12 = vld [vmem:[#allocation8 + $0x30] ss:$12 sps:$4 sm:$0xff]   ;;  %vm554_vm0 = vcmask 261120   ;;  %v3391_v21 = vmov 0.0  }
  0x90   : > { %562 = vmatpush1.bf16.msra.mxu1 %v3005_v4  ;;  %845 = vmatpush1.bf16.msra.mxu0 %v3665_v5  ;;  %v3017_v13 = vld [vmem:[#allocation5 + $0x8] ss:$12 sps:$4 sm:$0xff]   ;;  %v3686_v15 = vld [vmem:[#allocation8 + $0x48] ss:$12 sps:$4 sm:$0xff]   ;;  %v3025_v17 = vld [vmem:[#allocation5 + $0x20] ss:$12 sps:$4 sm:$0xff]  }
  0x91   : > { %563 = vmatprep.subr.bf16.mxu1 %v3007_v6  ;;  %846 = vmatprep.subr.bf16.mxu0 %v3671_v7  ;;  %v3683_v14 = vld [vmem:[#allocation8 + $0x4c] ss:$12 sps:$4 sm:$0xff]   ;;  %v3689_v16 = vld [vmem:[#allocation8 + $0x64] ss:$12 sps:$4 sm:$0xff]   ;;  %v3698_v20 = vld [vmem:[#allocation8 + $0x7c] ss:$12 sps:$4 sm:$0xff]  }
  0x92   : > { %v3021_v18 = vld [vmem:[%s3655_s13 + $0x8] sm:$0xff]   ;;  %v3709_v24 = vld [vmem:[#allocation8 + $0x8] ss:$12 sps:$4 sm:$0xff]   ;;  %v3712_v25 = vld [vmem:[#allocation8 + $0x90] ss:$12 sps:$4 sm:$0xff]   ;;  %vm3392_vm1 = vmmov 0  }
  0x93   : > { %v3695_v19 = vld [vmem:[#allocation8 + $0x60] ss:$12 sps:$4 sm:$0xff]   ;;  %v3703_v22 = vld [vmem:[#allocation8 + $0x78] ss:$12 sps:$4 sm:$0xff]   ;;  %v3719_v28 = vld [vmem:[#allocation8 + $0xa8] ss:$12 sps:$4 sm:$0xff]  }
  0x94   : > { %564 = vmatpush1.bf16.msra.mxu1 %v3011_v8  ;;  %847 = vmatpush1.bf16.msra.mxu0 %v3673_v9  ;;  %v3707_v23 = vld [vmem:[#allocation8 + $0x94] ss:$12 sps:$4 sm:$0xff]   ;;  %v3715_v26 = vld [vmem:[#allocation8 + $0xac] ss:$12 sps:$4 sm:$0xff]   ;;  %v3738_v32 = vld [vmem:[#allocation8 + $0x50] ss:$12 sps:$4 sm:$0xff]  }
  0x95   : > { %848 = vmatprep.subr.bf16.mxu0 %v3677_v11  ;;  %2703 = vmatprep.subr.bf16.mxu1 %v3017_v13  ;;  %v3717_v27 = vld [vmem:[#allocation8 + $0x20] ss:$12 sps:$4 sm:$0xff]   ;;  %v3728_v30 = vld [vmem:[#allocation8 + $0x38] ss:$12 sps:$4 sm:$0xff]   ;;  %v3744_v33 = vld [vmem:[#allocation8 + $0x68] ss:$12 sps:$4 sm:$0xff]  }
  0x96   : > { %v3721_v29 = vld [vmem:[#allocation4] sm:$0xff]  ;;  %v3764_v36 = vld [vmem:[#allocation8 + $0xb0] ss:$12 sps:$4 sm:$0xff]   ;;  %v3795_v38 = vshrl.u32 %v497_v37, 7  ;;  %v495_v40 = vld [vmem:[%s4312_s4] sm:$0x7] }
  0x97   : > { %2492 = vmatmul.mubr.msk.bf16.vlgmr.msra.gmra.mrb[0].mxu1 %vm554_vm0, %v3013_v10  ;;  %v715_v31 = vpack.c.bf16 %v3721_v29, %v3721_v29  ;;  %v3751_v34 = vld [vmem:[#allocation8 + $0x80] ss:$12 sps:$4 sm:$0xff]   ;;  %v3757_v35 = vld [vmem:[#allocation8 + $0x98] ss:$12 sps:$4 sm:$0xff]   ;;  %s1974_s23 = sadd.s32 1, %s3646_s15  ;;  %s2090_s21 = sadd.s32 2, %s3646_s15 }
  0x98   : > { %849 = vmatpush1.bf16.msra.mxu0 %v3679_v12  ;;  %2704 = vmatpush3.bf16.msra.mxu1 %v3017_v13  ;;  %v499_v39 = vsub.s32 0, %v3795_v38  ;;  %v503_v41 = vsub.s32 1, %v3795_v38  ;;  %v507_v53 = vsub.s32 2, %v3795_v38  ;;  %s2206_s24 = sadd.s32 3, %s3646_s15  ;;  %s2600_s19 = sshll.u32 %s3482_s25, 9 }
  0x99   : > { %850 = vmatprep.subr.bf16.mxu0 %v3683_v14  ;;  %603 = vmatprep.mubr.bf16.mxu1 %v3390_v3  ;;  %s2361_s26 = sshll.u32 %s3657_s29, 4  ;;  %s4354_s27 = sld [smem:[#allocation23_spill]]  ;;  %s4260_s26 = int_to_ptr.vmem [resolvable:$true] %s2361_s26 }
  0x9a   : > { %2705 = vmatprep.subr.bf16.mxu1 %v3025_v17  ;;  %v500_v42 = vrot.slane %v495_v40, %v499_v39  ;;  %v504_v44 = vrot.slane %v495_v40, %v503_v41  ;;  %v508_v59 = vrot.slane %v495_v40, %v507_v53  ;;  %s4355_s20 = sld [smem:[#allocation25_spill]]  ;;  %s4267_s25 = scalar_lea.sflag [#allocation7], %s464_s14 }
  0x9b   : > { %s3307_s18 = scalar_lea.vmem %s4260_s26, 512  ;;  %s3393_s30 = smov [#allocation13]  }
  0x9c   : > { %851 = vmatpush1.bf16.msra.mxu0 %v3686_v15  ;;  %2706 = vmatpush3.bf16.msra.mxu1 %v3025_v17  ;;  %p3308_p12 = scmp.ne.s32.totalorder %s4260_s26, %s3307_s18 }
  0x9d   : > { %852 = vmatprep.subr.bf16.mxu0 %v3689_v16  ;;  %2711 = vmatprep.subr.bf16.mxu1 %v3391_v21 }
  0x9f   : > { %2493 = vmatmul.mubr.msk.bf16.gmra.mrb[4].mxu1 %vm554_vm0, %v3021_v18  ;;  %p4356_p0 = scmp.ne.s32.totalorder %s4354_s27, 0 }
  0xa0   : > { %853 = vmatpush1.bf16.msra.mxu0 %v3695_v19  ;;  %2707 = vmatprep.mubr.msk.bf16.mxu1 %vm554_vm0, %v3013_v10  ;;  %s4258_s12 = scalar_lea.hbm %s4355_s20, %s2600_s19 }
  0xa1   : > { %854 = vmatprep.subr.bf16.mxu0 %v3698_v20  ;;  %p3309_p2 = pnand %p3308_p12, %p4356_p0 }
  0xa3   : > { %p3310_p6 = pneg %p3309_p2 }
  0xa4   : > { %855 = vmatpush1.bf16.msra.mxu0 %v3703_v22 }
  0xa5   : > { %856 = vmatprep.subr.bf16.mxu0 %v3707_v23 }
  0xa7   : > { %2708 = vmatmul.mubr.msk.bf16.vlgmr.msra.gmra.mrb[8].mxu1 %vm554_vm0, %v3021_v18 }
  0xa8   : > { %2712 = vmatpush3.bf16.msra.mxu1 %v3709_v24  ;;  %857 = vmatpush1.bf16.msra.mxu0 %v3712_v25 }
  0xa9   : > { %2713 = vmatprep.subr.bf16.mxu1 %v3391_v21  ;;  %858 = vmatprep.subr.bf16.mxu0 %v3715_v26 }
  0xaa   : > { %2727 = vmatprep.mubr.msk.bf16.mxu1 %vm3392_vm1, %v3391_v21 }
  0xac   : > { %2714 = vmatpush3.bf16.msra.mxu1 %v3717_v27  ;;  %859 = vmatpush1.bf16.msra.mxu0 %v3719_v28 }
  0xad   : > { %2715 = vmatprep.subr.bf16.mxu1 %v3391_v21  ;;  %960 = vmatprep.subr.bf16.mxu0 %v3661_v2 }
  0xaf   : > { %877 = vmatmul.mubr.bf16.vlgmr.msra.gmra.mrb[0].mxu0 %v715_v31 }
  0xb0   : > { %2716 = vmatpush3.bf16.msra.mxu1 %v3728_v30  ;;  %961 = vmatpush1.bf16.msra.mxu0 %v3665_v5 }
  0xb1   : > { %2717 = vmatprep.subr.bf16.mxu1 %v3391_v21  ;;  %962 = vmatprep.subr.bf16.mxu0 %v3671_v7 }
  0xb2   : > { %992 = vmatprep.mubr.bf16.mxu0 %v3390_v3 }
  0xb4   : > { %2718 = vmatpush3.bf16.msra.mxu1 %v3738_v32  ;;  %963 = vmatpush1.bf16.msra.mxu0 %v3673_v9 }
  0xb5   : > { %2719 = vmatprep.subr.bf16.mxu1 %v3391_v21  ;;  %964 = vmatprep.subr.bf16.mxu0 %v3677_v11 }
  0xb8   : > { %2720 = vmatpush3.bf16.msra.mxu1 %v3744_v33  ;;  %965 = vmatpush1.bf16.msra.mxu0 %v3679_v12 }
  0xb9   : > { %2721 = vmatprep.subr.bf16.mxu1 %v3391_v21  ;;  %966 = vmatprep.subr.bf16.mxu0 %v3683_v14 }
  0xbc   : > { %2722 = vmatpush3.bf16.msra.mxu1 %v3751_v34  ;;  %967 = vmatpush1.bf16.msra.mxu0 %v3686_v15 }
  0xbd   : > { %2723 = vmatprep.subr.bf16.mxu1 %v3391_v21  ;;  %968 = vmatprep.subr.bf16.mxu0 %v3689_v16 }
  0xc0   : > { %2724 = vmatpush3.bf16.msra.mxu1 %v3757_v35  ;;  %969 = vmatpush1.bf16.msra.mxu0 %v3695_v19 }
  0xc1   : > { %2725 = vmatprep.subr.bf16.mxu1 %v3391_v21  ;;  %970 = vmatprep.subr.bf16.mxu0 %v3698_v20 }
  0xc4   : > { %2726 = vmatpush3.bf16.msra.mxu1 %v3764_v36  ;;  %971 = vmatpush1.bf16.msra.mxu0 %v3703_v22 }
  0xc5   : > { %2731 = vmatprep.subr.bf16.mxu1 %v3391_v21  ;;  %972 = vmatprep.subr.bf16.mxu0 %v3707_v23 }
  0xc7   : > { %2728 = vmatmul.mubr.bf16.vlgmr.msra.gmra.mrb[12].mxu1 %v715_v31 }
  0xc8   : > { %2732 = vmatpush3.bf16.msra.mxu1 %v3709_v24  ;;  %973 = vmatpush1.bf16.msra.mxu0 %v3712_v25 }
  0xc9   : > { %2733 = vmatprep.subr.bf16.mxu1 %v3391_v21  ;;  %974 = vmatprep.subr.bf16.mxu0 %v3715_v26 }
  0xca   : > { %2747 = vmatprep.mubr.msk.bf16.mxu1 %vm3392_vm1, %v3391_v21 }
  0xcc   : > { %2734 = vmatpush3.bf16.msra.mxu1 %v3717_v27  ;;  %975 = vmatpush1.bf16.msra.mxu0 %v3719_v28 }
  0xcd   : > { %2735 = vmatprep.subr.bf16.mxu1 %v3391_v21  ;;  %1071 = vmatprep.subr.bf16.mxu0 %v3661_v2 }
  0xd0   : > { %2736 = vmatpush3.bf16.msra.mxu1 %v3728_v30 }
  0xd1   : > { %2737 = vmatprep.subr.bf16.mxu1 %v3391_v21 }
  0xd4   : > { %2738 = vmatpush3.bf16.msra.mxu1 %v3738_v32 }
  0xd5   : > { %2739 = vmatprep.subr.bf16.mxu1 %v3391_v21 }
  0xd8   : > { %2740 = vmatpush3.bf16.msra.mxu1 %v3744_v33 }
  0xd9   : > { %2741 = vmatprep.subr.bf16.mxu1 %v3391_v21 }
  0xdc   : > { %2742 = vmatpush3.bf16.msra.mxu1 %v3751_v34 }
  0xdd   : > { %2743 = vmatprep.subr.bf16.mxu1 %v3391_v21 }
  0xe0   : > { %2744 = vmatpush3.bf16.msra.mxu1 %v3757_v35 }
  0xe1   : > { %2745 = vmatprep.subr.bf16.mxu1 %v3391_v21 }
  0xe4   : > { %2746 = vmatpush3.bf16.msra.mxu1 %v3764_v36 }
  0xe5   : > { %2751 = vmatprep.subr.bf16.mxu1 %v3391_v21 }
 0x16a   : > { %v595_v43 = vpop.f32.mrb[0].mxu1 }
 0x16b   : > { %v597_v45 = vpop.f32.mrb[1].mxu1  ;;  %v596_v6 = vadd.f32 %v595_v43, %v500_v42 }
 0x16c   : > { %v599_v46 = vpop.f32.mrb[2].mxu1  ;;  %v598_v8 = vadd.f32 %v597_v45, %v504_v44 }
 0x16d   : > { %v3806_v47 = vadd.f32 %v599_v46, %v500_v42  ;;  %v601_v48 = vpop.f32.mrb[3].mxu1 }
 0x16e   : > { %v3808_v49 = vadd.f32 %v601_v48, %v504_v44 }
 0x172   : > { %v605_v50 = vpop.f32.mrb[4].mxu1 }
 0x173   : > { %v3810_v51 = vadd.f32 %v605_v50, %v500_v42  ;;  %v607_v52 = vpop.f32.mrb[5].mxu1 }
 0x174   : > { %v3813_v54 = vadd.f32 %v607_v52, %v504_v44  ;;  %v609_v55 = vpop.f32.mrb[6].mxu1  ;;  %v3830_v52 = vld [vmem:[%s4313_s5] ss:$0 sm:$0xff] }
 0x175   : > { %v3815_v56 = vadd.f32 %v609_v55, %v500_v42  ;;  %v611_v57 = vpop.f32.mrb[7].mxu1 }
 0x176   : > { %v3817_v58 = vadd.f32 %v611_v57, %v504_v44 }
 0x17a   : > { %v2709_v60 = vpop.f32.mrb[8].mxu1 }
 0x17b   : > { %v3821_v61 = vadd.f32 %v2709_v60, %v508_v59  ;;  %v648_v62 = vpop.f32.mrb[9].mxu1 }
 0x17c   : > { %v2710_v63 = vpop.f32.mrb[10].mxu1 }
 0x17d   : > { %v3823_v0 = vadd.f32 %v2710_v63, %v508_v59  ;;  %v651_v1 = vpop.f32.mrb[11].mxu1  ;;  %v649_v63 = vadd.f32 %v648_v62, %v508_v59 }
 0x17e   : > { %v3825_v4 = vadd.f32 %v651_v1, %v508_v59 }
 0x182   : > { %v878_v10 = vpop.f32.mrb[0].mxu0 }
 0x183   : > { %v925_v13 = vadd.f32 %v878_v10, %v596_v6  ;;  %v880_v17 = vpop.f32.mrb[1].mxu0 }
 0x184   : > { %v932_v18 = vadd.f32 %v880_v17, %v598_v8  ;;  %v882_v31 = vpop.f32.mrb[2].mxu0 }
 0x185   : > { %v2520_v37 = vmul.f32 -1.442695, %v925_v13  ;;  %v883_v46 = vpop.f32.mrb[3].mxu0 }
 0x186   : > { %v2521_v40 = vmul.f32 -1.442695, %v932_v18 }
 0x187   : > { %3115 = vpow2.f32 %v2520_v37 }
 0x188   : > { %3117 = vpow2.f32 %v2521_v40 }
 0x191   : > { %v3116_v48 = vpop.eup %3115 }
 0x192   : > { %v929_v50 = vadd.f32 1.0, %v3116_v48  ;;  %v3118_v55 = vpop.eup %3117 }
 0x193   : > { %v936_v6 = vadd.f32 1.0, %v3118_v55 }
 0x194   : > { %3119 = vrcp.f32 %v929_v50 }
 0x19a   : > { %v919_v42 = vpop.f32.mrb[12].mxu1 }
 0x19b   : > { %v945_v43 = vadd.f32 %v3830_v52, %v919_v42  ;;  %v2729_v44 = vpop.f32.mrb[13].mxu1 }
 0x19c   : > { %v922_v45 = vpop.f32.mrb[14].mxu1 }
 0x19d   : > { %v2730_v57 = vpop.f32.mrb[15].mxu1 }
 0x19e   : > { %v3120_v60 = vpop.eup %3119 }
 0x19f   : > { %v946_v1 = vmul.f32 %v3120_v60, %v945_v43 }
 0x1a1   : > { %v947_v8 = vadd.f32 %v946_v1, %v649_v63 }
 0x1a3   : > { %3121 = vtanh.f32 %v947_v8 }
 0x1a4   : > { %3123 = vrcp.f32 %v936_v6 }
 0x1ad   : > { %v3122_v10 = vpop.eup %3121 }
 0x1ae   : > { %v949_v13 = vsub.f32 %v3721_v29, %v3122_v10  ;;  %v3124_v17 = vpop.eup %3123 }
 0x1b0   : > { %v950_v18 = vmul.f32 %v3124_v17, %v949_v13 }
 0x1b2   : > { %v3834_v31 = vadd.f32 %v3122_v10, %v950_v18 }
 0x1b4   : > { %v959_v37 = vpack.c.bf16 %v3834_v31, %v3834_v31 }
 0x1b6   : > { %993 = vmatmul.mubr.bf16.vlgmr.msra.gmra.mrb[4].mxu0 %v959_v37  ;;  %2748 = vmatmul.mubr.bf16.vlgmr.msra.gmra.mrb[16].mxu1 %v959_v37 }
 0x1b7   : > { %1072 = vmatpush1.bf16.msra.mxu0 %v3665_v5  ;;  %2752 = vmatpush3.bf16.msra.mxu1 %v3709_v24 }
 0x1b8   : > { %1073 = vmatprep.subr.bf16.mxu0 %v3671_v7  ;;  %2753 = vmatprep.subr.bf16.mxu1 %v3391_v21 }
 0x1b9   : > { %1103 = vmatprep.mubr.bf16.mxu0 %v3390_v3  ;;  %2767 = vmatprep.mubr.msk.bf16.mxu1 %vm3392_vm1, %v3391_v21 }
 0x1bb   : > { %1074 = vmatpush1.bf16.msra.mxu0 %v3673_v9  ;;  %2754 = vmatpush3.bf16.msra.mxu1 %v3717_v27 }
 0x1bc   : > { %1075 = vmatprep.subr.bf16.mxu0 %v3677_v11  ;;  %2755 = vmatprep.subr.bf16.mxu1 %v3391_v21 }
 0x1bf   : > { %1076 = vmatpush1.bf16.msra.mxu0 %v3679_v12  ;;  %2756 = vmatpush3.bf16.msra.mxu1 %v3728_v30 }
 0x1c0   : > { %1077 = vmatprep.subr.bf16.mxu0 %v3683_v14  ;;  %2757 = vmatprep.subr.bf16.mxu1 %v3391_v21 }
 0x1c3   : > { %1078 = vmatpush1.bf16.msra.mxu0 %v3686_v15  ;;  %2758 = vmatpush3.bf16.msra.mxu1 %v3738_v32 }
 0x1c4   : > { %1079 = vmatprep.subr.bf16.mxu0 %v3689_v16  ;;  %2759 = vmatprep.subr.bf16.mxu1 %v3391_v21 }
 0x1c7   : > { %1080 = vmatpush1.bf16.msra.mxu0 %v3695_v19  ;;  %2760 = vmatpush3.bf16.msra.mxu1 %v3744_v33 }
 0x1c8   : > { %1081 = vmatprep.subr.bf16.mxu0 %v3698_v20  ;;  %2761 = vmatprep.subr.bf16.mxu1 %v3391_v21 }
 0x1cb   : > { %1082 = vmatpush1.bf16.msra.mxu0 %v3703_v22  ;;  %2762 = vmatpush3.bf16.msra.mxu1 %v3751_v34 }
 0x1cc   : > { %1083 = vmatprep.subr.bf16.mxu0 %v3707_v23  ;;  %2763 = vmatprep.subr.bf16.mxu1 %v3391_v21 }
 0x1cf   : > { %1084 = vmatpush1.bf16.msra.mxu0 %v3712_v25  ;;  %2764 = vmatpush3.bf16.msra.mxu1 %v3757_v35 }
 0x1d0   : > { %1085 = vmatprep.subr.bf16.mxu0 %v3715_v26  ;;  %2765 = vmatprep.subr.bf16.mxu1 %v3391_v21 }
 0x1d3   : > { %1086 = vmatpush1.bf16.msra.mxu0 %v3719_v28  ;;  %2766 = vmatpush3.bf16.msra.mxu1 %v3764_v36 }
 0x1d4   : > { %1182 = vmatprep.subr.bf16.mxu0 %v3661_v2  ;;  %2771 = vmatprep.subr.bf16.mxu1 %v3391_v21 }
 0x289   : > { %v994_v29 = vpop.f32.mrb[4].mxu0  ;;  %v1035_v59 = vpop.f32.mrb[16].mxu1 }
 0x28a   : > { %v1041_v62 = vadd.f32 %v994_v29, %v3806_v47  ;;  %v996_v46 = vpop.f32.mrb[5].mxu0  ;;  %v2749_v40 = vpop.f32.mrb[17].mxu1  ;;  %v1055_v63 = vadd.f32 %v3830_v52, %v1035_v59  ;;  %v3043_v29 = vld [vmem:[#allocation10] ss:$12 sps:$4 sm:$0xff]  }
 0x28b   : > { %v1048_v48 = vadd.f32 %v996_v46, %v3808_v49  ;;  %v998_v50 = vpop.f32.mrb[6].mxu0  ;;  %v1038_v42 = vpop.f32.mrb[18].mxu1  ;;  %v3051_v40 = vld [vmem:[#allocation10 + $0x34] ss:$12 sps:$4 sm:$0xff]  }
 0x28c   : > { %v2523_v43 = vmul.f32 -1.442695, %v1041_v62  ;;  %v999_v44 = vpop.f32.mrb[7].mxu0  ;;  %v2750_v45 = vpop.f32.mrb[19].mxu1  ;;  %v3048_v62 = vld [vmem:[#allocation10 + $0x1c] ss:$12 sps:$4 sm:$0xff]  }
 0x28d   : > { %v2524_v55 = vmul.f32 -1.442695, %v1048_v48  ;;  %v3049_v48 = vld [vmem:[#allocation10 + $0x30] ss:$12 sps:$4 sm:$0xff]   ;;  %v3054_v50 = vld [vmem:[#allocation10 + $0x4c] ss:$12 sps:$4 sm:$0xff]  }
 0x28e   : > { %3125 = vpow2.f32 %v2523_v43  ;;  %v3052_v42 = vld [vmem:[#allocation10 + $0x48] ss:$12 sps:$4 sm:$0xff]   ;;  %v3057_v43 = vld [vmem:[#allocation10 + $0x64] ss:$12 sps:$4 sm:$0xff]   ;;  %v3055_v44 = vld [vmem:[#allocation10 + $0x60] ss:$12 sps:$4 sm:$0xff]  }
 0x28f   : > { %3127 = vpow2.f32 %v2524_v55  ;;  %v3058_v45 = vld [vmem:[#allocation10 + $0x78] ss:$12 sps:$4 sm:$0xff]   ;;  %v3063_v55 = vld [vmem:[#allocation10 + $0x94] ss:$12 sps:$4 sm:$0xff]  }
 0x298   : > { %v3126_v57 = vpop.eup %3125 }
 0x299   : > { %v1045_v60 = vadd.f32 1.0, %v3126_v57  ;;  %v3128_v2 = vpop.eup %3127  ;;  %v3061_v57 = vld [vmem:[#allocation10 + $0x90] ss:$12 sps:$4 sm:$0xff]  }
 0x29a   : > { %v1052_v8 = vadd.f32 1.0, %v3128_v2  ;;  %v3064_v2 = vld [vmem:[#allocation10 + $0xa8] ss:$12 sps:$4 sm:$0xff]  }
 0x29b   : > { %3129 = vrcp.f32 %v1045_v60  ;;  %v3066_v60 = vld [vmem:[#allocation10 + $0xac] ss:$12 sps:$4 sm:$0xff]  }
 0x2a5   : > { %v3130_v1 = vpop.eup %3129 }
 0x2a6   : > { %v1056_v47 = vmul.f32 %v3130_v1, %v1055_v63  ;;  %v3067_v63 = vld [vmem:[#allocation10 + $0x8] ss:$12 sps:$4 sm:$0xff]   ;;  %v3068_v1 = vld [vmem:[#allocation10 + $0x20] ss:$12 sps:$4 sm:$0xff]  }
 0x2a8   : > { %v1057_v6 = vadd.f32 %v1056_v47, %v3825_v4  ;;  %v3069_v47 = vld [vmem:[#allocation10 + $0x38] ss:$12 sps:$4 sm:$0xff]  }
 0x2aa   : > { %3131 = vtanh.f32 %v1057_v6  ;;  %v3928_v6 = vld [vmem:[#allocation11 + $0x4] ss:$12 sps:$4 sm:$0xff]  }
 0x2ab   : > { %3133 = vrcp.f32 %v1052_v8  ;;  %v3930_v8 = vld [vmem:[#allocation11] ss:$12 sps:$4 sm:$0xff]  }
 0x2b4   : > { %v3132_v49 = vpop.eup %3131 }
 0x2b5   : > { %v1059_v10 = vsub.f32 %v3834_v31, %v3132_v49  ;;  %v3134_v13 = vpop.eup %3133 }
 0x2b7   : > { %v1060_v17 = vmul.f32 %v3134_v13, %v1059_v10  ;;  %v3934_v10 = vld [vmem:[#allocation11 + $0x1c] ss:$12 sps:$4 sm:$0xff]   ;;  %v3936_v13 = vld [vmem:[#allocation11 + $0x18] ss:$12 sps:$4 sm:$0xff]  }
 0x2b9   : > { %v3878_v18 = vadd.f32 %v3132_v49, %v1060_v17  ;;  %v3073_v49 = vld [vmem:[#allocation10 + $0x50] ss:$12 sps:$4 sm:$0xff]   ;;  %v3077_v17 = vld [vmem:[#allocation10 + $0x68] ss:$12 sps:$4 sm:$0xff]  }
 0x2bb   : > { %v1070_v37 = vpack.c.bf16 %v3878_v18, %v3878_v18  ;;  %v1291_v46 = vpack.c.bf16 %v3878_v18, %v3834_v31  ;;  %v3060_v31 = vld [vmem:[#allocation10 + $0x7c] ss:$12 sps:$4 sm:$0xff]  }
 0x2bd   : > { %1104 = vmatmul.mubr.bf16.vlgmr.msra.gmra.mrb[8].mxu0 %v1070_v37  ;;  %2768 = vmatmul.mubr.bf16.vlgmr.msra.gmra.mrb[20].mxu1 %v1070_v37  ;;  %v3942_v37 = vld [vmem:[#allocation11 + $0x30] ss:$12 sps:$4 sm:$0xff]  }
 0x2be   : > { %1183 = vmatpush1.bf16.msra.mxu0 %v3665_v5  ;;  %2772 = vmatpush3.bf16.msra.mxu1 %v3709_v24  ;;  %v3045_v5 = vld [vmem:[#allocation10 + $0x4] ss:$12 sps:$4 sm:$0xff]  }
 0x2bf   : > { %1184 = vmatprep.subr.bf16.mxu0 %v3671_v7  ;;  %2773 = vmatprep.subr.bf16.mxu1 %v3391_v21 }
 0x2c0   : > { %1214 = vmatprep.mubr.bf16.mxu0 %v3390_v3  ;;  %2787 = vmatprep.mubr.msk.bf16.mxu1 %vm3392_vm1, %v3391_v21 }
 0x2c2   : > { %1185 = vmatpush1.bf16.msra.mxu0 %v3673_v9  ;;  %2774 = vmatpush3.bf16.msra.mxu1 %v3717_v27 }
 0x2c3   : > { %1186 = vmatprep.subr.bf16.mxu0 %v3677_v11  ;;  %2775 = vmatprep.subr.bf16.mxu1 %v3391_v21 }
 0x2c6   : > { %1187 = vmatpush1.bf16.msra.mxu0 %v3679_v12  ;;  %2776 = vmatpush3.bf16.msra.mxu1 %v3728_v30 }
 0x2c7   : > { %1188 = vmatprep.subr.bf16.mxu0 %v3683_v14  ;;  %2777 = vmatprep.subr.bf16.mxu1 %v3391_v21 }
 0x2ca   : > { %1189 = vmatpush1.bf16.msra.mxu0 %v3686_v15  ;;  %2778 = vmatpush3.bf16.msra.mxu1 %v3738_v32 }
 0x2cb   : > { %1190 = vmatprep.subr.bf16.mxu0 %v3689_v16  ;;  %2779 = vmatprep.subr.bf16.mxu1 %v3391_v21 }
 0x2ce   : > { %1191 = vmatpush1.bf16.msra.mxu0 %v3695_v19  ;;  %2780 = vmatpush3.bf16.msra.mxu1 %v3744_v33 }
 0x2cf   : > { %1192 = vmatprep.subr.bf16.mxu0 %v3698_v20  ;;  %2781 = vmatprep.subr.bf16.mxu1 %v3391_v21 }
 0x2d2   : > { %1193 = vmatpush1.bf16.msra.mxu0 %v3703_v22  ;;  %2782 = vmatpush3.bf16.msra.mxu1 %v3751_v34 }
 0x2d3   : > { %1194 = vmatprep.subr.bf16.mxu0 %v3707_v23  ;;  %2783 = vmatprep.subr.bf16.mxu1 %v3391_v21 }
 0x2d6   : > { %1195 = vmatpush1.bf16.msra.mxu0 %v3712_v25  ;;  %2784 = vmatpush3.bf16.msra.mxu1 %v3757_v35 }
 0x2d7   : > { %1196 = vmatprep.subr.bf16.mxu0 %v3715_v26  ;;  %2785 = vmatprep.subr.bf16.mxu1 %v3391_v21 }
 0x2da   : > { %1197 = vmatpush1.bf16.msra.mxu0 %v3719_v28  ;;  %2786 = vmatpush3.bf16.msra.mxu1 %v3764_v36 }
 0x2db   : > { %1470 = vmatprep.subr.bf16.mxu0 %v3045_v5  ;;  %2791 = vmatprep.subr.bf16.mxu1 %v3067_v63  ;;  %v3081_v5 = vld [vmem:[#allocation10 + $0x80] ss:$12 sps:$4 sm:$0xff]  }
 0x390   : > { %v1105_v7 = vpop.f32.mrb[8].mxu0  ;;  %v1146_v9 = vpop.f32.mrb[20].mxu1 }
 0x391   : > { %v1152_v11 = vadd.f32 %v1105_v7, %v3810_v51  ;;  %v1107_v12 = vpop.f32.mrb[9].mxu0  ;;  %v2769_v14 = vpop.f32.mrb[21].mxu1  ;;  %v1166_v28 = vadd.f32 %v3830_v52, %v1146_v9  ;;  %v3944_v7 = vld [vmem:[#allocation11 + $0x4c] ss:$12 sps:$4 sm:$0xff]   ;;  %v3948_v9 = vld [vmem:[#allocation11 + $0x48] ss:$12 sps:$4 sm:$0xff]  }
 0x392   : > { %v1159_v15 = vadd.f32 %v1107_v12, %v3813_v54  ;;  %v1109_v16 = vpop.f32.mrb[10].mxu0  ;;  %v1149_v19 = vpop.f32.mrb[22].mxu1  ;;  %v3951_v12 = vld [vmem:[#allocation11 + $0x64] ss:$12 sps:$4 sm:$0xff]   ;;  %v3954_v14 = vld [vmem:[#allocation11 + $0x60] ss:$12 sps:$4 sm:$0xff]  }
 0x393   : > { %v2525_v20 = vmul.f32 -1.442695, %v1152_v11  ;;  %v1110_v22 = vpop.f32.mrb[11].mxu0  ;;  %v2770_v23 = vpop.f32.mrb[23].mxu1  ;;  %v3085_v11 = vld [vmem:[#allocation10 + $0x98] ss:$12 sps:$4 sm:$0xff]  }
 0x394   : > { %v2526_v24 = vmul.f32 -1.442695, %v1159_v15  ;;  %v3089_v15 = vld [vmem:[#allocation10 + $0xb0] ss:$12 sps:$4 sm:$0xff]   ;;  %v3960_v19 = vld [vmem:[#allocation11 + $0x78] ss:$12 sps:$4 sm:$0xff]  }
 0x395   : > { %3135 = vpow2.f32 %v2525_v20  ;;  %v3957_v16 = vld [vmem:[#allocation11 + $0x7c] ss:$12 sps:$4 sm:$0xff]   ;;  %v3965_v20 = vld [vmem:[#allocation11 + $0x94] ss:$12 sps:$4 sm:$0xff]   ;;  %v3971_v23 = vld [vmem:[#allocation11 + $0xac] ss:$12 sps:$4 sm:$0xff]  }
 0x396   : > { %3137 = vpow2.f32 %v2526_v24  ;;  %v3967_v22 = vld [vmem:[#allocation11 + $0x90] ss:$12 sps:$4 sm:$0xff]   ;;  %v3974_v24 = vld [vmem:[#allocation11 + $0xa8] ss:$12 sps:$4 sm:$0xff]  }
 0x39f   : > { %v3136_v25 = vpop.eup %3135 }
 0x3a0   : > { %v1156_v26 = vadd.f32 1.0, %v3136_v25  ;;  %v3138_v27 = vpop.eup %3137 }
 0x3a1   : > { %v1163_v34 = vadd.f32 1.0, %v3138_v27 }
 0x3a2   : > { %3139 = vrcp.f32 %v1156_v26 }
 0x3ac   : > { %v3140_v30 = vpop.eup %3139 }
 0x3ad   : > { %v1167_v32 = vmul.f32 %v3140_v30, %v1166_v28 }
 0x3af   : > { %v1168_v33 = vadd.f32 %v1167_v32, %v3821_v61  ;;  %v3046_v61 = vld [vmem:[#allocation10 + $0x18] ss:$12 sps:$4 sm:$0xff]  }
 0x3b1   : > { %3141 = vtanh.f32 %v1168_v33 }
 0x3b2   : > { %3143 = vrcp.f32 %v1163_v34 }
 0x3bb   : > { %v3142_v35 = vpop.eup %3141 }
 0x3bc   : > { %v1170_v36 = vsub.f32 %v3878_v18, %v3142_v35  ;;  %v3144_v51 = vpop.eup %3143  ;;  %v3940_v18 = vld [vmem:[#allocation11 + $0x34] ss:$12 sps:$4 sm:$0xff]  }
 0x3be   : > { %v1171_v54 = vmul.f32 %v3144_v51, %v1170_v36 }
 0x3c0   : > { %v3920_v4 = vadd.f32 %v3142_v35, %v1171_v54 }
 0x3c2   : > { %v1181_v59 = vpack.c.bf16 %v3920_v4, %v3920_v4 }
 0x3c4   : > { %1215 = vmatmul.mubr.bf16.vlgmr.msra.gmra.mrb[12].mxu0 %v1181_v59  ;;  %2788 = vmatmul.mubr.bf16.vlgmr.msra.gmra.mrb[24].mxu1 %v1181_v59 }
 0x3c5   : > { %1471 = vmatpush1.bf16.msra.mxu0 %v3043_v29  ;;  %2807 = vmatprep.mubr.bf16.mxu1 %v1291_v46 }
 0x3c6   : > { %1472 = vmatprep.subr.bf16.mxu0 %v3048_v62  ;;  %1502 = vmatprep.mubr.bf16.mxu0 %v3390_v3 }
 0x3c7   : > { %2792 = vmatpush3.bf16.msra.mxu1 %v3067_v63 }
 0x3c8   : > { %2793 = vmatprep.subr.bf16.mxu1 %v3068_v1 }
 0x3c9   : > { %1473 = vmatpush1.bf16.msra.mxu0 %v3046_v61 }
 0x3ca   : > { %1474 = vmatprep.subr.bf16.mxu0 %v3051_v40 }
 0x3cb   : > { %2794 = vmatpush3.bf16.msra.mxu1 %v3068_v1  ;;  %v4010_v1 = vld [vmem:[#allocation11 + $0x50] ss:$12 sps:$4 sm:$0xff]  }
 0x3cc   : > { %2795 = vmatprep.subr.bf16.mxu1 %v3069_v47 }
 0x3cd   : > { %1475 = vmatpush1.bf16.msra.mxu0 %v3049_v48 }
 0x3ce   : > { %1476 = vmatprep.subr.bf16.mxu0 %v3054_v50 }
 0x3cf   : > { %2796 = vmatpush3.bf16.msra.mxu1 %v3069_v47  ;;  %v4017_v47 = vld [vmem:[#allocation11 + $0x68] ss:$12 sps:$4 sm:$0xff]  }
 0x3d0   : > { %2797 = vmatprep.subr.bf16.mxu1 %v3073_v49 }
 0x3d1   : > { %1477 = vmatpush1.bf16.msra.mxu0 %v3052_v42 }
 0x3d2   : > { %1478 = vmatprep.subr.bf16.mxu0 %v3057_v43 }
 0x3d3   : > { %2798 = vmatpush3.bf16.msra.mxu1 %v3073_v49  ;;  %v4023_v49 = vld [vmem:[#allocation11 + $0x80] ss:$12 sps:$4 sm:$0xff]  }
 0x3d4   : > { %2799 = vmatprep.subr.bf16.mxu1 %v3077_v17 }
 0x3d5   : > { %1479 = vmatpush1.bf16.msra.mxu0 %v3055_v44 }
 0x3d6   : > { %1480 = vmatprep.subr.bf16.mxu0 %v3060_v31 }
 0x3d7   : > { %2800 = vmatpush3.bf16.msra.mxu1 %v3077_v17  ;;  %v4029_v17 = vld [vmem:[#allocation11 + $0x98] ss:$12 sps:$4 sm:$0xff]  }
 0x3d8   : > { %2801 = vmatprep.subr.bf16.mxu1 %v3081_v5 }
 0x3d9   : > { %1481 = vmatpush1.bf16.msra.mxu0 %v3058_v45 }
 0x3da   : > { %1482 = vmatprep.subr.bf16.mxu0 %v3063_v55 }
 0x3db   : > { %2802 = vmatpush3.bf16.msra.mxu1 %v3081_v5  ;;  %v4035_v5 = vld [vmem:[#allocation11 + $0xb0] ss:$12 sps:$4 sm:$0xff]  }
 0x3dc   : > { %2803 = vmatprep.subr.bf16.mxu1 %v3085_v11 }
 0x3dd   : > { %1483 = vmatpush1.bf16.msra.mxu0 %v3061_v57  ;;  %v3991_v57 = vld [vmem:[#allocation11 + $0x8] ss:$12 sps:$4 sm:$0xff]  }
 0x3de   : > { %1484 = vmatprep.subr.bf16.mxu0 %v3066_v60  ;;  %v3995_v60 = vld [vmem:[#allocation11 + $0x20] ss:$12 sps:$4 sm:$0xff]  }
 0x3df   : > { %2804 = vmatpush3.bf16.msra.mxu1 %v3085_v11  ;;  %v1325_v11 = vld [vmem:[%s4316_s8] sm:$0x7] }
 0x3e0   : > { %2805 = vmatprep.subr.bf16.mxu1 %v3089_v15 }
 0x3e1   : > { %1485 = vmatpush1.bf16.msra.mxu0 %v3064_v2  ;;  %v3998_v2 = vld [vmem:[#allocation4 + $0x8] sm:$0xff] }
 0x3e2   : > { %1751 = vmatprep.subr.bf16.mxu0 %v3928_v6  ;;  %v1622_v63 = vpack.c.bf16 %v3998_v2, %v3998_v2 }
 0x3e3   : > { %2806 = vmatpush3.bf16.msra.mxu1 %v3089_v15  ;;  %v1338_v15 = vrot.slane %v1325_v11, %v507_v53 }
 0x3e4   : > { %1503 = vmatmul.mubr.bf16.vlgmr.msra.gmra.mrb[16].mxu0 %v1291_v46  ;;  %2811 = vmatprep.subr.bf16.mxu1 %v3391_v21 }
 0x3e5   : > { %1512 = vmatprep.mubr.bf16.mxu0 %v3390_v3  ;;  %1752 = vmatpush1.bf16.msra.mxu0 %v3930_v8 }
 0x3e6   : > { %1753 = vmatprep.subr.bf16.mxu0 %v3934_v10 }
 0x3e9   : > { %1754 = vmatpush1.bf16.msra.mxu0 %v3936_v13 }
 0x3ea   : > { %1755 = vmatprep.subr.bf16.mxu0 %v3940_v18 }
 0x3ed   : > { %1756 = vmatpush1.bf16.msra.mxu0 %v3942_v37 }
 0x3ee   : > { %1757 = vmatprep.subr.bf16.mxu0 %v3944_v7 }
 0x3f1   : > { %1758 = vmatpush1.bf16.msra.mxu0 %v3948_v9 }
 0x3f2   : > { %1759 = vmatprep.subr.bf16.mxu0 %v3951_v12 }
 0x3f5   : > { %1760 = vmatpush1.bf16.msra.mxu0 %v3954_v14 }
 0x3f6   : > { %1761 = vmatprep.subr.bf16.mxu0 %v3957_v16 }
 0x3f9   : > { %1762 = vmatpush1.bf16.msra.mxu0 %v3960_v19 }
 0x3fa   : > { %1763 = vmatprep.subr.bf16.mxu0 %v3965_v20 }
 0x3fd   : > { %1764 = vmatpush1.bf16.msra.mxu0 %v3967_v22 }
 0x3fe   : > { %1765 = vmatprep.subr.bf16.mxu0 %v3971_v23 }
 0x401   : > { %1766 = vmatpush1.bf16.msra.mxu0 %v3974_v24 }
 0x402   : > { %1872 = vmatprep.subr.bf16.mxu0 %v3928_v6 }
 0x497   : > { %v1216_v25 = vpop.f32.mrb[12].mxu0  ;;  %v1257_v26 = vpop.f32.mrb[24].mxu1 }
 0x498   : > { %v1263_v27 = vadd.f32 %v1216_v25, %v3815_v56  ;;  %v1218_v28 = vpop.f32.mrb[13].mxu0  ;;  %v2789_v30 = vpop.f32.mrb[25].mxu1  ;;  %v1277_v46 = vadd.f32 %v3830_v52, %v1257_v26 }
 0x499   : > { %v1270_v32 = vadd.f32 %v1218_v28, %v3817_v58  ;;  %v1220_v33 = vpop.f32.mrb[14].mxu0  ;;  %v1260_v34 = vpop.f32.mrb[26].mxu1 }
 0x49a   : > { %v2527_v35 = vmul.f32 -1.442695, %v1263_v27  ;;  %v1221_v36 = vpop.f32.mrb[15].mxu0  ;;  %v2790_v51 = vpop.f32.mrb[27].mxu1  ;;  %v4081_v34 = vrot.slane %v1325_v11, %v499_v39 }
 0x49b   : > { %v2528_v54 = vmul.f32 -1.442695, %v1270_v32  ;;  %v4089_v51 = vrot.slane %v1325_v11, %v503_v41 }
 0x49c   : > { %3145 = vpow2.f32 %v2527_v35 }
 0x49d   : > { %3147 = vpow2.f32 %v2528_v54 }
 0x4a6   : > { %v3146_v29 = vpop.eup %3145 }
 0x4a7   : > { %v1267_v59 = vadd.f32 1.0, %v3146_v29  ;;  %v3148_v62 = vpop.eup %3147 }
 0x4a8   : > { %v1274_v48 = vadd.f32 1.0, %v3148_v62 }
 0x4a9   : > { %3149 = vrcp.f32 %v1267_v59 }
 0x4b3   : > { %v3150_v61 = vpop.eup %3149 }
 0x4b4   : > { %v1278_v56 = vmul.f32 %v3150_v61, %v1277_v46 }
 0x4b6   : > { %v1279_v40 = vadd.f32 %v1278_v56, %v3823_v0 }
 0x4b7   : > { %v3982_v58 = vpop.f32.mrb[16].mxu0 }
 0x4b8   : > { %3151 = vtanh.f32 %v1279_v40  ;;  %v3984_v50 = vpop.f32.mrb[17].mxu0  ;;  %v1505_v29 = vadd.f32 %v3982_v58, %v4081_v34  ;;  %v4100_v58 = vld [vmem:[%s4317_s9] ss:$0 sm:$0xff] }
 0x4b9   : > { %v3986_v42 = vpop.f32.mrb[18].mxu0  ;;  %3153 = vrcp.f32 %v1274_v48  ;;  %v1507_v59 = vadd.f32 %v3984_v50, %v4089_v51 }
 0x4ba   : > { %v3988_v43 = vpop.f32.mrb[19].mxu0 }
 0x4c2   : > { %v3152_v44 = vpop.eup %3151 }
 0x4c3   : > { %v1281_v31 = vsub.f32 %v3920_v4, %v3152_v44  ;;  %v3154_v45 = vpop.eup %3153 }
 0x4c5   : > { %v1282_v52 = vmul.f32 %v3154_v45, %v1281_v31 }
 0x4c7   : > { %v1283_v55 = vadd.f32 %v3152_v44, %v1282_v52 }
 0x4c9   : > { %1286 = vst [vmem:[#allocation4] sm:$0xff] %v1283_v55  ;;  %v1292_v0 = vpack.c.bf16 %v1283_v55, %v3920_v4  ;;  %v4006_v4 = vld [vmem:[#allocation11 + $0x38] ss:$12 sps:$4 sm:$0xff]  }
 0x4cb   : > { %1513 = vmatmul.mubr.bf16.gmra.mrb[20].mxu0 %v1292_v0  ;;  %2808 = vmatmul.mubr.bf16.vlgmr.msra.gmra.mrb[28].mxu1 %v1292_v0 }
 0x4cc   : > { %2812 = vmatpush3.bf16.msra.mxu1 %v3991_v57  ;;  %1783 = vmatprep.mubr.bf16.mxu0 %v3390_v3 }
 0x4cd   : > { %2813 = vmatprep.subr.bf16.mxu1 %v3391_v21  ;;  %2827 = vmatprep.mubr.msk.bf16.mxu1 %vm3392_vm1, %v3391_v21 }
 0x4d0   : > { %2814 = vmatpush3.bf16.msra.mxu1 %v3995_v60 }
 0x4d1   : > { %2815 = vmatprep.subr.bf16.mxu1 %v3391_v21 }
 0x4d3   : > { %1784 = vmatmul.mubr.bf16.vlgmr.msra.gmra.mrb[24].mxu0 %v1622_v63 }
 0x4d4   : > { %2816 = vmatpush3.bf16.msra.mxu1 %v4006_v4  ;;  %1873 = vmatpush1.bf16.msra.mxu0 %v3930_v8 }
 0x4d5   : > { %2817 = vmatprep.subr.bf16.mxu1 %v3391_v21  ;;  %1874 = vmatprep.subr.bf16.mxu0 %v3934_v10 }
 0x4d6   : > { %1904 = vmatprep.mubr.bf16.mxu0 %v3390_v3 }
 0x4d8   : > { %2818 = vmatpush3.bf16.msra.mxu1 %v4010_v1  ;;  %1875 = vmatpush1.bf16.msra.mxu0 %v3936_v13 }
 0x4d9   : > { %2819 = vmatprep.subr.bf16.mxu1 %v3391_v21  ;;  %1876 = vmatprep.subr.bf16.mxu0 %v3940_v18 }
 0x4dc   : > { %2820 = vmatpush3.bf16.msra.mxu1 %v4017_v47  ;;  %1877 = vmatpush1.bf16.msra.mxu0 %v3942_v37 }
 0x4dd   : > { %2821 = vmatprep.subr.bf16.mxu1 %v3391_v21  ;;  %1878 = vmatprep.subr.bf16.mxu0 %v3944_v7 }
 0x4e0   : > { %2822 = vmatpush3.bf16.msra.mxu1 %v4023_v49  ;;  %1879 = vmatpush1.bf16.msra.mxu0 %v3948_v9 }
 0x4e1   : > { %2823 = vmatprep.subr.bf16.mxu1 %v3391_v21  ;;  %1880 = vmatprep.subr.bf16.mxu0 %v3951_v12 }
 0x4e4   : > { %2824 = vmatpush3.bf16.msra.mxu1 %v4029_v17  ;;  %1881 = vmatpush1.bf16.msra.mxu0 %v3954_v14 }
 0x4e5   : > { %2825 = vmatprep.subr.bf16.mxu1 %v3391_v21  ;;  %1882 = vmatprep.subr.bf16.mxu0 %v3957_v16 }
 0x4e8   : > { %2826 = vmatpush3.bf16.msra.mxu1 %v4035_v5  ;;  %1883 = vmatpush1.bf16.msra.mxu0 %v3960_v19 }
 0x4e9   : > { %2831 = vmatprep.subr.bf16.mxu1 %v3391_v21  ;;  %1884 = vmatprep.subr.bf16.mxu0 %v3965_v20 }
 0x4eb   : > { %2828 = vmatmul.mubr.bf16.vlgmr.msra.gmra.mrb[32].mxu1 %v1622_v63 }
 0x4ec   : > { %2832 = vmatpush3.bf16.msra.mxu1 %v3991_v57  ;;  %1885 = vmatpush1.bf16.msra.mxu0 %v3967_v22 }
 0x4ed   : > { %2833 = vmatprep.subr.bf16.mxu1 %v3391_v21  ;;  %1886 = vmatprep.subr.bf16.mxu0 %v3971_v23 }
 0x4ee   : > { %2847 = vmatprep.mubr.msk.bf16.mxu1 %vm3392_vm1, %v3391_v21 }
 0x4f0   : > { %2834 = vmatpush3.bf16.msra.mxu1 %v3995_v60  ;;  %1887 = vmatpush1.bf16.msra.mxu0 %v3974_v24 }
 0x4f1   : > { %2835 = vmatprep.subr.bf16.mxu1 %v3391_v21  ;;  %1988 = vmatprep.subr.bf16.mxu0 %v3928_v6 }
 0x4f4   : > { %2836 = vmatpush3.bf16.msra.mxu1 %v4006_v4 }
 0x4f5   : > { %2837 = vmatprep.subr.bf16.mxu1 %v3391_v21 }
 0x4f8   : > { %2838 = vmatpush3.bf16.msra.mxu1 %v4010_v1 }
 0x4f9   : > { %2839 = vmatprep.subr.bf16.mxu1 %v3391_v21 }
 0x4fc   : > { %2840 = vmatpush3.bf16.msra.mxu1 %v4017_v47 }
 0x4fd   : > { %2841 = vmatprep.subr.bf16.mxu1 %v3391_v21 }
 0x500   : > { %2842 = vmatpush3.bf16.msra.mxu1 %v4023_v49 }
 0x501   : > { %2843 = vmatprep.subr.bf16.mxu1 %v3391_v21 }
 0x504   : > { %2844 = vmatpush3.bf16.msra.mxu1 %v4029_v17 }
 0x505   : > { %2845 = vmatprep.subr.bf16.mxu1 %v3391_v21 }
 0x508   : > { %2846 = vmatpush3.bf16.msra.mxu1 %v4035_v5 }
 0x509   : > { %2851 = vmatprep.subr.bf16.mxu1 %v3391_v21 }
 0x59e   : > { %v4071_v25 = vpop.f32.mrb[20].mxu0  ;;  %v2809_v26 = vpop.f32.mrb[28].mxu1 }
 0x59f   : > { %v4073_v27 = vadd.f32 %v2809_v26, %v1338_v15  ;;  %v4075_v28 = vpop.f32.mrb[21].mxu0  ;;  %v1557_v30 = vpop.f32.mrb[29].mxu1 }
 0x5a0   : > { %v4077_v32 = vpop.f32.mrb[22].mxu0  ;;  %v2810_v33 = vpop.f32.mrb[30].mxu1  ;;  %v1558_v11 = vadd.f32 %v1557_v30, %v1338_v15  ;;  %v1975_v30 = vstv %s1974_s23  ;;  %s3311_s23 = sshll.u32 %s3393_s30, 4  ;;  %s3312_s23 = int_to_ptr.vmem [resolvable:$false] %s3311_s23 }
 0x5a1   : > { %v4083_v35 = vadd.f32 %v2810_v33, %v1338_v15  ;;  %v4085_v36 = vpop.f32.mrb[23].mxu0  ;;  %v1560_v53 = vpop.f32.mrb[31].mxu1  ;;  %p3314_p9 = scmp.lt.s32.totalorder %s4260_s26, %s3312_s23 }
 0x5a2   : > { %v4091_v54 = vadd.f32 %v1560_v53, %v1338_v15  ;;  %v1859_v15 = vstv %s3646_s15 }
 0x5a6   : > { %v1785_v62 = vpop.f32.mrb[24].mxu0 }
 0x5a7   : > { %v1832_v39 = vadd.f32 %v1785_v62, %v1505_v29  ;;  %v1787_v46 = vpop.f32.mrb[25].mxu0 }
 0x5a8   : > { %v1839_v61 = vadd.f32 %v1787_v46, %v1507_v59  ;;  %v1789_v56 = vpop.f32.mrb[26].mxu0 }
 0x5a9   : > { %v2577_v40 = vmul.f32 -1.442695, %v1832_v39  ;;  %v1790_v48 = vpop.f32.mrb[27].mxu0 }
 0x5aa   : > { %v2578_v44 = vmul.f32 -1.442695, %v1839_v61  ;;  %v1511_v48 = vadd.f32 %v3988_v43, %v4089_v51 }
 0x5ab   : > { %3155 = vpow2.f32 %v2577_v40 }
 0x5ac   : > { %3157 = vpow2.f32 %v2578_v44 }
 0x5b5   : > { %v3156_v38 = vpop.eup %3155 }
 0x5b6   : > { %v1836_v41 = vadd.f32 1.0, %v3156_v38  ;;  %v3158_v55 = vpop.eup %3157 }
 0x5b7   : > { %v1843_v33 = vadd.f32 1.0, %v3158_v55 }
 0x5b8   : > { %3159 = vrcp.f32 %v1836_v41 }
 0x5be   : > { %v1826_v31 = vpop.f32.mrb[32].mxu1 }
 0x5bf   : > { %v1852_v50 = vadd.f32 %v4100_v58, %v1826_v31  ;;  %v2829_v45 = vpop.f32.mrb[33].mxu1 }
 0x5c0   : > { %v1829_v52 = vpop.f32.mrb[34].mxu1 }
 0x5c1   : > { %v2830_v0 = vpop.f32.mrb[35].mxu1 }
 0x5c2   : > { %v3160_v63 = vpop.eup %3159 }
 0x5c3   : > { %v1853_v26 = vmul.f32 %v3160_v63, %v1852_v50 }
 0x5c5   : > { %v1854_v53 = vadd.f32 %v1853_v26, %v1558_v11 }
 0x5c7   : > { %3161 = vtanh.f32 %v1854_v53 }
 0x5c8   : > { %3163 = vrcp.f32 %v1843_v33 }
 0x5d1   : > { %v3162_v29 = vpop.eup %3161 }
 0x5d2   : > { %v1856_v59 = vsub.f32 %v3998_v2, %v3162_v29  ;;  %v3164_v62 = vpop.eup %3163  ;;  %v4146_v2 = vld [vmem:[%s4308_s0] sm:$0xff] }
 0x5d3   : > { %vm1860_vm2 = vcmp.gt.s32.totalorder %v4146_v2, %v1859_v15  ;;  %vm1976_vm3 = vcmp.gt.s32.totalorder %v4146_v2, %v1975_v30 }
 0x5d4   : > { %v1857_v39 = vmul.f32 %v3164_v62, %v1856_v59  ;;  %v1861_v56 = vsel %vm1860_vm2, 1, %v3390_v3  ;;  %v1977_v40 = vsel %vm1976_vm3, 1, %v3390_v3 }
 0x5d5   : > { %1863 = vperm.xlu0 %2999, %v1861_v56  }
 0x5d6   : > { %v4104_v46 = vadd.f32 %v3162_v29, %v1857_v39 }
 0x5d8   : > { %v1871_v61 = vpack.c.bf16 %v4104_v46, %v4104_v46 }
 0x5d9   : > { %1979 = vperm.xlu0 %2999, %v1977_v40  }
 0x5da   : > { %1905 = vmatmul.mubr.bf16.vlgmr.msra.gmra.mrb[28].mxu0 %v1871_v61  ;;  %2848 = vmatmul.mubr.bf16.vlgmr.msra.gmra.mrb[36].mxu1 %v1871_v61 }
 0x5db   : > { %1989 = vmatpush1.bf16.msra.mxu0 %v3930_v8  ;;  %2852 = vmatpush3.bf16.msra.mxu1 %v3991_v57 }
 0x5dc   : > { %1990 = vmatprep.subr.bf16.mxu0 %v3934_v10  ;;  %2853 = vmatprep.subr.bf16.mxu1 %v3391_v21 }
 0x5dd   : > { %2020 = vmatprep.mubr.bf16.mxu0 %v3390_v3  ;;  %2867 = vmatprep.mubr.msk.bf16.mxu1 %vm3392_vm1, %v3391_v21 }
 0x5df   : > { %1991 = vmatpush1.bf16.msra.mxu0 %v3936_v13  ;;  %2854 = vmatpush3.bf16.msra.mxu1 %v3995_v60 }
 0x5e0   : > { %1992 = vmatprep.subr.bf16.mxu0 %v3940_v18  ;;  %2855 = vmatprep.subr.bf16.mxu1 %v3391_v21 }
 0x5e3   : > { %1993 = vmatpush1.bf16.msra.mxu0 %v3942_v37  ;;  %2856 = vmatpush3.bf16.msra.mxu1 %v4006_v4 }
 0x5e4   : > { %1994 = vmatprep.subr.bf16.mxu0 %v3944_v7  ;;  %2857 = vmatprep.subr.bf16.mxu1 %v3391_v21 }
 0x5e7   : > { %1995 = vmatpush1.bf16.msra.mxu0 %v3948_v9  ;;  %2858 = vmatpush3.bf16.msra.mxu1 %v4010_v1 }
 0x5e8   : > { %1996 = vmatprep.subr.bf16.mxu0 %v3951_v12  ;;  %2859 = vmatprep.subr.bf16.mxu1 %v3391_v21 }
 0x5eb   : > { %1997 = vmatpush1.bf16.msra.mxu0 %v3954_v14  ;;  %2860 = vmatpush3.bf16.msra.mxu1 %v4017_v47 }
 0x5ec   : > { %1998 = vmatprep.subr.bf16.mxu0 %v3957_v16  ;;  %2861 = vmatprep.subr.bf16.mxu1 %v3391_v21 }
 0x5ef   : > { %1999 = vmatpush1.bf16.msra.mxu0 %v3960_v19  ;;  %2862 = vmatpush3.bf16.msra.mxu1 %v4023_v49 }
 0x5f0   : > { %2000 = vmatprep.subr.bf16.mxu0 %v3965_v20  ;;  %2863 = vmatprep.subr.bf16.mxu1 %v3391_v21 }
 0x5f3   : > { %2001 = vmatpush1.bf16.msra.mxu0 %v3967_v22  ;;  %2864 = vmatpush3.bf16.msra.mxu1 %v4029_v17 }
 0x5f4   : > { %2002 = vmatprep.subr.bf16.mxu0 %v3971_v23  ;;  %2865 = vmatprep.subr.bf16.mxu1 %v3391_v21 }
 0x5f7   : > { %2003 = vmatpush1.bf16.msra.mxu0 %v3974_v24  ;;  %2866 = vmatpush3.bf16.msra.mxu1 %v4035_v5 }
 0x5f8   : > { %2104 = vmatprep.subr.bf16.mxu0 %v3928_v6  ;;  %2871 = vmatprep.subr.bf16.mxu1 %v3391_v21  ;;  %v1509_v6 = vadd.f32 %v3986_v42, %v4081_v34 }
 0x6ad   : > { %v1906_v44 = vpop.f32.mrb[28].mxu0  ;;  %v1947_v38 = vpop.f32.mrb[36].mxu1 }
 0x6ae   : > { %v1953_v41 = vadd.f32 %v1906_v44, %v1509_v6  ;;  %v1908_v31 = vpop.f32.mrb[29].mxu0  ;;  %v2849_v50 = vpop.f32.mrb[37].mxu1  ;;  %v1967_v43 = vadd.f32 %v4100_v58, %v1947_v38 }
 0x6af   : > { %v1960_v45 = vadd.f32 %v1908_v31, %v1511_v48  ;;  %v1910_v52 = vpop.f32.mrb[30].mxu0  ;;  %v1950_v55 = vpop.f32.mrb[38].mxu1  ;;  %v3107_v50 = vld [vmem:[%s4318_s10] sm:$0xff]  }
 0x6b0   : > { %v2580_v0 = vmul.f32 -1.442695, %v1953_v41  ;;  %v1911_v63 = vpop.f32.mrb[31].mxu0  ;;  %v2850_v11 = vpop.f32.mrb[39].mxu1  ;;  %v3109_v52 = vld [vmem:[%s4318_s10 + $0x10] sm:$0xff]   ;;  %v3111_v55 = vld [vmem:[%s4318_s10 + $0x20] sm:$0xff]  }
 0x6b1   : > { %v2581_v26 = vmul.f32 -1.442695, %v1960_v45  ;;  %v3108_v45 = vld [vmem:[%s4318_s10 + $0x8] sm:$0xff]   ;;  %v3113_v63 = vld [vmem:[%s4318_s10 + $0x30] sm:$0xff]   ;;  %v3114_v11 = vld [vmem:[%s4318_s10 + $0x38] sm:$0xff]  }
 0x6b2   : > { %3165 = vpow2.f32 %v2580_v0  ;;  %v3112_v0 = vld [vmem:[%s4318_s10 + $0x28] sm:$0xff]  }
 0x6b3   : > { %3167 = vpow2.f32 %v2581_v26  ;;  %v1519_v26 = vadd.f32 %v4077_v32, %v4081_v34 }
 0x6bc   : > { %v3166_v33 = vpop.eup %3165 }
 0x6bd   : > { %v1957_v53 = vadd.f32 1.0, %v3166_v33  ;;  %v3168_v42 = vpop.eup %3167  ;;  %v1521_v33 = vadd.f32 %v4085_v36, %v4089_v51 }
 0x6be   : > { %v1964_v39 = vadd.f32 1.0, %v3168_v42 }
 0x6bf   : > { %3169 = vrcp.f32 %v1957_v53 }
 0x6c9   : > { %v3170_v29 = vpop.eup %3169 }
 0x6ca   : > { %v1968_v59 = vmul.f32 %v3170_v29, %v1967_v43 }
 0x6cc   : > { %v1969_v62 = vadd.f32 %v1968_v59, %v4091_v54 }
 0x6ce   : > { %3171 = vtanh.f32 %v1969_v62 }
 0x6cf   : > { %3173 = vrcp.f32 %v1964_v39 }
 0x6d8   : > { %v3172_v61 = vpop.eup %3171 }
 0x6d9   : > { %v1971_v15 = vsub.f32 %v4104_v46, %v3172_v61  ;;  %v3174_v30 = vpop.eup %3173 }
 0x6db   : > { %v1972_v56 = vmul.f32 %v3174_v30, %v1971_v15 }
 0x6dd   : > { %v4161_v40 = vadd.f32 %v3172_v61, %v1972_v56 }
 0x6df   : > { %v1987_v6 = vpack.c.bf16 %v4161_v40, %v4161_v40 }
 0x6e1   : > { %2021 = vmatmul.mubr.bf16.vlgmr.msra.gmra.mrb[32].mxu0 %v1987_v6  ;;  %2868 = vmatmul.mubr.bf16.vlgmr.msra.gmra.mrb[40].mxu1 %v1987_v6 }
 0x6e2   : > { %2105 = vmatpush1.bf16.msra.mxu0 %v3930_v8  ;;  %2872 = vmatpush3.bf16.msra.mxu1 %v3991_v57  ;;  %v2091_v8 = vstv %s2090_s21  ;;  %s3313_s21 = scalar_lea.vmem %s3312_s23, 1024 }
 0x6e3   : > { %2106 = vmatprep.subr.bf16.mxu0 %v3934_v10  ;;  %2873 = vmatprep.subr.bf16.mxu1 %v3391_v21  ;;  %v2207_v10 = vstv %s2206_s24  ;;  %vm2092_vm4 = vcmp.gt.s32.totalorder %v4146_v2, %v2091_v8  ;;  %p3315_p5 = scmp.lt.s32.totalorder %s3313_s21, %s3307_s18 }
 0x6e4   : > { %2136 = vmatprep.mubr.bf16.mxu0 %v3390_v3  ;;  %2887 = vmatprep.mubr.msk.bf16.mxu1 %vm3392_vm1, %v3391_v21  ;;  %vm2208_vm5 = vcmp.gt.s32.totalorder %v4146_v2, %v2207_v10 }
 0x6e5   : > { %p3316_p1 = por %p3315_p5, %p3314_p9 }
 0x6e6   : > { %2107 = vmatpush1.bf16.msra.mxu0 %v3936_v13  ;;  %2874 = vmatpush3.bf16.msra.mxu1 %v3995_v60  ;;  %v2093_v13 = vsel %vm2092_vm4, 1, %v3390_v3 }
 0x6e7   : > { %2108 = vmatprep.subr.bf16.mxu0 %v3940_v18  ;;  %2875 = vmatprep.subr.bf16.mxu1 %v3391_v21  ;;  %v2209_v18 = vsel %vm2208_vm5, 1, %v3390_v3  ;;  %p3317_p11 = pnand %p3316_p1, %p3310_p6 }
 0x6e8   : > { %2095 = vperm.xlu1 %3000, %v2093_v13  }
 0x6ea   : > { %2109 = vmatpush1.bf16.msra.mxu0 %v3942_v37  ;;  %2876 = vmatpush3.bf16.msra.mxu1 %v4006_v4  ;;  %v1517_v37 = vadd.f32 %v4075_v28, %v4089_v51  ;;  %v1864_v28 = vpop.permute.xlu0 %1863 }
 0x6eb   : > { %2110 = vmatprep.subr.bf16.mxu0 %v3944_v7  ;;  %2877 = vmatprep.subr.bf16.mxu1 %v3391_v21  ;;  %vm1865_vm6 = vcmp.eq.s32.totalorder %v1864_v28, 1 }
 0x6ec   : > { %2211 = vperm.xlu1 %3000, %v2209_v18  }
 0x6ee   : > { %2111 = vmatpush1.bf16.msra.mxu0 %v3948_v9  ;;  %2878 = vmatpush3.bf16.msra.mxu1 %v4010_v1  ;;  %v1980_v2 = vpop.permute.xlu0 %1979 }
 0x6ef   : > { %2112 = vmatprep.subr.bf16.mxu0 %v3951_v12  ;;  %2879 = vmatprep.subr.bf16.mxu1 %v3391_v21  ;;  %vm1981_vm7 = vcmp.eq.s32.totalorder %v1980_v2, 1 }
 0x6f0   : > { %vm2601_vm8 = vmpackc.low %vm1981_vm7, %vm1865_vm6 }
 0x6f2   : > { %2113 = vmatpush1.bf16.msra.mxu0 %v3954_v14  ;;  %2880 = vmatpush3.bf16.msra.mxu1 %v4017_v47 }
 0x6f3   : > { %2114 = vmatprep.subr.bf16.mxu0 %v3957_v16  ;;  %2881 = vmatprep.subr.bf16.mxu1 %v3391_v21 }
 0x6f6   : > { %2115 = vmatpush1.bf16.msra.mxu0 %v3960_v19  ;;  %2882 = vmatpush3.bf16.msra.mxu1 %v4023_v49 }
 0x6f7   : > { %2116 = vmatprep.subr.bf16.mxu0 %v3965_v20  ;;  %2883 = vmatprep.subr.bf16.mxu1 %v3391_v21 }
 0x6fa   : > { %2117 = vmatpush1.bf16.msra.mxu0 %v3967_v22  ;;  %2884 = vmatpush3.bf16.msra.mxu1 %v4029_v17 }
 0x6fb   : > { %2118 = vmatprep.subr.bf16.mxu0 %v3971_v23  ;;  %2885 = vmatprep.subr.bf16.mxu1 %v3391_v21  ;;  %v1515_v21 = vadd.f32 %v4071_v25, %v4081_v34 }
 0x6fe   : > { %2119 = vmatpush1.bf16.msra.mxu0 %v3974_v24  ;;  %2886 = vmatpush3.bf16.msra.mxu1 %v4035_v5 }
 0x6ff   : > { %2891 = vmatprep.subr.bf16.mxu0 %v3107_v50 }
 0x767   : > { %v2096_v18 = vpop.permute.xlu1 %2095 }
 0x768   : > { %vm2097_vm9 = vcmp.eq.s32.totalorder %v2096_v18, 1 }
 0x7b4   : > { %v2022_v7 = vpop.f32.mrb[32].mxu0  ;;  %v2063_v9 = vpop.f32.mrb[40].mxu1 }
 0x7b5   : > { %v2069_v12 = vadd.f32 %v2022_v7, %v1515_v21  ;;  %v2024_v14 = vpop.f32.mrb[33].mxu0  ;;  %v2869_v16 = vpop.f32.mrb[41].mxu1  ;;  %v2083_v47 = vadd.f32 %v4100_v58, %v2063_v9 }
 0x7b6   : > { %v2076_v19 = vadd.f32 %v2024_v14, %v1517_v37  ;;  %v2026_v20 = vpop.f32.mrb[34].mxu0  ;;  %v2066_v22 = vpop.f32.mrb[42].mxu1 }
 0x7b7   : > { %v2582_v23 = vmul.f32 -1.442695, %v2069_v12  ;;  %v2027_v24 = vpop.f32.mrb[35].mxu0  ;;  %v2870_v57 = vpop.f32.mrb[43].mxu1 }
 0x7b8   : > { %v2583_v3 = vmul.f32 -1.442695, %v2076_v19  ;;  %v2212_v9 = vpop.permute.xlu1 %2211 }
 0x7b9   : > { %3175 = vpow2.f32 %v2582_v23  ;;  %vm2213_vm10 = vcmp.eq.s32.totalorder %v2212_v9, 1 }
 0x7ba   : > { %3177 = vpow2.f32 %v2583_v3  ;;  %vm2604_vm11 = vmpackc.low %vm2213_vm10, %vm2097_vm9 }
 0x7c3   : > { %v3176_v60 = vpop.eup %3175 }
 0x7c4   : > { %v2073_v4 = vadd.f32 1.0, %v3176_v60  ;;  %v3178_v1 = vpop.eup %3177 }
 0x7c5   : > { %v2080_v25 = vadd.f32 1.0, %v3178_v1 }
 0x7c6   : > { %3179 = vrcp.f32 %v2073_v4 }
 0x7d0   : > { %v3180_v49 = vpop.eup %3179 }
 0x7d1   : > { %v2084_v17 = vmul.f32 %v3180_v49, %v2083_v47 }
 0x7d3   : > { %v2085_v5 = vadd.f32 %v2084_v17, %v4073_v27  ;;  %v2602_v27 = vpack.c.bf16 %v4161_v40, %v4104_v46  ;;  %v3110_v46 = vld [vmem:[%s4318_s10 + $0x18] sm:$0xff]  }
 0x7d5   : > { %3181 = vtanh.f32 %v2085_v5 }
 0x7d6   : > { %3183 = vrcp.f32 %v2080_v25 }
 0x7df   : > { %v3182_v54 = vpop.eup %3181 }
 0x7e0   : > { %v2087_v48 = vsub.f32 %v4161_v40, %v3182_v54  ;;  %v3184_v44 = vpop.eup %3183 }
 0x7e2   : > { %v2088_v38 = vmul.f32 %v3184_v44, %v2087_v48 }
 0x7e4   : > { %v4211_v41 = vadd.f32 %v3182_v54, %v2088_v38 }
 0x7e6   : > { %v2103_v31 = vpack.c.bf16 %v4211_v41, %v4211_v41 }
 0x7e8   : > { %2137 = vmatmul.mubr.bf16.vlgmr.msra.gmra.mrb[36].mxu0 %v2103_v31  ;;  %2888 = vmatmul.mubr.bf16.vlgmr.msra.gmra.mrb[44].mxu1 %v2103_v31 }
 0x7e9   : > { %2907 = vmatprep.mubr.msk.bf16.mxu0 %vm2601_vm8, %v2602_v27  ;;  %2892 = vmatpush3.bf16.msra.mxu0 %v3107_v50 }
 0x7ea   : > { %2893 = vmatprep.subr.bf16.mxu0 %v3108_v45 }
 0x7ed   : > { %2894 = vmatpush3.bf16.msra.mxu0 %v3108_v45 }
 0x7ee   : > { %2895 = vmatprep.subr.bf16.mxu0 %v3109_v52 }
 0x7f1   : > { %2896 = vmatpush3.bf16.msra.mxu0 %v3109_v52 }
 0x7f2   : > { %2897 = vmatprep.subr.bf16.mxu0 %v3110_v46 }
 0x7f5   : > { %2898 = vmatpush3.bf16.msra.mxu0 %v3110_v46 }
 0x7f6   : > { %2899 = vmatprep.subr.bf16.mxu0 %v3111_v55 }
 0x7f9   : > { %2900 = vmatpush3.bf16.msra.mxu0 %v3111_v55 }
 0x7fa   : > { %2901 = vmatprep.subr.bf16.mxu0 %v3112_v0 }
 0x7fd   : > { %2902 = vmatpush3.bf16.msra.mxu0 %v3112_v0 }
 0x7fe   : > { %2903 = vmatprep.subr.bf16.mxu0 %v3113_v63 }
 0x801   : > { %2904 = vmatpush3.bf16.msra.mxu0 %v3113_v63 }
 0x802   : > { %2905 = vmatprep.subr.bf16.mxu0 %v3114_v11 }
 0x805   : > { %2906 = vmatpush3.bf16.msra.mxu0 %v3114_v11 }
 0x8bb   : > { %v2138_v53 = vpop.f32.mrb[36].mxu0  ;;  %v2179_v42 = vpop.f32.mrb[44].mxu1 }
 0x8bc   : > { %v2185_v43 = vadd.f32 %v2138_v53, %v1519_v26  ;;  %v2140_v29 = vpop.f32.mrb[37].mxu0  ;;  %v2889_v59 = vpop.f32.mrb[45].mxu1  ;;  %v2199_v34 = vadd.f32 %v4100_v58, %v2179_v42 }
 0x8bd   : > { %v2192_v62 = vadd.f32 %v2140_v29, %v1521_v33  ;;  %v2142_v39 = vpop.f32.mrb[38].mxu0  ;;  %v2182_v61 = vpop.f32.mrb[46].mxu1 }
 0x8be   : > { %v2584_v15 = vmul.f32 -1.442695, %v2185_v43  ;;  %v2143_v30 = vpop.f32.mrb[39].mxu0  ;;  %v2890_v56 = vpop.f32.mrb[47].mxu1 }
 0x8bf   : > { %v2585_v40 = vmul.f32 -1.442695, %v2192_v62 }
 0x8c0   : > { %3185 = vpow2.f32 %v2584_v15 }
 0x8c1   : > { %3187 = vpow2.f32 %v2585_v40 }
 0x8ca   : > { %v3186_v6 = vpop.eup %3185 }
 0x8cb   : > { %v2189_v8 = vadd.f32 1.0, %v3186_v6  ;;  %v3188_v32 = vpop.eup %3187 }
 0x8cc   : > { %v2196_v13 = vadd.f32 1.0, %v3188_v32 }
 0x8cd   : > { %3189 = vrcp.f32 %v2189_v8 }
 0x8d7   : > { %v3190_v36 = vpop.eup %3189 }
 0x8d8   : > { %v2200_v51 = vmul.f32 %v3190_v36, %v2199_v34 }
 0x8da   : > { %v2201_v10 = vadd.f32 %v2200_v51, %v4083_v35  ;;  %v2586_v35 = vld [vmem:[%s4319_s11] ss:$0 sm:$0xff] }
 0x8dc   : > { %3191 = vtanh.f32 %v2201_v10 }
 0x8dd   : > { %3193 = vrcp.f32 %v2196_v13 }
 0x8e6   : > { %v3192_v21 = vpop.eup %3191 }
 0x8e7   : > { %v2203_v37 = vsub.f32 %v4211_v41, %v3192_v21  ;;  %v3194_v7 = vpop.eup %3193 }
 0x8e9   : > { %v2204_v12 = vmul.f32 %v3194_v7, %v2203_v37 }
 0x8eb   : > { %v2205_v58 = vadd.f32 %v3192_v21, %v2204_v12 }
 0x8ed   : > { %2216 = vst [vmem:[#allocation4 + $0x8] sm:$0xff] %v2205_v58  ;;  %v2605_v14 = vpack.c.bf16 %v2205_v58, %v4211_v41 }
 0x8ef   : > { %2908 = vmatmul.mubr.msk.bf16.vlgmr.msra.gmra.mrb[40].mxu0 %vm2604_vm11, %v2605_v14 }
 0x9c2   : > { %v2909_v16 = vpop.f32.mrb[40].mxu0 }
 0x9c3   : > { %v2337_v19 = vadd.f32 %v2909_v16, %v2586_v35  ;;  %v2328_v20 = vpop.f32.mrb[41].mxu0 }
 0x9c4   : > { %v2329_v22 = vadd.f32 %v2586_v35, %v2328_v20  ;;  %v2910_v23 = vpop.f32.mrb[42].mxu0 }
 0x9c5   : > { %2345 = vst [vmem:[%s3657_s29 + $0x10] sm:$0xff] %v2337_v19  ;;  %v2340_v24 = vadd.f32 %v2910_v23, %v2586_v35  ;;  %v2331_v57 = vpop.f32.mrb[43].mxu0 }
 0x9c6   : > { %2343 = vst [vmem:[%s3657_s29] sm:$0xff] %v2329_v22  ;;  %v2332_v3 = vadd.f32 %v2586_v35, %v2331_v57 }
 0x9c7   : > { %2346 = vst [vmem:[%s3657_s29 + $0x18] sm:$0xff] %v2340_v24 }
 0x9c8   : > { %2344 = vst [vmem:[%s3657_s29 + $0x8] sm:$0xff] %v2332_v3 }
 0x9c9   : > { %3320 = shalt.err (!%p3317_p11)
}
 0x9ca   : > { %s3321_s14 = scalar_lea.hbm %s4258_s12, 512  ;;  %s3325_s15 = scalar_lea.hbm %s4355_s20, 1024 }
 0x9cb   : > { %p3322_p10 = scmp.ne.s32.totalorder %s4258_s12, %s3321_s14  ;;  %p3326_p13 = scmp.lt.u32.totalorder %s4258_s12, %s4355_s20 }
 0x9cc   : > { %p3327_p7 = scmp.lt.u32.totalorder %s3325_s15, %s3321_s14  ;;  %p3329_p12 = scmp.lt.u32.totalorder %s3321_s14, %s4258_s12 }
 0x9cd   : > { %p3323_p3 = pnand %p3322_p10, %p4356_p0 }
 0x9ce   : > { %p3328_p8 = por %p3327_p7, %p3326_p13 }
 0x9cf   : > { %p3324_p4 = pneg %p3323_p3 }
 0x9d0   : > { %p3330_p2 = por %p3329_p12, %p3328_p8 }
 0x9d2   : > { %p3331_p6 = pnand %p3330_p2, %p3324_p4 }
 0x9d4   : > { %3334 = shalt.err (!%p3331_p6)
}
 0x9d5   : > { %s3394_s19 = smov 128   ;;  %s3395_s17 = smov 8  }
 0x9d6   : > { %2927 = dma.vmem_to_hbm [thread:$0]  (%p4356_p0), %s4260_s26, 512, %s4258_s12, %s4267_s25, %s3394_s19, %s3394_s19, %s3395_s17  }
 0x9d7 PF: > { %s4357_s28 = sld [smem:[#allocation20_spill]]  ;;  %s4358_s18 = sld [smem:[#allocation18_spill]] }
 0x9d8   : > { %s4359_s30 = sld [smem:[#allocation24_spill]] }
 0x9dd   : > { %p2954_p9 = scmp.ge.s32.totalorder %s4357_s28, 2  ;;  %s2376_s23 = sand.u32 1, %s4358_s18  }
 0x9de   : > { %p4360_p5 = scmp.ne.s32.totalorder %s4359_s30, 0  ;;  %s2377_s21 = scalar_lea.sflag [#allocation7], %s2376_s23 }
 0x9e0   : > { %p2943_p1 = pnand %p2954_p9, %p4360_p5 }
 0x9e2   : > { %3364 = dma.done.wait (!%p2943_p1), %s2377_s21, 512  }
 0x9e3   : > { %3366 = vsyncadd (!%p2943_p1), %s2377_s21, 4294966784  ;;  %s4361_s24 = sld [smem:[#allocation21_spill]]  ;;  %s4362_s14 = sld [smem:[#allocation19_spill]] }
 0x9e4   : > { %s4363_s23 = sld [smem:[#allocation22_spill]]  ;;  %s4364_s21 = smov %s3373_s22 }
 0x9e9   : > { %p25_p11 = scmp.ge.s32.totalorder %s4361_s24, 4   ;;  %s4365_s22 = smov %s4362_s14 }
 0x9eb   :  { %27 = sbr.rel (!%p25_p11) target bundleno = 8 (0x8), region = 132 }
 0x9f2   :  { %2382 = vsyncpa [#allocation6], 1 }
 0x9f3   :  { %2384 = vsyncpa [#allocation6 + $0x1], 1 }
 0x9f4   :  { %2385 = vsyncpa [#allocation9], 1 }
 0x9f5   :  { %2386 = vsyncpa [#allocation12], 1 }
 0x9f6   :  { %2387 = vsyncpa [#allocation7], 1 }
 0x9f7   :  { %2389 = vsyncpa [#allocation7 + $0x1], 1 }

</bundles_post_ra>
